<compile_context>
chip_gen: v7x
topology: tpu7x:2x2x1
jax: 0.10.0
libtpu: 0.0.40
codegen_flags: <defaults>
</compile_context>

<pallas_src>
import functools

import jax
import jax.numpy as jnp
from jax.experimental import pallas as pl
from jax.experimental.pallas import tpu as pltpu


def _window_attn_kernel(x_ref, wqkv_ref, bqkv_ref, pos_ref, wproj_ref,
                        bproj_ref, o_ref, *, num_heads):
    """One grid step processes WB windows.

    x_ref:    (WB, N, C)      tokens for WB windows
    wqkv_ref: (C, 3C)         QKV weight (transposed; Q columns pre-scaled)
    bqkv_ref: (1, 3C)         QKV bias   (Q slice pre-scaled)
    pos_ref:  (H, WB, N, N)   relative-position bias + window mask (combined)
    wproj_ref:(C, C)          output projection weight (transposed)
    bproj_ref:(1, C)          output projection bias
    o_ref:    (WB, N, C)      output
    """
    wb, n, c = x_ref.shape
    hd = c // num_heads

    # --- QKV projection: one (WB*N, C) @ (C, 3C) MXU matmul -----------------
    x2 = x_ref[...].reshape(wb * n, c)                       # leading-dim merge
    qkv = jnp.dot(x2, wqkv_ref[...], preferred_element_type=jnp.float32)
    qkv = qkv + bqkv_ref[0]                                  # (WB*N, 3C)

    q = qkv[:, 0 * c:1 * c].reshape(wb, n, c)                # already scaled
    k = qkv[:, 1 * c:2 * c].reshape(wb, n, c)
    v = qkv[:, 2 * c:3 * c].reshape(wb, n, c)

    # --- per-head attention + accumulated output projection -----------------
    # out @ Wproj == sum_h out_h @ Wproj[h*hd:(h+1)*hd, :]  (no lane concat)
    y = jnp.zeros((wb * n, c), jnp.float32)
    for h in range(num_heads):                               # static unroll
        sl = slice(h * hd, (h + 1) * hd)
        qh, kh, vh = q[..., sl], k[..., sl], v[..., sl]      # (WB, N, hd)

        # window-batched QK^T: (WB, N, hd) x (WB, N, hd) -> (WB, N, N)
        attn = jnp.einsum('bnd,bmd->bnm', qh, kh,
                          preferred_element_type=jnp.float32)
        attn = attn + pos_ref[h]                             # bias + mask (fused)

        # numerically-stable softmax; reciprocal runs on the EUP, not the VALU
        attn = attn - jnp.max(attn, axis=-1, keepdims=True)
        p = jnp.exp(attn)
        denom = jnp.sum(p, axis=-1, keepdims=True)
        p = p * pl.reciprocal(denom, approx=True)

        # window-batched attn @ V: (WB, N, N) x (WB, N, hd) -> (WB, N, hd)
        oh = jnp.einsum('bnm,bmd->bnd', p, vh,
                        preferred_element_type=jnp.float32)

        # per-head slice of the output projection (sublane-aligned row slice)
        y = y + jnp.dot(oh.reshape(wb * n, hd), wproj_ref[sl, :],
                        preferred_element_type=jnp.float32)

    y = y + bproj_ref[0]
    o_ref[...] = y.reshape(wb, n, c).astype(o_ref.dtype)


def _pick_block_windows(B_, max_wb=16):
    """Largest divisor of B_ that is <= max_wb and keeps >=2 grid steps (v7x)."""
    limit = min(max_wb, max(B_ // 2, 1))
    wb = 1
    for cand in range(1, limit + 1):
        if B_ % cand == 0:
            wb = cand
    return wb


def window_attention_pallas(x, mask, wqkv_t, bqkv, rel_bias, wproj_t, bproj,
                            num_heads, block_windows=None):
    """x: (B_, N, C); mask: (nW, N, N) or None; rel_bias: (num_heads, N, N).
    wqkv_t: (C, 3C); bqkv: (3C,); wproj_t: (C, C); bproj: (C,)."""
    B_, N, C = x.shape
    assert C % num_heads == 0
    head_dim = C // num_heads
    scale = head_dim ** (-0.5)

    if mask is None:
        mask = jnp.zeros((1, N, N), dtype=x.dtype)
    nW = mask.shape[0]

    wb = _pick_block_windows(B_) if block_windows is None else block_windows
    assert B_ % wb == 0, "block_windows must divide num_windows * batch"
    grid = (B_ // wb,)

    # Fold 1/sqrt(head_dim) into the Q columns of the QKV weight and bias
    # (one-time parameter transform; removes the per-token scale multiply).
    col_scale = jnp.concatenate(
        [jnp.full((C,), scale, dtype=wqkv_t.dtype),
         jnp.ones((2 * C,), dtype=wqkv_t.dtype)])
    wqkv_s = wqkv_t * col_scale[None, :]
    bqkv_s = (bqkv * col_scale).reshape(1, 3 * C)
    bproj2 = bproj.reshape(1, C)

    # Combine relative-position bias and window mask into one additive tensor.
    # Window index for global window b is b % nW.  If WB covers whole
    # repetitions of the nW pattern, the combined tensor is the same for every
    # grid step -> build it once as (H, WB, N, N) and keep it VMEM-resident
    # via a constant index_map; otherwise expand per window and stream a
    # matching (H, WB, N, N) slab each step.
    if wb % nW == 0:
        mask_tiled = jnp.tile(mask, (wb // nW, 1, 1))                # (WB, N, N)
        pos = rel_bias[:, None, :, :] + mask_tiled[None]             # (H,WB,N,N)
        pos_spec = pl.BlockSpec((num_heads, wb, N, N), lambda b: (0, 0, 0, 0))
    else:
        mask_full = mask[jnp.arange(B_) % nW]                        # (B_, N, N)
        pos = rel_bias[:, None, :, :] + mask_full[None]              # (H,B_,N,N)
        pos_spec = pl.BlockSpec((num_heads, wb, N, N), lambda b: (0, b, 0, 0))

    # Explicit VMEM budget: double-buffered streamed blocks + resident params,
    # with a generous margin for in-kernel temporaries (qkv, q/k/v, per-head
    # attention tiles, projection accumulator).
    itemsize = 4  # f32
    per_step = 2 * wb * N * C                                # x block + out block
    if wb % nW != 0:
        per_step += num_heads * wb * N * N                   # streamed pos block
    resident = C * 3 * C + 3 * C + C * C + C
    if wb % nW == 0:
        resident += num_heads * wb * N * N                   # resident pos
    vmem_bytes = int(min(max(8 * itemsize * (2 * per_step + resident),
                             8 * 1024 * 1024),
                         32 * 1024 * 1024))

    kernel = functools.partial(_window_attn_kernel, num_heads=num_heads)

    return pl.pallas_call(
        kernel,
        out_shape=jax.ShapeDtypeStruct((B_, N, C), x.dtype),
        grid_spec=pltpu.PrefetchScalarGridSpec(
            num_scalar_prefetch=0,
            grid=grid,
            in_specs=[
                pl.BlockSpec((wb, N, C), lambda b: (b, 0, 0)),          # x
                pl.BlockSpec((C, 3 * C), lambda b: (0, 0)),             # Wqkv^T
                pl.BlockSpec((1, 3 * C), lambda b: (0, 0)),             # bqkv
                pos_spec,                                               # bias+mask
                pl.BlockSpec((C, C), lambda b: (0, 0)),                 # Wproj^T
                pl.BlockSpec((1, C), lambda b: (0, 0)),                 # bproj
            ],
            out_specs=pl.BlockSpec((wb, N, C), lambda b: (b, 0, 0)),
        ),
        compiler_params=pltpu.CompilerParams(
            dimension_semantics=("parallel",),
            vmem_limit_bytes=vmem_bytes),
    )(x, wqkv_s, bqkv_s, pos, wproj_t, bproj2)


def make_relative_position_index(Wh, Ww):
    coords_h = jnp.arange(Wh)
    coords_w = jnp.arange(Ww)
    coords = jnp.stack(jnp.meshgrid(coords_h, coords_w, indexing="ij"))  # (2,Wh,Ww)
    coords_flatten = coords.reshape(2, -1)                               # (2, N)
    rel = coords_flatten[:, :, None] - coords_flatten[:, None, :]        # (2,N,N)
    rel = rel.transpose(1, 2, 0)                                         # (N,N,2)
    rel = rel.at[:, :, 0].add(Wh - 1)
    rel = rel.at[:, :, 1].add(Ww - 1)
    rel = rel.at[:, :, 0].multiply(2 * Ww - 1)
    return rel.sum(-1)                                                   # (N,N)


def reference_jax(x, mask, wqkv_t, bqkv, rel_bias, wproj_t, bproj, num_heads):
    B_, N, C = x.shape
    nW = mask.shape[0]
    hd = C // num_heads
    scale = hd ** (-0.5)
    qkv = x @ wqkv_t + bqkv                                  # (B_, N, 3C)
    qkv = qkv.reshape(B_, N, 3, num_heads, hd).transpose(2, 0, 3, 1, 4)
    q, k, v = qkv[0], qkv[1], qkv[2]                         # (B_, H, N, hd)
    q = q * scale
    attn = q @ k.transpose(0, 1, 3, 2)                       # (B_, H, N, N)
    attn = attn + rel_bias[None]
    attn = attn.reshape(B_ // nW, nW, num_heads, N, N) + mask[None, :, None]
    attn = attn.reshape(B_, num_heads, N, N)
    attn = jax.nn.softmax(attn, axis=-1)
    out = (attn @ v).transpose(0, 2, 1, 3).reshape(B_, N, C)
    return out @ wproj_t + bproj


if __name__ == "__main__":
    # Module config (small): dim=32, window_size=(4,4) -> N=16, num_heads=4
    dim = 32
    window_size = (4, 4)
    num_heads = 4
    N = window_size[0] * window_size[1]
    batch = 4
    nW = 4
    B_ = batch * nW  # num_windows * B = 16  -> WB=8, grid=(2,)

    key = jax.random.PRNGKey(0)
    k_x, k_tab, k_wqkv, k_bqkv, k_wproj, k_bproj, k_mask = jax.random.split(key, 7)

    # Deterministic "parameters" (matching the nn.Module's shapes).
    x = jax.random.normal(k_x, (B_, N, dim), dtype=jnp.float32)
    rel_table = 0.02 * jax.random.normal(
        k_tab, ((2 * window_size[0] - 1) * (2 * window_size[1] - 1), num_heads),
        dtype=jnp.float32)
    # nn.Linear weight is (out, in); we pass the transposed (in, out) version.
    wqkv_t = 0.05 * jax.random.normal(k_wqkv, (dim, 3 * dim), dtype=jnp.float32)
    bqkv = 0.05 * jax.random.normal(k_bqkv, (3 * dim,), dtype=jnp.float32)
    wproj_t = 0.05 * jax.random.normal(k_wproj, (dim, dim), dtype=jnp.float32)
    bproj = 0.05 * jax.random.normal(k_bproj, (dim,), dtype=jnp.float32)

    # Relative position bias gather (glue, same as the PyTorch buffer logic).
    rel_index = make_relative_position_index(*window_size)          # (N, N)
    rel_bias = rel_table[rel_index.reshape(-1)].reshape(N, N, num_heads)
    rel_bias = rel_bias.transpose(2, 0, 1)                           # (H, N, N)

    # SW-MSA-style 0 / -100 attention mask per window (deterministic).
    mask = jnp.where(jax.random.uniform(k_mask, (nW, N, N)) > 0.5,
                     0.0, -100.0).astype(jnp.float32)

    # Dropout layers (attn_drop / proj_drop) default to p=0.0 -> identity.
    out = window_attention_pallas(x, mask, wqkv_t, bqkv, rel_bias,
                                  wproj_t, bproj, num_heads)
    out = jax.block_until_ready(out)

    ref = reference_jax(x, mask, wqkv_t, bqkv, rel_bias, wproj_t, bproj,
                        num_heads)
    assert out.shape == (B_, N, dim)
    # Tolerance slightly looser than f32-exact because the kernel uses the
    # hardware approximate reciprocal (EUP vrcp) for the softmax denominator.
    assert jnp.allclose(out, ref, rtol=1e-3, atol=1e-3), "mismatch vs reference"

    print("KERNEL_OK")
</pallas_src>

<mosaic_0001>
module attributes {stable_mosaic.version = 11 : i64} {
  func.func @_window_attn_kernel(%arg0: i32, %arg1: memref<8x16x32xf32, #tpu.memory_space<vmem>>, %arg2: memref<32x96xf32, #tpu.memory_space<vmem>>, %arg3: memref<1x96xf32, #tpu.memory_space<vmem>>, %arg4: memref<4x8x16x16xf32, #tpu.memory_space<vmem>>, %arg5: memref<32x32xf32, #tpu.memory_space<vmem>>, %arg6: memref<1x32xf32, #tpu.memory_space<vmem>>, %arg7: memref<8x16x32xf32, #tpu.memory_space<vmem>>) attributes {dimension_semantics = [#tpu.dimension_semantics<parallel>], iteration_bounds = array<i64: 2>, scalar_prefetch = 0 : i64, scratch_operands = 0 : i64, tpu.core_type = #tpu.core_type<tc>, window_params = [{transform_indices = @transform_0, window_bounds = array<i64: 8, 16, 32>}, {pipeline_mode = #tpu.pipeline_mode<synchronous>, transform_indices = @transform_1, window_bounds = array<i64: 32, 96>}, {pipeline_mode = #tpu.pipeline_mode<synchronous>, transform_indices = @transform_2, window_bounds = array<i64: 1, 96>}, {pipeline_mode = #tpu.pipeline_mode<synchronous>, transform_indices = @transform_3, window_bounds = array<i64: 4, 8, 16, 16>}, {pipeline_mode = #tpu.pipeline_mode<synchronous>, transform_indices = @transform_4, window_bounds = array<i64: 32, 32>}, {pipeline_mode = #tpu.pipeline_mode<synchronous>, transform_indices = @transform_5, window_bounds = array<i64: 1, 32>}, {transform_indices = @transform_6, window_bounds = array<i64: 8, 16, 32>}]} {
    %c0 = arith.constant 0 : index
    %c0_0 = arith.constant 0 : index
    %c0_1 = arith.constant 0 : index
    %0 = vector.load %arg1[%c0, %c0_0, %c0_1] : memref<8x16x32xf32, #tpu.memory_space<vmem>>, vector<8x16x32xf32>
    %1 = vector.shape_cast %0 : vector<8x16x32xf32> to vector<128x32xf32>
    %c0_2 = arith.constant 0 : index
    %c0_3 = arith.constant 0 : index
    %2 = vector.load %arg2[%c0_2, %c0_3] : memref<32x96xf32, #tpu.memory_space<vmem>>, vector<32x96xf32>
    %cst = arith.constant dense<0.000000e+00> : vector<128x96xf32>
    %3 = tpu.matmul %1, %2, %cst {dimension_numbers = #tpu.dot_dimension_numbers<[1], [0], [0], [1], [0, 0, 1, 1], [], []>} : vector<128x32xf32>, vector<32x96xf32>, vector<128x96xf32> -> vector<128x96xf32>
    %c0_4 = arith.constant 0 : index
    %c0_5 = arith.constant 0 : index
    %4 = vector.load %arg3[%c0_4, %c0_5] : memref<1x96xf32, #tpu.memory_space<vmem>>, vector<1x96xf32>
    %5 = vector.shape_cast %4 : vector<1x96xf32> to vector<96xf32>
    %6 = vector.shape_cast %5 : vector<96xf32> to vector<1x96xf32>
    %7 = vector.broadcast %6 : vector<1x96xf32> to vector<128x96xf32>
    %8 = arith.addf %3, %7 : vector<128x96xf32>
    %9 = vector.extract_strided_slice %8 {offsets = [0, 0], sizes = [128, 32], strides = [1, 1]} : vector<128x96xf32> to vector<128x32xf32>
    %10 = vector.shape_cast %9 : vector<128x32xf32> to vector<8x16x32xf32>
    %11 = vector.extract_strided_slice %8 {offsets = [0, 32], sizes = [128, 32], strides = [1, 1]} : vector<128x96xf32> to vector<128x32xf32>
    %12 = vector.shape_cast %11 : vector<128x32xf32> to vector<8x16x32xf32>
    %13 = vector.extract_strided_slice %8 {offsets = [0, 64], sizes = [128, 32], strides = [1, 1]} : vector<128x96xf32> to vector<128x32xf32>
    %14 = vector.shape_cast %13 : vector<128x32xf32> to vector<8x16x32xf32>
    %cst_6 = arith.constant 0.000000e+00 : f32
    %15 = vector.broadcast %cst_6 : f32 to vector<128x32xf32>
    %16 = vector.extract_strided_slice %10 {offsets = [0, 0, 0], sizes = [8, 16, 8], strides = [1, 1, 1]} : vector<8x16x32xf32> to vector<8x16x8xf32>
    %17 = vector.extract_strided_slice %12 {offsets = [0, 0, 0], sizes = [8, 16, 8], strides = [1, 1, 1]} : vector<8x16x32xf32> to vector<8x16x8xf32>
    %18 = vector.extract_strided_slice %14 {offsets = [0, 0, 0], sizes = [8, 16, 8], strides = [1, 1, 1]} : vector<8x16x32xf32> to vector<8x16x8xf32>
    "tpu.trace_start"() <{level = 10 : i32, message = "bnd,bmd->bnm"}> : () -> ()
    %cst_7 = arith.constant dense<0.000000e+00> : vector<8x16x16xf32>
    %19 = tpu.matmul %16, %17, %cst_7 {dimension_numbers = #tpu.dot_dimension_numbers<[2], [2], [1], [1], [0, 0, 0, 1, 1, 1], [0], [0]>} : vector<8x16x8xf32>, vector<8x16x8xf32>, vector<8x16x16xf32> -> vector<8x16x16xf32>
    "tpu.trace_stop"() : () -> ()
    %c0_8 = arith.constant 0 : index
    %c0_9 = arith.constant 0 : index
    %c0_10 = arith.constant 0 : index
    %c0_11 = arith.constant 0 : index
    %20 = vector.load %arg4[%c0_8, %c0_9, %c0_10, %c0_11] : memref<4x8x16x16xf32, #tpu.memory_space<vmem>>, vector<1x8x16x16xf32>
    %21 = vector.shape_cast %20 : vector<1x8x16x16xf32> to vector<8x16x16xf32>
    %22 = arith.addf %19, %21 : vector<8x16x16xf32>
    %cst_12 = arith.constant dense<0xFF800000> : vector<8x16xf32>
    %23 = vector.multi_reduction <maximumf>, %22, %cst_12 [2] : vector<8x16x16xf32> to vector<8x16xf32>
    %24 = vector.shape_cast %23 : vector<8x16xf32> to vector<8x16x1xf32>
    %25 = vector.broadcast %24 : vector<8x16x1xf32> to vector<8x16x16xf32>
    %26 = arith.subf %22, %25 : vector<8x16x16xf32>
    %27 = math.exp %26 : vector<8x16x16xf32>
    %cst_13 = arith.constant dense<0.000000e+00> : vector<8x16xf32>
    %28 = vector.multi_reduction <add>, %27, %cst_13 [2] : vector<8x16x16xf32> to vector<8x16xf32>
    %29 = vector.shape_cast %28 : vector<8x16xf32> to vector<8x16x1xf32>
    %30 = tpu.reciprocal %29 {approx = true} : vector<8x16x1xf32> -> vector<8x16x1xf32>
    %31 = vector.broadcast %30 : vector<8x16x1xf32> to vector<8x16x16xf32>
    %32 = arith.mulf %27, %31 : vector<8x16x16xf32>
    "tpu.trace_start"() <{level = 10 : i32, message = "bnm,bmd->bnd"}> : () -> ()
    %cst_14 = arith.constant dense<0.000000e+00> : vector<8x16x8xf32>
    %33 = tpu.matmul %32, %18, %cst_14 {dimension_numbers = #tpu.dot_dimension_numbers<[2], [1], [1], [2], [0, 0, 0, 1, 1, 2], [0], [0]>} : vector<8x16x16xf32>, vector<8x16x8xf32>, vector<8x16x8xf32> -> vector<8x16x8xf32>
    "tpu.trace_stop"() : () -> ()
    %34 = vector.shape_cast %33 : vector<8x16x8xf32> to vector<128x8xf32>
    %c0_15 = arith.constant 0 : index
    %c0_16 = arith.constant 0 : index
    %35 = vector.load %arg5[%c0_15, %c0_16] : memref<32x32xf32, #tpu.memory_space<vmem>>, vector<8x32xf32>
    %cst_17 = arith.constant dense<0.000000e+00> : vector<128x32xf32>
    %36 = tpu.matmul %34, %35, %cst_17 {dimension_numbers = #tpu.dot_dimension_numbers<[1], [0], [0], [1], [0, 0, 1, 1], [], []>} : vector<128x8xf32>, vector<8x32xf32>, vector<128x32xf32> -> vector<128x32xf32>
    %37 = arith.addf %15, %36 : vector<128x32xf32>
    %38 = vector.extract_strided_slice %10 {offsets = [0, 0, 8], sizes = [8, 16, 8], strides = [1, 1, 1]} : vector<8x16x32xf32> to vector<8x16x8xf32>
    %39 = vector.extract_strided_slice %12 {offsets = [0, 0, 8], sizes = [8, 16, 8], strides = [1, 1, 1]} : vector<8x16x32xf32> to vector<8x16x8xf32>
    %40 = vector.extract_strided_slice %14 {offsets = [0, 0, 8], sizes = [8, 16, 8], strides = [1, 1, 1]} : vector<8x16x32xf32> to vector<8x16x8xf32>
    "tpu.trace_start"() <{level = 10 : i32, message = "bnd,bmd->bnm"}> : () -> ()
    %cst_18 = arith.constant dense<0.000000e+00> : vector<8x16x16xf32>
    %41 = tpu.matmul %38, %39, %cst_18 {dimension_numbers = #tpu.dot_dimension_numbers<[2], [2], [1], [1], [0, 0, 0, 1, 1, 1], [0], [0]>} : vector<8x16x8xf32>, vector<8x16x8xf32>, vector<8x16x16xf32> -> vector<8x16x16xf32>
    "tpu.trace_stop"() : () -> ()
    %c1 = arith.constant 1 : index
    %c0_19 = arith.constant 0 : index
    %c0_20 = arith.constant 0 : index
    %c0_21 = arith.constant 0 : index
    %42 = vector.load %arg4[%c1, %c0_19, %c0_20, %c0_21] : memref<4x8x16x16xf32, #tpu.memory_space<vmem>>, vector<1x8x16x16xf32>
    %43 = vector.shape_cast %42 : vector<1x8x16x16xf32> to vector<8x16x16xf32>
    %44 = arith.addf %41, %43 : vector<8x16x16xf32>
    %cst_22 = arith.constant dense<0xFF800000> : vector<8x16xf32>
    %45 = vector.multi_reduction <maximumf>, %44, %cst_22 [2] : vector<8x16x16xf32> to vector<8x16xf32>
    %46 = vector.shape_cast %45 : vector<8x16xf32> to vector<8x16x1xf32>
    %47 = vector.broadcast %46 : vector<8x16x1xf32> to vector<8x16x16xf32>
    %48 = arith.subf %44, %47 : vector<8x16x16xf32>
    %49 = math.exp %48 : vector<8x16x16xf32>
    %cst_23 = arith.constant dense<0.000000e+00> : vector<8x16xf32>
    %50 = vector.multi_reduction <add>, %49, %cst_23 [2] : vector<8x16x16xf32> to vector<8x16xf32>
    %51 = vector.shape_cast %50 : vector<8x16xf32> to vector<8x16x1xf32>
    %52 = tpu.reciprocal %51 {approx = true} : vector<8x16x1xf32> -> vector<8x16x1xf32>
    %53 = vector.broadcast %52 : vector<8x16x1xf32> to vector<8x16x16xf32>
    %54 = arith.mulf %49, %53 : vector<8x16x16xf32>
    "tpu.trace_start"() <{level = 10 : i32, message = "bnm,bmd->bnd"}> : () -> ()
    %cst_24 = arith.constant dense<0.000000e+00> : vector<8x16x8xf32>
    %55 = tpu.matmul %54, %40, %cst_24 {dimension_numbers = #tpu.dot_dimension_numbers<[2], [1], [1], [2], [0, 0, 0, 1, 1, 2], [0], [0]>} : vector<8x16x16xf32>, vector<8x16x8xf32>, vector<8x16x8xf32> -> vector<8x16x8xf32>
    "tpu.trace_stop"() : () -> ()
    %56 = vector.shape_cast %55 : vector<8x16x8xf32> to vector<128x8xf32>
    %c8 = arith.constant 8 : index
    %c0_25 = arith.constant 0 : index
    %57 = vector.load %arg5[%c8, %c0_25] : memref<32x32xf32, #tpu.memory_space<vmem>>, vector<8x32xf32>
    %cst_26 = arith.constant dense<0.000000e+00> : vector<128x32xf32>
    %58 = tpu.matmul %56, %57, %cst_26 {dimension_numbers = #tpu.dot_dimension_numbers<[1], [0], [0], [1], [0, 0, 1, 1], [], []>} : vector<128x8xf32>, vector<8x32xf32>, vector<128x32xf32> -> vector<128x32xf32>
    %59 = arith.addf %37, %58 : vector<128x32xf32>
    %60 = vector.extract_strided_slice %10 {offsets = [0, 0, 16], sizes = [8, 16, 8], strides = [1, 1, 1]} : vector<8x16x32xf32> to vector<8x16x8xf32>
    %61 = vector.extract_strided_slice %12 {offsets = [0, 0, 16], sizes = [8, 16, 8], strides = [1, 1, 1]} : vector<8x16x32xf32> to vector<8x16x8xf32>
    %62 = vector.extract_strided_slice %14 {offsets = [0, 0, 16], sizes = [8, 16, 8], strides = [1, 1, 1]} : vector<8x16x32xf32> to vector<8x16x8xf32>
    "tpu.trace_start"() <{level = 10 : i32, message = "bnd,bmd->bnm"}> : () -> ()
    %cst_27 = arith.constant dense<0.000000e+00> : vector<8x16x16xf32>
    %63 = tpu.matmul %60, %61, %cst_27 {dimension_numbers = #tpu.dot_dimension_numbers<[2], [2], [1], [1], [0, 0, 0, 1, 1, 1], [0], [0]>} : vector<8x16x8xf32>, vector<8x16x8xf32>, vector<8x16x16xf32> -> vector<8x16x16xf32>
    "tpu.trace_stop"() : () -> ()
    %c2 = arith.constant 2 : index
    %c0_28 = arith.constant 0 : index
    %c0_29 = arith.constant 0 : index
    %c0_30 = arith.constant 0 : index
    %64 = vector.load %arg4[%c2, %c0_28, %c0_29, %c0_30] : memref<4x8x16x16xf32, #tpu.memory_space<vmem>>, vector<1x8x16x16xf32>
    %65 = vector.shape_cast %64 : vector<1x8x16x16xf32> to vector<8x16x16xf32>
    %66 = arith.addf %63, %65 : vector<8x16x16xf32>
    %cst_31 = arith.constant dense<0xFF800000> : vector<8x16xf32>
    %67 = vector.multi_reduction <maximumf>, %66, %cst_31 [2] : vector<8x16x16xf32> to vector<8x16xf32>
    %68 = vector.shape_cast %67 : vector<8x16xf32> to vector<8x16x1xf32>
    %69 = vector.broadcast %68 : vector<8x16x1xf32> to vector<8x16x16xf32>
    %70 = arith.subf %66, %69 : vector<8x16x16xf32>
    %71 = math.exp %70 : vector<8x16x16xf32>
    %cst_32 = arith.constant dense<0.000000e+00> : vector<8x16xf32>
    %72 = vector.multi_reduction <add>, %71, %cst_32 [2] : vector<8x16x16xf32> to vector<8x16xf32>
    %73 = vector.shape_cast %72 : vector<8x16xf32> to vector<8x16x1xf32>
    %74 = tpu.reciprocal %73 {approx = true} : vector<8x16x1xf32> -> vector<8x16x1xf32>
    %75 = vector.broadcast %74 : vector<8x16x1xf32> to vector<8x16x16xf32>
    %76 = arith.mulf %71, %75 : vector<8x16x16xf32>
    "tpu.trace_start"() <{level = 10 : i32, message = "bnm,bmd->bnd"}> : () -> ()
    %cst_33 = arith.constant dense<0.000000e+00> : vector<8x16x8xf32>
    %77 = tpu.matmul %76, %62, %cst_33 {dimension_numbers = #tpu.dot_dimension_numbers<[2], [1], [1], [2], [0, 0, 0, 1, 1, 2], [0], [0]>} : vector<8x16x16xf32>, vector<8x16x8xf32>, vector<8x16x8xf32> -> vector<8x16x8xf32>
    "tpu.trace_stop"() : () -> ()
    %78 = vector.shape_cast %77 : vector<8x16x8xf32> to vector<128x8xf32>
    %c16 = arith.constant 16 : index
    %c0_34 = arith.constant 0 : index
    %79 = vector.load %arg5[%c16, %c0_34] : memref<32x32xf32, #tpu.memory_space<vmem>>, vector<8x32xf32>
    %cst_35 = arith.constant dense<0.000000e+00> : vector<128x32xf32>
    %80 = tpu.matmul %78, %79, %cst_35 {dimension_numbers = #tpu.dot_dimension_numbers<[1], [0], [0], [1], [0, 0, 1, 1], [], []>} : vector<128x8xf32>, vector<8x32xf32>, vector<128x32xf32> -> vector<128x32xf32>
    %81 = arith.addf %59, %80 : vector<128x32xf32>
    %82 = vector.extract_strided_slice %10 {offsets = [0, 0, 24], sizes = [8, 16, 8], strides = [1, 1, 1]} : vector<8x16x32xf32> to vector<8x16x8xf32>
    %83 = vector.extract_strided_slice %12 {offsets = [0, 0, 24], sizes = [8, 16, 8], strides = [1, 1, 1]} : vector<8x16x32xf32> to vector<8x16x8xf32>
    %84 = vector.extract_strided_slice %14 {offsets = [0, 0, 24], sizes = [8, 16, 8], strides = [1, 1, 1]} : vector<8x16x32xf32> to vector<8x16x8xf32>
    "tpu.trace_start"() <{level = 10 : i32, message = "bnd,bmd->bnm"}> : () -> ()
    %cst_36 = arith.constant dense<0.000000e+00> : vector<8x16x16xf32>
    %85 = tpu.matmul %82, %83, %cst_36 {dimension_numbers = #tpu.dot_dimension_numbers<[2], [2], [1], [1], [0, 0, 0, 1, 1, 1], [0], [0]>} : vector<8x16x8xf32>, vector<8x16x8xf32>, vector<8x16x16xf32> -> vector<8x16x16xf32>
    "tpu.trace_stop"() : () -> ()
    %c3 = arith.constant 3 : index
    %c0_37 = arith.constant 0 : index
    %c0_38 = arith.constant 0 : index
    %c0_39 = arith.constant 0 : index
    %86 = vector.load %arg4[%c3, %c0_37, %c0_38, %c0_39] : memref<4x8x16x16xf32, #tpu.memory_space<vmem>>, vector<1x8x16x16xf32>
    %87 = vector.shape_cast %86 : vector<1x8x16x16xf32> to vector<8x16x16xf32>
    %88 = arith.addf %85, %87 : vector<8x16x16xf32>
    %cst_40 = arith.constant dense<0xFF800000> : vector<8x16xf32>
    %89 = vector.multi_reduction <maximumf>, %88, %cst_40 [2] : vector<8x16x16xf32> to vector<8x16xf32>
    %90 = vector.shape_cast %89 : vector<8x16xf32> to vector<8x16x1xf32>
    %91 = vector.broadcast %90 : vector<8x16x1xf32> to vector<8x16x16xf32>
    %92 = arith.subf %88, %91 : vector<8x16x16xf32>
    %93 = math.exp %92 : vector<8x16x16xf32>
    %cst_41 = arith.constant dense<0.000000e+00> : vector<8x16xf32>
    %94 = vector.multi_reduction <add>, %93, %cst_41 [2] : vector<8x16x16xf32> to vector<8x16xf32>
    %95 = vector.shape_cast %94 : vector<8x16xf32> to vector<8x16x1xf32>
    %96 = tpu.reciprocal %95 {approx = true} : vector<8x16x1xf32> -> vector<8x16x1xf32>
    %97 = vector.broadcast %96 : vector<8x16x1xf32> to vector<8x16x16xf32>
    %98 = arith.mulf %93, %97 : vector<8x16x16xf32>
    "tpu.trace_start"() <{level = 10 : i32, message = "bnm,bmd->bnd"}> : () -> ()
    %cst_42 = arith.constant dense<0.000000e+00> : vector<8x16x8xf32>
    %99 = tpu.matmul %98, %84, %cst_42 {dimension_numbers = #tpu.dot_dimension_numbers<[2], [1], [1], [2], [0, 0, 0, 1, 1, 2], [0], [0]>} : vector<8x16x16xf32>, vector<8x16x8xf32>, vector<8x16x8xf32> -> vector<8x16x8xf32>
    "tpu.trace_stop"() : () -> ()
    %100 = vector.shape_cast %99 : vector<8x16x8xf32> to vector<128x8xf32>
    %c24 = arith.constant 24 : index
    %c0_43 = arith.constant 0 : index
    %101 = vector.load %arg5[%c24, %c0_43] : memref<32x32xf32, #tpu.memory_space<vmem>>, vector<8x32xf32>
    %cst_44 = arith.constant dense<0.000000e+00> : vector<128x32xf32>
    %102 = tpu.matmul %100, %101, %cst_44 {dimension_numbers = #tpu.dot_dimension_numbers<[1], [0], [0], [1], [0, 0, 1, 1], [], []>} : vector<128x8xf32>, vector<8x32xf32>, vector<128x32xf32> -> vector<128x32xf32>
    %103 = arith.addf %81, %102 : vector<128x32xf32>
    %c0_45 = arith.constant 0 : index
    %c0_46 = arith.constant 0 : index
    %104 = vector.load %arg6[%c0_45, %c0_46] : memref<1x32xf32, #tpu.memory_space<vmem>>, vector<1x32xf32>
    %105 = vector.shape_cast %104 : vector<1x32xf32> to vector<32xf32>
    %106 = vector.shape_cast %105 : vector<32xf32> to vector<1x32xf32>
    %107 = vector.broadcast %106 : vector<1x32xf32> to vector<128x32xf32>
    %108 = arith.addf %103, %107 : vector<128x32xf32>
    %109 = vector.shape_cast %108 : vector<128x32xf32> to vector<8x16x32xf32>
    %c0_47 = arith.constant 0 : index
    %c0_48 = arith.constant 0 : index
    %c0_49 = arith.constant 0 : index
    %110 = vector.load %arg7[%c0_47, %c0_48, %c0_49] : memref<8x16x32xf32, #tpu.memory_space<vmem>>, vector<8x16x32xf32>
    tpu.vector_store %arg7[%c0_47, %c0_48, %c0_49], %109 {strides = array<i32>} : memref<8x16x32xf32, #tpu.memory_space<vmem>>, vector<8x16x32xf32>,
    return
  }
  func.func @transform_0(%arg0: i32) -> (i32, i32, i32) {
    %c0_i32 = arith.constant 0 : i32
    %c0_i32_0 = arith.constant 0 : i32
    %c0_i32_1 = arith.constant 0 : i32
    return %arg0, %c0_i32, %c0_i32_0 : i32, i32, i32
  }
  func.func @transform_1(%arg0: i32) -> (i32, i32) {
    %c0_i32 = arith.constant 0 : i32
    %c0_i32_0 = arith.constant 0 : i32
    %c0_i32_1 = arith.constant 0 : i32
    return %c0_i32, %c0_i32_0 : i32, i32
  }
  func.func @transform_2(%arg0: i32) -> (i32, i32) {
    %c0_i32 = arith.constant 0 : i32
    %c0_i32_0 = arith.constant 0 : i32
    %c0_i32_1 = arith.constant 0 : i32
    return %c0_i32, %c0_i32_0 : i32, i32
  }
  func.func @transform_3(%arg0: i32) -> (i32, i32, i32, i32) {
    %c0_i32 = arith.constant 0 : i32
    %c0_i32_0 = arith.constant 0 : i32
    %c0_i32_1 = arith.constant 0 : i32
    %c0_i32_2 = arith.constant 0 : i32
    %c0_i32_3 = arith.constant 0 : i32
    return %c0_i32, %c0_i32_0, %c0_i32_1, %c0_i32_2 : i32, i32, i32, i32
  }
  func.func @transform_4(%arg0: i32) -> (i32, i32) {
    %c0_i32 = arith.constant 0 : i32
    %c0_i32_0 = arith.constant 0 : i32
    %c0_i32_1 = arith.constant 0 : i32
    return %c0_i32, %c0_i32_0 : i32, i32
  }
  func.func @transform_5(%arg0: i32) -> (i32, i32) {
    %c0_i32 = arith.constant 0 : i32
    %c0_i32_0 = arith.constant 0 : i32
    %c0_i32_1 = arith.constant 0 : i32
    return %c0_i32, %c0_i32_0 : i32, i32
  }
  func.func @transform_6(%arg0: i32) -> (i32, i32, i32) {
    %c0_i32 = arith.constant 0 : i32
    %c0_i32_0 = arith.constant 0 : i32
    %c0_i32_1 = arith.constant 0 : i32
    return %arg0, %c0_i32, %c0_i32_0 : i32, i32, i32
  }
}

</mosaic_0001>

<bundles_post_ra>
// kernel: tpu_custom_call.1
= control target key start
LH: loop header
LB: loop body
LE: loop exit
PB: predicated region body
PF: predicated region fallthrough
CT: control target
= control target key end

     0   :  { %11 = vsyncpa [#allocation3], 0  ;;  %s12251_s0 = inlined_call_operand.hbm [shape: f32[16,16,32], index: 0, kind: input, shape index: {}]   ;;  %s12252_s1 = inlined_call_operand.hbm [shape: f32[32,96], index: 1, kind: input, shape index: {}]   ;;  %s12253_s2 = inlined_call_operand.vmem [shape: f32[1,96], index: 2, kind: input, shape index: {}]   ;;  %s12254_s3 = inlined_call_operand.hbm [shape: f32[4,8,16,16], index: 3, kind: input, shape index: {}]   ;;  %s12255_s4 = inlined_call_operand.hbm [shape: f32[32,32], index: 4, kind: input, shape index: {}]   ;;  %s12256_s5 = inlined_call_operand.vmem [shape: f32[1,32], index: 5, kind: input, shape index: {}]   ;;  %s12257_s6 = inlined_call_operand.hbm [shape: f32[16,16,32], index: 6, kind: output, shape index: {}]  }
   0x1   :  { %13 = vsyncpa [#allocation3 + $0x1], 0 }
   0x2   :  { %14 = vsyncpa [#allocation6], 0 }
   0x3   :  { %15 = vsyncpa [#allocation9], 0 }
   0x4   :  { %16 = vsyncpa [#allocation4], 0 }
   0x5   :  { %18 = vsyncpa [#allocation4 + $0x1], 0  ;;  %s10474_s21 = smov 0   ;;  %s10476_s22 = smov 0  }
   0x6   :  { %s10478_s23 = smov 0   ;;  %s10480_s24 = smov 0  }
   0x7 LB: > { %s10495_s25 = sadd.s32 4294967295, %s10417_s24   ;;  %s7955_s26 = sadd.s32 4294967294, %s10417_s24   ;;  %s10417_s24 = sphi %s10480_s24, %s12304_s24   ;;  %s10413_s23 = sphi %s10478_s23, %s12303_s23   ;;  %s10409_s22 = sphi %s10476_s22, %s12302_s22   ;;  %s10405_s21 = sphi %s10474_s21, %s12301_s21  }
   0x8   : > { %p44_p0 = scmp.ne.s32.totalorder %s10409_s22, %s10405_s21  ;;  %p12258_p1 = scmp.eq.s32.totalorder %s10495_s25, 0 }
   0x9   : > { %p179_p3 = scmp.eq.s32.totalorder %s7955_s26, 1  ;;  %p7956_p5 = scmp.ge.s32.totalorder %s10417_s24, 1 }
   0xa   : > { %p10504_p4 = por %p12258_p1, %p44_p0  ;;  %p186_p7 = scmp.lt.s32.totalorder %s10417_s24, 3 }
   0xb   : > { %p10509_p6 = por %p179_p3, %p44_p0  ;;  %s10419_s30 = smov [#allocation5]  }
   0xc   : > { %s12261_s27 = scalar_select %p10504_p4, 1, 0 }
   0xd   : > { %s12262_s28 = scalar_select %p10509_p6, 1, 0 }
   0xe   : > { %p10514_p8 = pnand %p7956_p5, %p186_p7  ;;  %s198_s7 = sshll.u32 %s10419_s30, 4  ;;  %s10518_s7 = int_to_ptr.vmem [resolvable:$true] %s198_s7 }
   0xf   : > { %s10420_s9 = smov [#allocation7]   ;;  %s10421_s11 = smov [#allocation8]  }
  0x10   : > { %s12263_s29 = scalar_select %p10514_p8, 1, 0 }
  0x11   : > { %p9577_p9 = pneg %p10514_p8  ;;  %s214_s10 = sshll.u32 %s10420_s9, 4  ;;  %s10529_s10 = int_to_ptr.vmem [resolvable:$true] %s214_s10 }
  0x12   : > { %s10531_s12 = sshll.u32 %s10421_s11, 4  ;;  %s10229_s15 = scalar_lea.hbm %s12252_s1, 512  ;;  %s228_s12 = int_to_ptr.vmem [resolvable:$true] %s10531_s12 }
  0x13   : > { %p10525_p11 = pnand %p9577_p9, %p12258_p1  ;;  %p10230_p12 = scmp.ne.s32.totalorder %s12252_s1, %s10229_s15 }
  0x14   : > { %p10236_p5 = scmp.lt.u32.totalorder %s10229_s15, %s12252_s1 }
  0x15   : > { %p10541_p13 = pneg %p10525_p11 }
  0x17   : > { %p10232_p0 = pnand %p10541_p13, %p10230_p12 }
  0x19   : > { %p10233_p3 = pneg %p10232_p0 }
  0x1b   : > { %p10238_p7 = pnand %p10236_p5, %p10233_p3 }
  0x1d   : > { %10241 = shalt.err (!%p10238_p7)
}
  0x1e   : > { %s10242_s26 = scalar_lea.vmem %s10518_s7, 512  ;;  %p10250_p2 = scmp.lt.s32.totalorder %s10518_s7, %s10518_s7 }
  0x1f   : > { %p10243_p9 = scmp.ne.s32.totalorder %s10518_s7, %s10242_s26  ;;  %p10251_p6 = scmp.lt.s32.totalorder %s10242_s26, %s10242_s26 }
  0x21   : > { %p10245_p10 = pnand %p10243_p9, %p10541_p13  ;;  %p10252_p12 = por %p10251_p6, %p10250_p2 }
  0x23   : > { %p10246_p1 = pneg %p10245_p10 }
  0x25   : > { %p10253_p0 = pnand %p10252_p12, %p10246_p1 }
  0x27   : > { %10256 = shalt.err (!%p10253_p0)
}
  0x28   : > { %s10422_s30 = smov 128   ;;  %s10423_s9 = smov 8  }
  0x29   : > { %9580 = dma.hbm_to_vmem [thread:$0]  (!%p10525_p11), %s12252_s1, 512, %s10518_s7, [#allocation6], %s10422_s30, %s10422_s30, %s10423_s9  }
  0x2a   : > { %s10257_s16 = scalar_lea.hbm %s12254_s3, 8192 }
  0x2b   : > { %p10258_p1 = scmp.ne.s32.totalorder %s12254_s3, %s10257_s16  ;;  %p10264_p10 = scmp.lt.u32.totalorder %s10257_s16, %s12254_s3 }
  0x2d   : > { %p10260_p2 = pnand %p10258_p1, %p10541_p13 }
  0x2f   : > { %p10261_p6 = pneg %p10260_p2 }
  0x31   : > { %p10266_p3 = pnand %p10264_p10, %p10261_p6 }
  0x33   : > { %10269 = shalt.err (!%p10266_p3)
}
  0x34   : > { %s10270_s7 = scalar_lea.vmem %s10529_s10, 8192  ;;  %p10278_p12 = scmp.lt.s32.totalorder %s10529_s10, %s10529_s10 }
  0x35   : > { %p10271_p5 = scmp.ne.s32.totalorder %s10529_s10, %s10270_s7  ;;  %p10279_p0 = scmp.lt.s32.totalorder %s10270_s7, %s10270_s7 }
  0x37   : > { %p10273_p7 = pnand %p10271_p5, %p10541_p13  ;;  %p10280_p1 = por %p10279_p0, %p10278_p12 }
  0x39   : > { %p10274_p9 = pneg %p10273_p7 }
  0x3b   : > { %p10281_p2 = pnand %p10280_p1, %p10274_p9 }
  0x3d   : > { %10284 = shalt.err (!%p10281_p2)
}
  0x3e   : > { %9583 = dma.hbm_to_vmem [thread:$0]  (!%p10525_p11), %s12254_s3, 8192, %s10529_s10, [#allocation6], %s10422_s30, %s10422_s30, %s10423_s9  }
  0x3f   : > { %s10285_s16 = scalar_lea.hbm %s12255_s4, 512 }
  0x40   : > { %p10286_p6 = scmp.ne.s32.totalorder %s12255_s4, %s10285_s16  ;;  %p10292_p5 = scmp.lt.u32.totalorder %s10285_s16, %s12255_s4 }
  0x42   : > { %p10288_p10 = pnand %p10286_p6, %p10541_p13 }
  0x44   : > { %p10289_p3 = pneg %p10288_p10 }
  0x46   : > { %p10294_p7 = pnand %p10292_p5, %p10289_p3 }
  0x48   : > { %10297 = shalt.err (!%p10294_p7)
}
  0x49   : > { %s10298_s7 = scalar_lea.vmem %s228_s12, 512  ;;  %p10306_p1 = scmp.lt.s32.totalorder %s228_s12, %s228_s12 }
  0x4a   : > { %p10299_p9 = scmp.ne.s32.totalorder %s228_s12, %s10298_s7  ;;  %p10307_p2 = scmp.lt.s32.totalorder %s10298_s7, %s10298_s7 }
  0x4c   : > { %p10301_p12 = pnand %p10299_p9, %p10541_p13  ;;  %p10308_p4 = por %p10307_p2, %p10306_p1 }
  0x4e   : > { %p10302_p0 = pneg %p10301_p12 }
  0x50   : > { %p10309_p8 = pnand %p10308_p4, %p10302_p0 }
  0x52   : > { %10312 = shalt.err (!%p10309_p8)
}
  0x53   : > { %9586 = dma.hbm_to_vmem [thread:$0]  (!%p10525_p11), %s12255_s4, 512, %s228_s12, [#allocation9], %s10422_s30, %s10422_s30, %s10423_s9  }
  0x54   : > { %s10614_s18 = sadd.s32 1, %s10417_s24   ;;  %s31_s13 = sadd.s32 1, %s10413_s23 }
  0x55   : > { %s28_s8 = ssub.s32 %s10417_s24, %s10614_s18  ;;  %p38_p8 = scmp.ne.s32.totalorder %s10413_s23, %s10409_s22 }
  0x56   : > { %p29_p4 = scmp.eq.s32.totalorder %s28_s8, 0  ;;  %p39_p13 = scmp.eq.s32.totalorder %s10417_s24, 0 }
  0x57   : > { %p9598_p6 = scmp.lt.s32.totalorder %s10417_s24, 2  ;;  %p12266_p3 = scmp.eq.s32.totalorder %s10495_s25, 1 }
  0x58   : > { %s10624_s14 = scalar_select %p29_p4, %s10413_s23, %s31_s13  }
  0x59   : > { %p40_p10 = por %p39_p13, %p38_p8  ;;  %p10628_p5 = por %p12266_p3, %p38_p8 }
  0x5a   : > { %s244_s16 = sand.u32 1, %s10413_s23   ;;  %s8252_s17 = sshll.u32 %s10417_s24, 11 }
  0x5b   : > { %s7961_s12 = sshll.u32 %s244_s16, 7  ;;  %s10637_s26 = scalar_lea.hbm %s12251_s0, %s8252_s17 }
  0x5c   : > { %s248_s7 = scalar_lea.vmem [#allocation2], %s7961_s12  ;;  %p10639_p11 = pnand %p9598_p6, %p40_p10 }
  0x5d   : > { %s256_s10 = sshll.u32 %s248_s7, 4  ;;  %s10645_s8 = scalar_lea.sflag [#allocation3], %s244_s16  ;;  %s10643_s10 = int_to_ptr.vmem [resolvable:$true] %s256_s10 }
  0x5e   : > { %s10313_s13 = scalar_lea.hbm %s10637_s26, 2048  ;;  %p10315_p9 = pneg %p10639_p11 }
  0x5f   : > { %p10314_p7 = scmp.ne.s32.totalorder %s10637_s26, %s10313_s13  ;;  %s10318_s19 = scalar_lea.hbm %s12251_s0, 4096 }
  0x60   : > { %p10319_p1 = scmp.lt.u32.totalorder %s10637_s26, %s12251_s0  ;;  %p10320_p2 = scmp.lt.u32.totalorder %s10318_s19, %s10313_s13 }
  0x61   : > { %p10316_p12 = pnand %p10315_p9, %p10314_p7  ;;  %p10322_p8 = scmp.lt.u32.totalorder %s10313_s13, %s10637_s26 }
  0x62   : > { %p10321_p4 = por %p10320_p2, %p10319_p1 }
  0x63   : > { %p10317_p0 = pneg %p10316_p12 }
  0x64   : > { %p10323_p13 = por %p10322_p8, %p10321_p4 }
  0x66   : > { %p10324_p6 = pnand %p10323_p13, %p10317_p0 }
  0x68   : > { %10327 = shalt.err (!%p10324_p6)
}
  0x69   : > { %s10328_s16 = scalar_lea.vmem %s10643_s10, 2048  ;;  %s10424_s17 = smov [#allocation2]  }
  0x6a   : > { %p10329_p10 = scmp.ne.s32.totalorder %s10643_s10, %s10328_s16  ;;  %s10333_s12 = sshll.u32 %s10424_s17, 4  ;;  %s10334_s12 = int_to_ptr.vmem [resolvable:$false] %s10333_s12 }
  0x6b   : > { %s10335_s20 = scalar_lea.vmem %s10334_s12, 4096  ;;  %p10336_p12 = scmp.lt.s32.totalorder %s10643_s10, %s10334_s12 }
  0x6c   : > { %p10331_p3 = pnand %p10329_p10, %p10315_p9  ;;  %p10337_p1 = scmp.lt.s32.totalorder %s10335_s20, %s10328_s16 }
  0x6e   : > { %p10332_p7 = pneg %p10331_p3  ;;  %p10338_p2 = por %p10337_p1, %p10336_p12 }
  0x70   : > { %p10339_p4 = pnand %p10338_p2, %p10332_p7 }
  0x72   : > { %10342 = shalt.err (!%p10339_p4)
}
  0x73   : > { %9590 = dma.hbm_to_vmem [thread:$0]  (!%p10639_p11), %s10637_s26, 2048, %s10643_s10, %s10645_s8, %s10422_s30, %s10422_s30, %s10423_s9  }
  0x74   : > { %p12269_p9 = scmp.ne.s32.totalorder %s12263_s29, 0 }
  0x76   : > { %268 = sbr.rel (%p12269_p9) target bundleno = 3799 (0xed7), region = 44 }
  0x7d   : > { %s10679_s13 = sand.u32 1, %s10409_s22   ;;  %p12270_p0 = scmp.ne.s32.totalorder %s12261_s27, 0 }
  0x7e   : > { %s7966_s19 = sshll.u32 %s10679_s13, 7  ;;  %s271_s7 = scalar_lea.sflag [#allocation3], %s10679_s13 }
  0x7f   : > { %s10685_s11 = scalar_lea.vmem [#allocation2], %s7966_s19 }
  0x80   : > { %10388 = dma.done.wait (%p12270_p0), %s271_s7, 2048  }
  0x81   : > { %10390 = vsyncadd (%p12270_p0), %s271_s7, 4294965248  ;;  %p12271_p11 = scmp.eq.s32.totalorder %s10495_s25, 0 }
  0x83   : > { %10392 = dma.done.wait (%p12271_p11), [#allocation6], 8704   ;;  %p12272_p8 = pmov %p12271_p11 }
  0x85   : > { %10394 = vsyncadd (%p12272_p8), [#allocation6], 4294958592  ;;  %p12273_p13 = pmov %p12272_p8 }
  0x86   : > { %p12274_p6 = pmov %p12272_p8 }
  0x87   : > { %10396 = dma.done.wait (%p12273_p13), [#allocation9], 512  }
  0x88   : > { %10398 = vsyncadd (%p12274_p6), [#allocation9], 4294966784  ;;  %vm344_vm0 = vcmask 261120   ;;  %v333_v0 = vld [vmem:[#allocation5] sm:$0xff]  ;;  %v334_v1 = vld [vmem:[#allocation5 + $0x8] sm:$0xff]  ;;  %vm560_vm1 = vcmask 64512  }
  0x89   : > { %v335_v2 = vld [vmem:[#allocation5 + $0x10] sm:$0xff]  ;;  %v9183_v3 = vpack.c.bf16 %v334_v1, %v333_v0  ;;  %v336_v4 = vld [vmem:[#allocation5 + $0x18] sm:$0xff]  ;;  %v317_v5 = vld [vmem:[%s10685_s11] sm:$0xff]  ;;  %s10425_s30 = smov 96   ;;  %s10426_s9 = smov 64   ;;  %vm1267_vm3 = vcmask 130048  }
  0x8a   : > { %v9187_v6 = vpack.c.bf16 %v336_v4, %v335_v2  ;;  %8607 = vmatprep.mubr.msk.f32.mxu0 %vm344_vm0, %v317_v5  ;;  %v318_v7 = vld [vmem:[%s10685_s11 + $0x8] sm:$0xff]  ;;  %v319_v8 = vld [vmem:[%s10685_s11 + $0x10] sm:$0xff]  ;;  %v320_v9 = vld [vmem:[%s10685_s11 + $0x18] sm:$0xff]  ;;  %s10427_s26 = smov 88   ;;  %s10428_s10 = smov 120  }
  0x8b   : > { %9184 = vmatprep.subr.bf16.mxu0 %v9183_v3  ;;  %v321_v10 = vld [vmem:[%s10685_s11 + $0x20] sm:$0xff]  ;;  %v322_v11 = vld [vmem:[%s10685_s11 + $0x28] sm:$0xff]  ;;  %v323_v12 = vld [vmem:[%s10685_s11 + $0x30] sm:$0xff]  ;;  %s10429_s8 = smov 56   ;;  %s10430_s16 = smov 80  }
  0x8c   : > { %9186 = vmatpush3.bf16.msra.mxu0 %v9183_v3  ;;  %v324_v13 = vld [vmem:[%s10685_s11 + $0x38] sm:$0xff]  ;;  %v325_v14 = vld [vmem:[%s10685_s11 + $0x40] sm:$0xff]  ;;  %v326_v15 = vld [vmem:[%s10685_s11 + $0x48] sm:$0xff]  ;;  %s10431_s17 = smov 112   ;;  %s10432_s12 = smov 48  }
  0x8d   : > { %9188 = vmatprep.subr.bf16.mxu0 %v9187_v6  ;;  %v327_v16 = vld [vmem:[%s10685_s11 + $0x50] sm:$0xff]  ;;  %v328_v17 = vld [vmem:[%s10685_s11 + $0x58] sm:$0xff]  ;;  %v329_v18 = vld [vmem:[%s10685_s11 + $0x60] sm:$0xff]  ;;  %s10433_s20 = smov 72   ;;  %s10434_s7 = smov 104  }
  0x8e   : > { %v330_v19 = vld [vmem:[%s10685_s11 + $0x68] sm:$0xff]  ;;  %v331_v20 = vld [vmem:[%s10685_s11 + $0x70] sm:$0xff]  ;;  %v332_v21 = vld [vmem:[%s10685_s11 + $0x78] sm:$0xff]  ;;  %s10435_s11 = smov 40  }
  0x8f   : > { %v7971_v22 = vld [vmem:[%s12253_s2] ss:$0 sm:$0xff]  ;;  %vm10832_vm2 = vmpackc.low %vm560_vm1, %vm560_vm1  ;;  %v5975_v2 = vld [vmem:[#allocation7 + $0x190] sm:$0xff] }
  0x90   : > { %9190 = vmatpush3.bf16.msra.mxu0 %v9187_v6 }
  0x93   : > { %8608 = vmatmul.mubr.msk.f32.vlgmr.msra.gmra.mrb[0].mxu0 %vm344_vm0, %v318_v7 }
  0x94   : > { %8610 = vmatprep.mubr.msk.f32.mxu0 %vm344_vm0, %v319_v8 }
  0x97   : > { %8611 = vmatmul.mubr.msk.f32.gmra.mrb[2].mxu0 %vm344_vm0, %v320_v9 }
  0x98   : > { %8613 = vmatprep.mubr.msk.f32.mxu0 %vm344_vm0, %v321_v10 }
  0x9b   : > { %8614 = vmatmul.mubr.msk.f32.gmra.mrb[4].mxu0 %vm344_vm0, %v322_v11 }
  0x9c   : > { %8616 = vmatprep.mubr.msk.f32.mxu0 %vm344_vm0, %v323_v12 }
  0x9f   : > { %8617 = vmatmul.mubr.msk.f32.gmra.mrb[6].mxu0 %vm344_vm0, %v324_v13 }
  0xa0   : > { %8619 = vmatprep.mubr.msk.f32.mxu0 %vm344_vm0, %v325_v14 }
  0xa3   : > { %8620 = vmatmul.mubr.msk.f32.gmra.mrb[8].mxu0 %vm344_vm0, %v326_v15 }
  0xa4   : > { %8622 = vmatprep.mubr.msk.f32.mxu0 %vm344_vm0, %v327_v16 }
  0xa7   : > { %8623 = vmatmul.mubr.msk.f32.gmra.mrb[10].mxu0 %vm344_vm0, %v328_v17 }
  0xa8   : > { %8625 = vmatprep.mubr.msk.f32.mxu0 %vm344_vm0, %v329_v18 }
  0xab   : > { %8626 = vmatmul.mubr.msk.f32.gmra.mrb[12].mxu0 %vm344_vm0, %v330_v19 }
  0xac   : > { %8628 = vmatprep.mubr.msk.f32.mxu0 %vm344_vm0, %v331_v20 }
  0xaf   : > { %8629 = vmatmul.mubr.msk.f32.gmra.mrb[14].mxu0 %vm344_vm0, %v332_v21 }
 0x166   : > { %v8609_v23 = vpop.f32.mrb[0].mxu0 }
 0x167   : > { %v10734_v24 = vadd.f32 %v8609_v23, %v7971_v22  ;;  %v459_v25 = vpop.f32.mrb[1].mxu0 }
 0x168   : > { %v10736_v26 = vadd.f32 %v7971_v22, %v459_v25 }
 0x16a   : > { %v8612_v27 = vpop.f32.mrb[2].mxu0  ;;  %8635 = vmatprep.mubr.msk.f32.mxu1 %vm560_vm1, %v10736_v26  ;;  %v10742_v28 = vpack.i.bf16 %v10734_v24, %v10736_v26 }
 0x16b   : > { %v10744_v29 = vadd.f32 %v8612_v27, %v7971_v22  ;;  %v469_v30 = vpop.f32.mrb[3].mxu0 }
 0x16c   : > { %v10746_v31 = vadd.f32 %v7971_v22, %v469_v30  ;;  %9654 = vrot.lane.b32.xlu0 %v10742_v28, %s10425_s30 }
 0x16e   : > { %v8615_v32 = vpop.f32.mrb[4].mxu0  ;;  %v10752_v33 = vpack.i.bf16 %v10744_v29, %v10746_v31 }
 0x16f   : > { %v10754_v34 = vadd.f32 %v8615_v32, %v7971_v22  ;;  %v479_v35 = vpop.f32.mrb[5].mxu0 }
 0x170   : > { %v10756_v36 = vadd.f32 %v7971_v22, %v479_v35  ;;  %9659 = vrot.lane.b32.xlu0 %v10752_v33, %s10425_s30 }
 0x172   : > { %v8618_v37 = vpop.f32.mrb[6].mxu0  ;;  %v10762_v38 = vpack.i.bf16 %v10754_v34, %v10756_v36 }
 0x173   : > { %v10764_v39 = vadd.f32 %v8618_v37, %v7971_v22  ;;  %v489_v40 = vpop.f32.mrb[7].mxu0 }
 0x174   : > { %v10766_v41 = vadd.f32 %v7971_v22, %v489_v40  ;;  %9664 = vrot.lane.b32.xlu1 %v10762_v38, %s10425_s30 }
 0x176   : > { %v8621_v42 = vpop.f32.mrb[8].mxu0  ;;  %v10772_v43 = vpack.i.bf16 %v10764_v39, %v10766_v41 }
 0x177   : > { %v10774_v44 = vadd.f32 %v8621_v42, %v7971_v22  ;;  %v499_v45 = vpop.f32.mrb[9].mxu0 }
 0x178   : > { %v10776_v46 = vadd.f32 %v7971_v22, %v499_v45  ;;  %9669 = vrot.lane.b32.xlu1 %v10772_v43, %s10425_s30 }
 0x17a   : > { %8663 = vmatprep.mubr.msk.f32.mxu0 %vm560_vm1, %v10776_v46  ;;  %v8624_v47 = vpop.f32.mrb[10].mxu0  ;;  %v10784_v48 = vpack.i.bf16 %v10774_v44, %v10776_v46 }
 0x17b   : > { %v10786_v49 = vadd.f32 %v8624_v47, %v7971_v22  ;;  %v509_v50 = vpop.f32.mrb[11].mxu0 }
 0x17c   : > { %9674 = vrot.lane.b32.xlu0 %v10784_v48, %s10425_s30  ;;  %v10790_v51 = vadd.f32 %v7971_v22, %v509_v50 }
 0x17e   : > { %v8627_v52 = vpop.f32.mrb[12].mxu0  ;;  %v10794_v53 = vpack.i.bf16 %v10786_v49, %v10790_v51 }
 0x17f   : > { %v10796_v54 = vadd.f32 %v8627_v52, %v7971_v22  ;;  %v519_v55 = vpop.f32.mrb[13].mxu0 }
 0x180   : > { %v10798_v56 = vadd.f32 %v7971_v22, %v519_v55  ;;  %9679 = vrot.lane.b32.xlu1 %v10794_v53, %s10425_s30 }
 0x182   : > { %v8630_v57 = vpop.f32.mrb[14].mxu0  ;;  %v10804_v58 = vpack.i.bf16 %v10796_v54, %v10798_v56 }
 0x183   : > { %v10806_v59 = vadd.f32 %v8630_v57, %v7971_v22  ;;  %v529_v60 = vpop.f32.mrb[15].mxu0 }
 0x184   : > { %v10808_v61 = vadd.f32 %v7971_v22, %v529_v60  ;;  %9684 = vrot.lane.b32.xlu0 %v10804_v58, %s10425_s30 }
 0x186   : > { %v10814_v62 = vpack.i.bf16 %v10806_v59, %v10808_v61 }
 0x188   : > { %9689 = vrot.lane.b32.xlu1 %v10814_v62, %s10425_s30  ;;  %9694 = vrot.lane.b32.xlu0 %v10742_v28, %s10426_s9  ;;  %s12156_s30 = scalar_lea.vmem [#allocation10], %s7966_s19  ;;  %s8254_s19 = sshll.u32 %s10495_s25, 11 }
 0x189   : > { %s7839_s25 = scalar_lea.sflag [#allocation4], %s10679_s13 }
 0x18c   : > { %9699 = vrot.lane.b32.xlu1 %v10752_v33, %s10426_s9  ;;  %9704 = vrot.lane.b32.xlu0 %v10762_v38, %s10426_s9 }
 0x190   : > { %9709 = vrot.lane.b32.xlu1 %v10772_v43, %s10426_s9  ;;  %9714 = vrot.lane.b32.xlu0 %v10784_v48, %s10426_s9 }
 0x194   : > { %9719 = vrot.lane.b32.xlu1 %v10794_v53, %s10426_s9 }
 0x1de   : > { %v9655_v63 = vpop.permute.xlu0 %9654 }
 0x1df   : > { %v9657_v0 = vunpack.i.h.bf16 %v9655_v63  ;;  %v9656_v1 = vunpack.i.l.bf16 %v9655_v63 }
 0x1e1   : > { %v9191_v3 = vpack.c.bf16 %v9657_v0, %v9656_v1 }
 0x1e2   : > { %v9660_v4 = vpop.permute.xlu0 %9659 }
 0x1e3   : > { %v9662_v5 = vunpack.i.h.bf16 %v9660_v4  ;;  %v9661_v6 = vunpack.i.l.bf16 %v9660_v4  ;;  %9193 = vmatprep.subr.msk.bf16.mxu1 %vm10832_vm2, %v9191_v3 }
 0x1e4   : > { %9196 = vmatpush3.bf16.xpose.msk.msra.mxu1 %vm10832_vm2, %v9191_v3 }
 0x1e5   : > { %v9197_v7 = vpack.c.bf16 %v9662_v5, %v9661_v6 }
 0x1e6   : > { %v9665_v8 = vpop.permute.xlu1 %9664 }
 0x1e7   : > { %v9667_v9 = vunpack.i.h.bf16 %v9665_v8  ;;  %v9666_v10 = vunpack.i.l.bf16 %v9665_v8  ;;  %9199 = vmatprep.subr.msk.bf16.mxu1 %vm10832_vm2, %v9197_v7 }
 0x1e9   : > { %v9203_v11 = vpack.c.bf16 %v9667_v9, %v9666_v10  ;;  %v539_v9 = vld [vmem:[#allocation7 + $0x8] sm:$0xff]  ;;  %v538_v10 = vld [vmem:[#allocation7] sm:$0xff] }
 0x1ea   : > { %v9670_v12 = vpop.permute.xlu1 %9669 }
 0x1eb   : > { %8636 = vmatmul.mubr.msk.f32.vlgmr.msra.gmra.mrb[0].mxu1 %vm560_vm1, %v10734_v24  ;;  %v9672_v13 = vunpack.i.h.bf16 %v9670_v12  ;;  %v9671_v14 = vunpack.i.l.bf16 %v9670_v12 }
 0x1ec   : > { %9202 = vmatpush3.bf16.xpose.msk.msra.mxu1 %vm10832_vm2, %v9197_v7  ;;  %8642 = vmatprep.mubr.msk.f32.mxu1 %vm560_vm1, %v10746_v31 }
 0x1ed   : > { %9205 = vmatprep.subr.msk.bf16.mxu1 %vm10832_vm2, %v9203_v11  ;;  %v9209_v18 = vpack.c.bf16 %v9672_v13, %v9671_v14 }
 0x1ee   : > { %v9675_v15 = vpop.permute.xlu0 %9674 }
 0x1ef   : > { %v9677_v16 = vunpack.i.h.bf16 %v9675_v15  ;;  %v9676_v17 = vunpack.i.l.bf16 %v9675_v15 }
 0x1f1   : > { %v9215_v19 = vpack.c.bf16 %v9677_v16, %v9676_v17  ;;  %v541_v17 = vld [vmem:[#allocation7 + $0x18] sm:$0xff] }
 0x1f2   : > { %v9680_v20 = vpop.permute.xlu1 %9679 }
 0x1f3   : > { %8643 = vmatmul.mubr.msk.f32.vlgmr.msra.gmra.mrb[2].mxu1 %vm560_vm1, %v10744_v29  ;;  %9217 = vmatprep.subr.msk.bf16.mxu0 %vm10832_vm2, %v9215_v19  ;;  %v9682_v21 = vunpack.i.h.bf16 %v9680_v20  ;;  %v9681_v22 = vunpack.i.l.bf16 %v9680_v20 }
 0x1f4   : > { %9208 = vmatpush3.bf16.xpose.msk.msra.mxu1 %vm10832_vm2, %v9203_v11  ;;  %8649 = vmatprep.mubr.msk.f32.mxu1 %vm560_vm1, %v10756_v36 }
 0x1f5   : > { %9220 = vmatpush3.bf16.xpose.msk.msra.mxu0 %vm10832_vm2, %v9215_v19  ;;  %9211 = vmatprep.subr.msk.bf16.mxu1 %vm10832_vm2, %v9209_v18  ;;  %v9221_v32 = vpack.c.bf16 %v9682_v21, %v9681_v22 }
 0x1f6   : > { %v9685_v23 = vpop.permute.xlu0 %9684 }
 0x1f7   : > { %v9687_v25 = vunpack.i.h.bf16 %v9685_v23  ;;  %v9686_v27 = vunpack.i.l.bf16 %v9685_v23 }
 0x1f9   : > { %v9227_v30 = vpack.c.bf16 %v9687_v25, %v9686_v27  ;;  %v543_v27 = vld [vmem:[#allocation7 + $0x28] sm:$0xff] }
 0x1fa   : > { %v9695_v35 = vpop.permute.xlu0 %9694  ;;  %v9690_v42 = vpop.permute.xlu1 %9689 }
 0x1fb   : > { %v9697_v37 = vunpack.i.h.bf16 %v9695_v35  ;;  %v9696_v40 = vunpack.i.l.bf16 %v9695_v35  ;;  %8650 = vmatmul.mubr.msk.f32.vlgmr.msra.gmra.mrb[4].mxu1 %vm560_vm1, %v10754_v34  ;;  %9229 = vmatprep.subr.msk.bf16.mxu0 %vm10832_vm2, %v9227_v30  ;;  %v9692_v47 = vunpack.i.h.bf16 %v9690_v42  ;;  %v9691_v50 = vunpack.i.l.bf16 %v9690_v42 }
 0x1fc   : > { %8664 = vmatmul.mubr.msk.f32.vlgmr.msra.gmra.mrb[16].mxu0 %vm560_vm1, %v10774_v44  ;;  %9214 = vmatpush3.bf16.xpose.msk.msra.mxu1 %vm10832_vm2, %v9209_v18  ;;  %v540_v18 = vld [vmem:[#allocation7 + $0x10] sm:$0xff] }
 0x1fd   : > { %8656 = vmatprep.mubr.msk.f32.mxu1 %vm560_vm1, %v10766_v41  ;;  %9232 = vmatpush3.bf16.xpose.msk.msra.mxu0 %vm10832_vm2, %v9227_v30  ;;  %v9239_v45 = vpack.c.bf16 %v9697_v37, %v9696_v40  ;;  %v9233_v60 = vpack.c.bf16 %v9692_v47, %v9691_v50  ;;  %v542_v50 = vld [vmem:[#allocation7 + $0x20] sm:$0xff] }
 0x1fe   : > { %8677 = vmatprep.mubr.msk.f32.mxu0 %vm560_vm1, %v10798_v56  ;;  %v9705_v52 = vpop.permute.xlu0 %9704  ;;  %9223 = vmatprep.subr.msk.bf16.mxu1 %vm10832_vm2, %v9221_v32  ;;  %v9700_v63 = vpop.permute.xlu1 %9699 }
 0x1ff   : > { %9240 = vmatprep.subr.bf16.mxu0 %v9239_v45  ;;  %v9707_v55 = vunpack.i.h.bf16 %v9705_v52  ;;  %v9706_v57 = vunpack.i.l.bf16 %v9705_v52  ;;  %v9702_v1 = vunpack.i.h.bf16 %v9700_v63  ;;  %v9701_v3 = vunpack.i.l.bf16 %v9700_v63  ;;  %v545_v52 = vld [vmem:[#allocation7 + $0x38] sm:$0xff] }
 0x201   : > { %v10884_v0 = vpack.c.bf16 %v9707_v55, %v9706_v57  ;;  %v9243_v4 = vpack.c.bf16 %v9702_v1, %v9701_v3  ;;  %v544_v1 = vld [vmem:[#allocation7 + $0x30] sm:$0xff] }
 0x202   : > { %v9710_v5 = vpop.permute.xlu1 %9709 }
 0x203   : > { %8657 = vmatmul.mubr.msk.f32.vlgmr.msra.gmra.mrb[6].mxu1 %vm560_vm1, %v10764_v39  ;;  %v9712_v6 = vunpack.i.h.bf16 %v9710_v5  ;;  %v9711_v7 = vunpack.i.l.bf16 %v9710_v5 }
 0x204   : > { %8678 = vmatmul.mubr.msk.f32.vlgmr.msra.gmra.mrb[18].mxu0 %vm560_vm1, %v10796_v54  ;;  %9226 = vmatpush3.bf16.xpose.msk.msra.mxu1 %vm10832_vm2, %v9221_v32  ;;  %v547_v32 = vld [vmem:[#allocation7 + $0x48] sm:$0xff] }
 0x205   : > { %8670 = vmatprep.mubr.msk.f32.mxu1 %vm560_vm1, %v10790_v51  ;;  %9242 = vmatpush3.bf16.msra.mxu0 %v9239_v45  ;;  %v10899_v8 = vpack.c.bf16 %v9712_v6, %v9711_v7 }
 0x206   : > { %9248 = vmatprep.subr.bf16.mxu0 %v10884_v0  ;;  %9235 = vmatprep.subr.msk.bf16.mxu1 %vm10832_vm2, %v9233_v60 }
 0x20b   : > { %8671 = vmatmul.mubr.msk.f32.vlgmr.msra.gmra.mrb[8].mxu1 %vm560_vm1, %v10786_v49 }
 0x20c   : > { %9238 = vmatpush3.bf16.xpose.msk.msra.mxu1 %vm10832_vm2, %v9233_v60  ;;  %8684 = vmatprep.mubr.msk.f32.mxu1 %vm560_vm1, %v10808_v61  ;;  %v546_v60 = vld [vmem:[#allocation7 + $0x40] sm:$0xff] }
 0x20d   : > { %9244 = vmatprep.subr.bf16.mxu1 %v9243_v4 }
 0x213   : > { %8685 = vmatmul.mubr.msk.f32.vlgmr.msra.gmra.mrb[10].mxu1 %vm560_vm1, %v10806_v59 }
 0x214   : > { %9246 = vmatpush3.bf16.msra.mxu1 %v9243_v4 }
 0x215   : > { %9252 = vmatprep.subr.bf16.mxu1 %v10899_v8 }
 0x2be   : > { %v8637_v11 = vpop.f32.mrb[0].mxu1 }
 0x2bf   : > { %v10902_v12 = vadd.f32 %v8637_v11, %v539_v9  ;;  %v635_v13 = vpop.f32.mrb[1].mxu1 }
 0x2c0   : > { %v10904_v14 = vadd.f32 %v635_v13, %v538_v10  ;;  %v551_v13 = vld [vmem:[#allocation7 + $0x68] sm:$0xff] }
 0x2c1   : > { %v1271_v15 = vsel %vm1267_vm3, %v10902_v12, -inf }
 0x2c2   : > { %1272 = vmax.xlane.f32.xlu1 %v1271_v15  ;;  %v1268_v16 = vsel %vm1267_vm3, %v10904_v14, -inf  ;;  %v550_v15 = vld [vmem:[#allocation7 + $0x60] sm:$0xff] }
 0x2c3   : > { %1269 = vmax.xlane.f32.xlu0 %v1268_v16 }
 0x2c6   : > { %v8644_v19 = vpop.f32.mrb[2].mxu1 }
 0x2c7   : > { %v10910_v20 = vadd.f32 %v8644_v19, %v541_v17  ;;  %v724_v21 = vpop.f32.mrb[3].mxu1 }
 0x2c8   : > { %v10912_v22 = vadd.f32 %v724_v21, %v540_v18  ;;  %v549_v21 = vld [vmem:[#allocation7 + $0x58] sm:$0xff] }
 0x2c9   : > { %v1277_v23 = vsel %vm1267_vm3, %v10910_v20, -inf }
 0x2ca   : > { %1278 = vmax.xlane.f32.xlu1 %v1277_v23  ;;  %v1274_v25 = vsel %vm1267_vm3, %v10912_v22, -inf }
 0x2cb   : > { %1275 = vmax.xlane.f32.xlu0 %v1274_v25 }
 0x2ce   : > { %v8651_v30 = vpop.f32.mrb[4].mxu1 }
 0x2cf   : > { %v10918_v35 = vadd.f32 %v8651_v30, %v543_v27  ;;  %v8665_v37 = vpop.f32.mrb[16].mxu0  ;;  %v813_v40 = vpop.f32.mrb[5].mxu1 }
 0x2d0   : > { %v991_v42 = vpop.f32.mrb[17].mxu0  ;;  %v10920_v45 = vadd.f32 %v8665_v37, %v547_v32  ;;  %v10924_v55 = vadd.f32 %v813_v40, %v542_v50 }
 0x2d1   : > { %v1283_v47 = vsel %vm1267_vm3, %v10918_v35, -inf  ;;  %v10930_v7 = vadd.f32 %v991_v42, %v546_v60 }
 0x2d2   : > { %1284 = vmax.xlane.f32.xlu0 %v1283_v47  ;;  %v1295_v57 = vsel %vm1267_vm3, %v10920_v45, -inf  ;;  %v1280_v11 = vsel %vm1267_vm3, %v10924_v55, -inf  ;;  %v548_v47 = vld [vmem:[#allocation7 + $0x50] sm:$0xff] }
 0x2d3   : > { %v1292_v19 = vsel %vm1267_vm3, %v10930_v7, -inf }
 0x2d6   : > { %v8658_v63 = vpop.f32.mrb[6].mxu1  ;;  %1296 = vmax.xlane.f32.xlu0 %v1295_v57 }
 0x2d7   : > { %v10928_v3 = vadd.f32 %v8658_v63, %v545_v52  ;;  %v8679_v4 = vpop.f32.mrb[18].mxu0  ;;  %v902_v5 = vpop.f32.mrb[7].mxu1  ;;  %v553_v52 = vld [vmem:[#allocation7 + $0x78] sm:$0xff] }
 0x2d8   : > { %v1169_v6 = vpop.f32.mrb[19].mxu0  ;;  %v10932_v9 = vadd.f32 %v902_v5, %v544_v1  ;;  %v10938_v16 = vadd.f32 %v8679_v4, %v551_v13  ;;  %v552_v1 = vld [vmem:[#allocation7 + $0x70] sm:$0xff]  ;;  %v10974_v4 = vpop.permute.xlu1 %9719 }
 0x2d9   : > { %v1289_v10 = vsel %vm1267_vm3, %v10928_v3, -inf  ;;  %v10940_v17 = vadd.f32 %v1169_v6, %v550_v15  ;;  %v10978_v6 = vpop.permute.xlu0 %9714 }
 0x2da   : > { %1290 = vmax.xlane.f32.xlu1 %v1289_v10  ;;  %1281 = vmax.xlane.f32.xlu0 %v1280_v11  ;;  %v1286_v18 = vsel %vm1267_vm3, %v10932_v9, -inf  ;;  %v1307_v32 = vsel %vm1267_vm3, %v10938_v16, -inf }
 0x2db   : > { %v1304_v30 = vsel %vm1267_vm3, %v10940_v17, -inf }
 0x2de   : > { %v8672_v23 = vpop.f32.mrb[8].mxu1  ;;  %1287 = vmax.xlane.f32.xlu1 %v1286_v18  ;;  %1293 = vmax.xlane.f32.xlu0 %v1292_v19 }
 0x2df   : > { %v1080_v25 = vpop.f32.mrb[9].mxu1  ;;  %v10946_v27 = vadd.f32 %v8672_v23, %v549_v21 }
 0x2e0   : > { %v10958_v50 = vadd.f32 %v1080_v25, %v548_v47 }
 0x2e1   : > { %v1301_v37 = vsel %vm1267_vm3, %v10946_v27, -inf }
 0x2e2   : > { %1305 = vmax.xlane.f32.xlu1 %v1304_v30  ;;  %1308 = vmax.xlane.f32.xlu0 %v1307_v32  ;;  %v1298_v60 = vsel %vm1267_vm3, %v10958_v50, -inf }
 0x2e6   : > { %v8686_v40 = vpop.f32.mrb[10].mxu1  ;;  %1302 = vmax.xlane.f32.xlu0 %v1301_v37 }
 0x2e7   : > { %v1258_v42 = vpop.f32.mrb[11].mxu1  ;;  %v10960_v57 = vadd.f32 %v8686_v40, %v553_v52 }
 0x2e8   : > { %v10976_v5 = vadd.f32 %v1258_v42, %v552_v1 }
 0x2e9   : > { %v1313_v63 = vsel %vm1267_vm3, %v10960_v57, -inf }
 0x2ea   : > { %v1310_v11 = vsel %vm1267_vm3, %v10976_v5, -inf }
 0x2f3   : > { %9729 = vrot.lane.b32.xlu1 %v10814_v62, %s10426_s9 }
 0x2fc   : > { %9724 = vrot.lane.b32.xlu0 %v10804_v58, %s10426_s9  ;;  %s7853_s9 = sshll.u32 %s12156_s30, 4  ;;  %s12203_s9 = int_to_ptr.vmem [resolvable:$true] %s7853_s9 }
 0x317   : > { %1299 = vmax.xlane.f32.xlu1 %v1298_v60 }
 0x31b   : > { %1314 = vmax.xlane.f32.xlu0 %v1313_v63 }
 0x328   : > { %9739 = vrot.lane.b32.xlu1 %v10752_v33, %s10427_s26 }
 0x32c   : > { %2158 = vrot.lane.b32.xlu1 %v10736_v26, %s10428_s10 }
 0x331   : > { %9734 = vrot.lane.b32.xlu0 %v10742_v28, %s10427_s26 }
 0x335   : > { %9744 = vrot.lane.b32.xlu0 %v10762_v38, %s10427_s26 }
 0x34f   : > { %v1273_v10 = vpop.xlane.xlu1 %1272 }
 0x350   : > { %v1317_v13 = vsub.f32 %v10902_v12, %v1273_v10  ;;  %1311 = vmax.xlane.f32.xlu1 %v1310_v11  ;;  %v1270_v15 = vpop.xlane.xlu0 %1269 }
 0x351   : > { %v1316_v18 = vsub.f32 %v10904_v14, %v1270_v15 }
 0x352   : > { %v1334_v19 = vmul.f32 1.442695, %v1317_v13 }
 0x353   : > { %v1332_v21 = vmul.f32 1.442695, %v1316_v18 }
 0x354   : > { %9973 = vpow2.f32 %v1334_v19 }
 0x355   : > { %9975 = vpow2.f32 %v1332_v21 }
 0x357   : > { %v1279_v23 = vpop.xlane.xlu1 %1278 }
 0x358   : > { %v1319_v25 = vsub.f32 %v10910_v20, %v1279_v23  ;;  %v1276_v30 = vpop.xlane.xlu0 %1275 }
 0x359   : > { %v1318_v32 = vsub.f32 %v10912_v22, %v1276_v30 }
 0x35a   : > { %v1338_v37 = vmul.f32 1.442695, %v1319_v25 }
 0x35b   : > { %v1336_v40 = vmul.f32 1.442695, %v1318_v32 }
 0x35c   : > { %9977 = vpow2.f32 %v1338_v37 }
 0x35d   : > { %9979 = vpow2.f32 %v1336_v40 }
 0x35e   : > { %v10986_v42 = vpop.eup %9973 }
 0x35f   : > { %v10988_v12 = vpop.eup %9975  ;;  %v1285_v47 = vpop.xlane.xlu0 %1284  ;;  %v1367_v14 = vsel %vm1267_vm3, %v10986_v42, 0.0 }
 0x360   : > { %v1321_v52 = vsub.f32 %v10918_v35, %v1285_v47  ;;  %1368 = vadd.xlane.f32.xlu0 %v1367_v14  ;;  %v1364_v20 = vsel %vm1267_vm3, %v10988_v12, 0.0 }
 0x361   : > { %1365 = vadd.xlane.f32.xlu1 %v1364_v20 }
 0x362   : > { %v1342_v22 = vmul.f32 1.442695, %v1321_v52 }
 0x363   : > { %v1297_v60 = vpop.xlane.xlu0 %1296 }
 0x364   : > { %9981 = vpow2.f32 %v1342_v22  ;;  %v1325_v63 = vsub.f32 %v10920_v45, %v1297_v60 }
 0x366   : > { %v10996_v1 = vpop.eup %9977  ;;  %v1350_v10 = vmul.f32 1.442695, %v1325_v63 }
 0x367   : > { %v1291_v11 = vpop.xlane.xlu1 %1290  ;;  %v1282_v13 = vpop.xlane.xlu0 %1281  ;;  %v1373_v15 = vsel %vm1267_vm3, %v10996_v1, 0.0 }
 0x368   : > { %v11000_v18 = vpop.eup %9979  ;;  %9983 = vpow2.f32 %v1350_v10  ;;  %v1323_v35 = vsub.f32 %v10928_v3, %v1291_v11  ;;  %v1320_v19 = vsub.f32 %v10924_v55, %v1282_v13  ;;  %1374 = vadd.xlane.f32.xlu1 %v1373_v15 }
 0x369   : > { %v1370_v30 = vsel %vm1267_vm3, %v11000_v18, 0.0 }
 0x36a   : > { %v1346_v21 = vmul.f32 1.442695, %v1323_v35  ;;  %v1340_v23 = vmul.f32 1.442695, %v1320_v19 }
 0x36b   : > { %v1288_v25 = vpop.xlane.xlu1 %1287  ;;  %v1294_v45 = vpop.xlane.xlu0 %1293 }
 0x36c   : > { %9985 = vpow2.f32 %v1346_v21  ;;  %v1322_v32 = vsub.f32 %v10932_v9, %v1288_v25  ;;  %v1324_v37 = vsub.f32 %v10930_v7, %v1294_v45  ;;  %1371 = vadd.xlane.f32.xlu1 %v1370_v30 }
 0x36d   : > { %9987 = vpow2.f32 %v1340_v23 }
 0x36e   : > { %v11008_v40 = vpop.eup %9981  ;;  %v1344_v3 = vmul.f32 1.442695, %v1322_v32  ;;  %v1348_v47 = vmul.f32 1.442695, %v1324_v37 }
 0x36f   : > { %v1306_v55 = vpop.xlane.xlu1 %1305  ;;  %v1309_v14 = vpop.xlane.xlu0 %1308  ;;  %v1379_v52 = vsel %vm1267_vm3, %v11008_v40, 0.0 }
 0x370   : > { %9989 = vpow2.f32 %v1344_v3  ;;  %v1328_v20 = vsub.f32 %v10940_v17, %v1306_v55  ;;  %v1329_v22 = vsub.f32 %v10938_v16, %v1309_v14  ;;  %1380 = vadd.xlane.f32.xlu0 %v1379_v52 }
 0x371   : > { %9991 = vpow2.f32 %v1348_v47 }
 0x372   : > { %v11014_v9 = vpop.eup %9983  ;;  %v1356_v7 = vmul.f32 1.442695, %v1328_v20  ;;  %v1358_v60 = vmul.f32 1.442695, %v1329_v22 }
 0x373   : > { %v1303_v63 = vpop.xlane.xlu0 %1302  ;;  %v1391_v10 = vsel %vm1267_vm3, %v11014_v9, 0.0  ;;  %v11057_v47 = vpop.permute.xlu1 %9729 }
 0x374   : > { %9993 = vpow2.f32 %v1356_v7  ;;  %v1327_v11 = vsub.f32 %v10946_v27, %v1303_v63  ;;  %1392 = vadd.xlane.f32.xlu0 %v1391_v10 }
 0x375   : > { %9995 = vpow2.f32 %v1358_v60 }
 0x376   : > { %v11019_v13 = vpop.eup %9985  ;;  %v1354_v17 = vmul.f32 1.442695, %v1327_v11 }
 0x377   : > { %v11021_v15 = vpop.eup %9987  ;;  %v1385_v16 = vsel %vm1267_vm3, %v11019_v13, 0.0  ;;  %v11061_v55 = vpop.permute.xlu0 %9724 }
 0x378   : > { %9997 = vpow2.f32 %v1354_v17  ;;  %1386 = vadd.xlane.f32.xlu1 %v1385_v16  ;;  %v1376_v35 = vsel %vm1267_vm3, %v11021_v15, 0.0 }
 0x379   : > { %1377 = vadd.xlane.f32.xlu0 %v1376_v35 }
 0x37a   : > { %v11027_v19 = vpop.eup %9989 }
 0x37b   : > { %v11029_v21 = vpop.eup %9991  ;;  %v1382_v27 = vsel %vm1267_vm3, %v11027_v19, 0.0 }
 0x37c   : > { %1383 = vadd.xlane.f32.xlu1 %v1382_v27  ;;  %v1388_v23 = vsel %vm1267_vm3, %v11029_v21, 0.0 }
 0x37d   : > { %1389 = vadd.xlane.f32.xlu0 %v1388_v23 }
 0x37e   : > { %v11035_v25 = vpop.eup %9993 }
 0x37f   : > { %v11037_v45 = vpop.eup %9995  ;;  %v1400_v30 = vsel %vm1267_vm3, %v11035_v25, 0.0 }
 0x380   : > { %1401 = vadd.xlane.f32.xlu1 %v1400_v30  ;;  %v1403_v32 = vsel %vm1267_vm3, %v11037_v45, 0.0 }
 0x381   : > { %1404 = vadd.xlane.f32.xlu0 %v1403_v32 }
 0x382   : > { %v11043_v37 = vpop.eup %9997 }
 0x383   : > { %v1397_v3 = vsel %vm1267_vm3, %v11043_v37, 0.0 }
 0x385   : > { %1398 = vadd.xlane.f32.xlu0 %v1397_v3 }
 0x391   : > { %9749 = vrot.lane.b32.xlu1 %v10772_v43, %s10427_s26 }
 0x395   : > { %2251 = vrot.lane.b32.xlu1 %v10744_v29, %s10428_s10 }
 0x399   : > { %2340 = vrot.lane.b32.xlu1 %v10756_v36, %s10428_s10 }
 0x39b   : > { %2160 = vrot.lane.b32.xlu0 %v10734_v24, %s10428_s10 }
 0x39f   : > { %2249 = vrot.lane.b32.xlu0 %v10746_v31, %s10428_s10 }
 0x3a3   : > { %9754 = vrot.lane.b32.xlu0 %v10784_v48, %s10427_s26 }
 0x3a4   : > { %v1300_v14 = vpop.xlane.xlu1 %1299 }
 0x3a5   : > { %v1326_v52 = vsub.f32 %v10958_v50, %v1300_v14 }
 0x3a7   : > { %2342 = vrot.lane.b32.xlu0 %v10754_v34, %s10428_s10  ;;  %v1352_v22 = vmul.f32 1.442695, %v1326_v52 }
 0x3a8   : > { %v1315_v20 = vpop.xlane.xlu0 %1314  ;;  %v11089_v11 = vpop.permute.xlu1 %9739 }
 0x3a9   : > { %v1331_v7 = vsub.f32 %v10960_v57, %v1315_v20  ;;  %9999 = vpow2.f32 %v1352_v22 }
 0x3ab   : > { %2431 = vrot.lane.b32.xlu0 %v10766_v41, %s10428_s10  ;;  %v1362_v60 = vmul.f32 1.442695, %v1331_v7 }
 0x3ac   : > { %v11091_v17 = vpop.permute.xlu1 %2158  ;;  %v11094_v23 = vpop.permute.xlu0 %9734 }
 0x3ad   : > { %10001 = vpow2.f32 %v1362_v60  ;;  %v9716_v60 = vunpack.i.l.bf16 %v10978_v6 }
 0x3af   : > { %9764 = vrot.lane.b32.xlu0 %v10804_v58, %s10427_s26 }
 0x3b0   : > { %v11096_v30 = vpop.permute.xlu0 %9744 }
 0x3b3   : > { %2524 = vrot.lane.b32.xlu0 %v10774_v44, %s10428_s10  ;;  %v11075_v50 = vpop.eup %9999 }
 0x3b4   : > { %v1394_v57 = vsel %vm1267_vm3, %v11075_v50, 0.0 }
 0x3b7   : > { %2613 = vrot.lane.b32.xlu0 %v10790_v51, %s10428_s10  ;;  %v11081_v63 = vpop.eup %10001 }
 0x3b8   : > { %v1409_v10 = vsel %vm1267_vm3, %v11081_v63, 0.0 }
 0x3bb   : > { %2704 = vrot.lane.b32.xlu0 %v10798_v56, %s10428_s10 }
 0x3bd   : > { %1395 = vadd.xlane.f32.xlu1 %v1394_v57 }
 0x3bf   : > { %2795 = vrot.lane.b32.xlu0 %v10808_v61, %s10428_s10 }
 0x3c1   : > { %1410 = vadd.xlane.f32.xlu1 %v1409_v10 }
 0x3c3   : > { %9779 = vrot.lane.b32.xlu0 %v10752_v33, %s10429_s8 }
 0x3dd   : > { %v1312_v16 = vpop.xlane.xlu1 %1311 }
 0x3de   : > { %v1330_v35 = vsub.f32 %v10976_v5, %v1312_v16  ;;  %v9717_v5 = vunpack.i.h.bf16 %v10978_v6 }
 0x3e0   : > { %v1360_v27 = vmul.f32 1.442695, %v1330_v35 }
 0x3e2   : > { %10003 = vpow2.f32 %v1360_v27  ;;  %v9255_v27 = vpack.c.bf16 %v9717_v5, %v9716_v60 }
 0x3ec   : > { %v11098_v32 = vpop.eup %10003 }
 0x3ed   : > { %v1369_v3 = vpop.xlane.xlu0 %1368  ;;  %v1406_v14 = vsel %vm1267_vm3, %v11098_v32, 0.0 }
 0x3ee   : > { %10005 = vrcp.f32 %v1369_v3  ;;  %v1366_v52 = vpop.xlane.xlu1 %1365  ;;  %1407 = vadd.xlane.f32.xlu1 %v1406_v14  ;;  %v9721_v14 = vunpack.i.l.bf16 %v10974_v4 }
 0x3ef   : > { %10007 = vrcp.f32 %v1366_v52 }
 0x3f5   : > { %v1375_v20 = vpop.xlane.xlu1 %1374 }
 0x3f6   : > { %10009 = vrcp.f32 %v1375_v20 }
 0x3f8   : > { %v10006_v22 = vpop.eup %10005 }
 0x3f9   : > { %v10008_v7 = vpop.eup %10007  ;;  %v1372_v57 = vpop.xlane.xlu1 %1371  ;;  %v1429_v16 = vmul.f32 %v10006_v22, %v10986_v42  ;;  %v9722_v42 = vunpack.i.h.bf16 %v10974_v4 }
 0x3fa   : > { %10011 = vrcp.f32 %v1372_v57  ;;  %v1428_v10 = vmul.f32 %v10008_v7, %v10988_v12 }
 0x3fb   : > { %v9259_v7 = vpack.c.bf16 %v9722_v42, %v9721_v14  ;;  %v9732_v14 = vunpack.i.h.bf16 %v11057_v47 }
 0x3fc   : > { %8691 = vmatprep.mubr.msk.f32.mxu0 %vm1267_vm3, %v1428_v10  ;;  %v9727_v10 = vunpack.i.h.bf16 %v11061_v55 }
 0x3fd   : > { %8692 = vmatmul.mubr.msk.f32.vlgmr.msra.gmra.mrb[20].mxu0 %vm1267_vm3, %v1429_v16  ;;  %v1381_v35 = vpop.xlane.xlu0 %1380 }
 0x3fe   : > { %9250 = vmatpush3.bf16.msra.mxu0 %v10884_v0  ;;  %10013 = vrcp.f32 %v1381_v35 }
 0x3ff   : > { %9256 = vmatprep.subr.bf16.mxu0 %v9255_v27  ;;  %9759 = vrot.lane.b32.xlu1 %v10794_v53, %s10427_s26 }
 0x400   : > { %v10010_v3 = vpop.eup %10009 }
 0x401   : > { %v1393_v6 = vpop.xlane.xlu0 %1392  ;;  %v1431_v0 = vmul.f32 %v10010_v3, %v10996_v1 }
 0x403   : > { %2433 = vrot.lane.b32.xlu1 %v10764_v39, %s10428_s10 }
 0x404   : > { %v10012_v12 = vpop.eup %10011 }
 0x405   : > { %v1387_v52 = vpop.xlane.xlu1 %1386  ;;  %v1430_v20 = vmul.f32 %v10012_v12, %v11000_v18 }
 0x406   : > { %v1378_v22 = vpop.xlane.xlu0 %1377 }
 0x407   : > { %10015 = vrcp.f32 %v1378_v22  ;;  %8698 = vmatprep.mubr.msk.f32.mxu1 %vm1267_vm3, %v1430_v20  ;;  %2522 = vrot.lane.b32.xlu1 %v10776_v46, %s10428_s10  ;;  %v9736_v22 = vunpack.i.l.bf16 %v11094_v23 }
 0x408   : > { %10017 = vrcp.f32 %v1393_v6  ;;  %8699 = vmatmul.mubr.msk.f32.vlgmr.msra.gmra.mrb[12].mxu1 %vm1267_vm3, %v1431_v0  ;;  %v10014_v60 = vpop.eup %10013 }
 0x409   : > { %10019 = vrcp.f32 %v1387_v52  ;;  %9254 = vmatpush3.bf16.msra.mxu1 %v10899_v8  ;;  %v1384_v4 = vpop.xlane.xlu1 %1383  ;;  %v9726_v8 = vunpack.i.l.bf16 %v11061_v55  ;;  %v1433_v12 = vmul.f32 %v10014_v60, %v11008_v40  ;;  %v9731_v52 = vunpack.i.l.bf16 %v11057_v47 }
 0x40a   : > { %9260 = vmatprep.subr.bf16.mxu1 %v9259_v7  ;;  %10021 = vrcp.f32 %v1384_v4  ;;  %v1390_v18 = vpop.xlane.xlu0 %1389  ;;  %v9737_v55 = vunpack.i.h.bf16 %v11094_v23 }
 0x40b   : > { %10023 = vrcp.f32 %v1390_v18  ;;  %9769 = vrot.lane.b32.xlu1 %v10814_v62, %s10427_s26 }
 0x40d   : > { %v1402_v1 = vpop.xlane.xlu1 %1401 }
 0x40e   : > { %10025 = vrcp.f32 %v1402_v1  ;;  %v1405_v5 = vpop.xlane.xlu0 %1404 }
 0x40f   : > { %10027 = vrcp.f32 %v1405_v5  ;;  %2615 = vrot.lane.b32.xlu1 %v10786_v49, %s10428_s10  ;;  %v9271_v5 = vpack.c.bf16 %v9737_v55, %v9736_v22  ;;  %v9742_v22 = vunpack.i.h.bf16 %v11089_v11 }
 0x411   : > { %v10016_v57 = vpop.eup %10015 }
 0x412   : > { %v10018_v16 = vpop.eup %10017  ;;  %v11128_v35 = vpop.xlane.xlu0 %1398  ;;  %v1432_v6 = vmul.f32 %v10016_v57, %v11021_v15  ;;  %v9263_v15 = vpack.c.bf16 %v9727_v10, %v9726_v8 }
 0x413   : > { %v10020_v3 = vpop.eup %10019  ;;  %2706 = vrot.lane.b32.xlu1 %v10796_v54, %s10428_s10  ;;  %v1437_v18 = vmul.f32 %v10018_v16, %v11014_v9  ;;  %10029 = vrcp.f32 %v11128_v35 }
 0x414   : > { %v10022_v42 = vpop.eup %10021  ;;  %8705 = vmatprep.mubr.msk.f32.mxu0 %vm1267_vm3, %v1432_v6  ;;  %v1435_v47 = vmul.f32 %v10020_v3, %v11019_v13 }
 0x415   : > { %v10024_v20 = vpop.eup %10023  ;;  %8706 = vmatmul.mubr.msk.f32.vlgmr.msra.gmra.mrb[22].mxu0 %vm1267_vm3, %v1433_v12  ;;  %v1434_v0 = vmul.f32 %v10022_v42, %v11027_v19  ;;  %v9267_v19 = vpack.c.bf16 %v9732_v14, %v9731_v52 }
 0x416   : > { %9258 = vmatpush3.bf16.msra.mxu0 %v9255_v27  ;;  %v2161_v4 = vpop.permute.xlu0 %2160  ;;  %v1436_v40 = vmul.f32 %v10024_v20, %v11029_v21  ;;  %v9747_v27 = vunpack.i.h.bf16 %v11096_v30 }
 0x417   : > { %9264 = vmatprep.subr.bf16.mxu0 %v9263_v15  ;;  %8712 = vmatprep.mubr.msk.f32.mxu1 %vm1267_vm3, %v1434_v0 }
 0x418   : > { %v10026_v1 = vpop.eup %10025  ;;  %2797 = vrot.lane.b32.xlu1 %v10806_v59, %s10428_s10  ;;  %8719 = vmatprep.mubr.msk.f32.mxu0 %vm1267_vm3, %v1436_v40 }
 0x419   : > { %v10028_v23 = vpop.eup %10027  ;;  %8713 = vmatmul.mubr.msk.f32.vlgmr.msra.gmra.mrb[14].mxu1 %vm1267_vm3, %v1435_v47  ;;  %8720 = vmatmul.mubr.msk.f32.vlgmr.msra.gmra.mrb[24].mxu0 %vm1267_vm3, %v1437_v18  ;;  %v1440_v21 = vmul.f32 %v10026_v1, %v11035_v25  ;;  %v9746_v25 = vunpack.i.l.bf16 %v11096_v30 }
 0x41a   : > { %9262 = vmatpush3.bf16.msra.mxu1 %v9259_v7  ;;  %9266 = vmatpush3.bf16.msra.mxu0 %v9263_v15  ;;  %v11151_v13 = vpop.permute.xlu0 %2249  ;;  %v1441_v9 = vmul.f32 %v10028_v23, %v11037_v45  ;;  %v9750_v7 = vpop.permute.xlu1 %9749  ;;  %v9741_v15 = vunpack.i.l.bf16 %v11089_v11 }
 0x41b   : > { %9268 = vmatprep.subr.bf16.mxu1 %v9267_v19  ;;  %9273 = vmatprep.subr.msk.bf16.mxu0 %vm10832_vm2, %v9271_v5  ;;  %v9283_v45 = vpack.c.bf16 %v9747_v27, %v9746_v25 }
 0x41c   : > { %9774 = vrot.lane.b32.xlu1 %v10742_v28, %s10429_s8  ;;  %8733 = vmatprep.mubr.msk.f32.mxu0 %vm1267_vm3, %v1440_v21  ;;  %v9277_v40 = vpack.c.bf16 %v9742_v22, %v9741_v15  ;;  %v9751_v21 = vunpack.i.l.bf16 %v9750_v7 }
 0x41d   : > { %8734 = vmatmul.mubr.msk.f32.vlgmr.msra.gmra.mrb[26].mxu0 %vm1267_vm3, %v1441_v9  ;;  %v10030_v20 = vpop.eup %10029 }
 0x41e   : > { %v9755_v60 = vpop.permute.xlu0 %9754  ;;  %8747 = vmatprep.mubr.msk.f32.mxu0 %vm560_vm1, %v11091_v17  ;;  %v11168_v10 = vpop.permute.xlu1 %2251 }
 0x41f   : > { %v9757_v30 = vunpack.i.h.bf16 %v9755_v60  ;;  %v9756_v8 = vunpack.i.l.bf16 %v9755_v60 }
 0x420   : > { %9784 = vrot.lane.b32.xlu1 %v10762_v38, %s10429_s8 }
 0x421   : > { %v9295_v6 = vpack.c.bf16 %v9757_v30, %v9756_v8 }
 0x422   : > { %v2343_v57 = vpop.permute.xlu0 %2342  ;;  %v2341_v17 = vpop.permute.xlu1 %2340 }
 0x423   : > { %9276 = vmatpush3.bf16.xpose.msk.msra.mxu0 %vm10832_vm2, %v9271_v5 }
 0x424   : > { %9285 = vmatprep.subr.msk.bf16.mxu0 %vm10832_vm2, %v9283_v45  ;;  %9789 = vrot.lane.b32.xlu1 %v10772_v43, %s10429_s8 }
 0x426   : > { %v2432_v16 = vpop.permute.xlu0 %2431 }
 0x42a   : > { %8748 = vmatmul.mubr.msk.f32.vlgmr.msra.gmra.mrb[28].mxu0 %vm560_vm1, %v2161_v4  ;;  %v9765_v3 = vpop.permute.xlu0 %9764  ;;  %v1439_v4 = vmul.f32 %v10030_v20, %v11043_v37  ;;  %v9752_v37 = vunpack.i.h.bf16 %v9750_v7 }
 0x42b   : > { %9288 = vmatpush3.bf16.xpose.msk.msra.mxu0 %vm10832_vm2, %v9283_v45  ;;  %8761 = vmatprep.mubr.msk.f32.mxu0 %vm560_vm1, %v2341_v17  ;;  %v9767_v12 = vunpack.i.h.bf16 %v9765_v3  ;;  %v9766_v42 = vunpack.i.l.bf16 %v9765_v3 }
 0x42c   : > { %9297 = vmatprep.subr.msk.bf16.mxu0 %vm10832_vm2, %v9295_v6  ;;  %v9289_v25 = vpack.c.bf16 %v9752_v37, %v9751_v21 }
 0x42d   : > { %v9307_v14 = vpack.c.bf16 %v9767_v12, %v9766_v42 }
 0x42e   : > { %v2525_v18 = vpop.permute.xlu0 %2524 }
 0x432   : > { %8762 = vmatmul.mubr.msk.f32.vlgmr.msra.gmra.mrb[30].mxu0 %vm560_vm1, %v2343_v57  ;;  %v2614_v23 = vpop.permute.xlu0 %2613 }
 0x433   : > { %9300 = vmatpush3.bf16.xpose.msk.msra.mxu0 %vm10832_vm2, %v9295_v6 }
 0x434   : > { %9309 = vmatprep.subr.msk.bf16.mxu0 %vm10832_vm2, %v9307_v14 }
 0x436   : > { %v2705_v60 = vpop.permute.xlu0 %2704 }
 0x44a   : > { %v1396_v52 = vpop.xlane.xlu1 %1395 }
 0x44b   : > { %10031 = vrcp.f32 %v1396_v52 }
 0x44e   : > { %v1411_v35 = vpop.xlane.xlu1 %1410 }
 0x44f   : > { %10033 = vrcp.f32 %v1411_v35 }
 0x455   : > { %v10032_v55 = vpop.eup %10031 }
 0x456   : > { %v1438_v0 = vmul.f32 %v10032_v55, %v11075_v50 }
 0x458   : > { %8726 = vmatprep.mubr.msk.f32.mxu1 %vm1267_vm3, %v1438_v0 }
 0x459   : > { %8727 = vmatmul.mubr.msk.f32.vlgmr.msra.gmra.mrb[16].mxu1 %vm1267_vm3, %v1439_v4  ;;  %v10034_v50 = vpop.eup %10033 }
 0x45a   : > { %9270 = vmatpush3.bf16.msra.mxu1 %v9267_v19  ;;  %v1443_v19 = vmul.f32 %v10034_v50, %v11081_v63 }
 0x45b   : > { %9279 = vmatprep.subr.msk.bf16.mxu1 %vm10832_vm2, %v9277_v40 }
 0x47b   : > { %v1408_v47 = vpop.xlane.xlu1 %1407 }
 0x47c   : > { %10035 = vrcp.f32 %v1408_v47 }
 0x47f   : > { %v9760_v1 = vpop.permute.xlu1 %9759 }
 0x480   : > { %v9762_v63 = vunpack.i.h.bf16 %v9760_v1  ;;  %v9761_v7 = vunpack.i.l.bf16 %v9760_v1 }
 0x482   : > { %v9301_v57 = vpack.c.bf16 %v9762_v63, %v9761_v7  ;;  %v2142_v7 = vld [vmem:[#allocation7 + $0x80] sm:$0xff] }
 0x483   : > { %v2434_v11 = vpop.permute.xlu1 %2433 }
 0x486   : > { %v10036_v5 = vpop.eup %10035 }
 0x487   : > { %v2523_v9 = vpop.permute.xlu1 %2522  ;;  %v1442_v27 = vmul.f32 %v10036_v5, %v11098_v32 }
 0x488   : > { %8775 = vmatprep.mubr.msk.f32.mxu0 %vm560_vm1, %v2523_v9 }
 0x489   : > { %8740 = vmatprep.mubr.msk.f32.mxu1 %vm1267_vm3, %v1442_v27  ;;  %8776 = vmatmul.mubr.msk.f32.vlgmr.msra.gmra.mrb[32].mxu0 %vm560_vm1, %v2525_v18 }
 0x48a   : > { %9312 = vmatpush3.bf16.xpose.msk.msra.mxu0 %vm10832_vm2, %v9307_v14  ;;  %8741 = vmatmul.mubr.msk.f32.vlgmr.msra.gmra.mrb[18].mxu1 %vm1267_vm3, %v1443_v19 }
 0x48b   : > { %9282 = vmatpush3.bf16.xpose.msk.msra.mxu1 %vm10832_vm2, %v9277_v40  ;;  %8789 = vmatprep.mubr.msk.f32.mxu0 %vm560_vm1, %v2705_v60  ;;  %v9770_v32 = vpop.permute.xlu1 %9769 }
 0x48c   : > { %8754 = vmatprep.mubr.msk.f32.mxu1 %vm560_vm1, %v11151_v13  ;;  %9291 = vmatprep.subr.msk.bf16.mxu1 %vm10832_vm2, %v9289_v25  ;;  %v2796_v13 = vpop.permute.xlu0 %2795  ;;  %v9772_v8 = vunpack.i.h.bf16 %v9770_v32  ;;  %v9771_v17 = vunpack.i.l.bf16 %v9770_v32  ;;  %v2143_v32 = vld [vmem:[#allocation7 + $0x88] sm:$0xff] }
 0x48e   : > { %v9313_v3 = vpack.c.bf16 %v9772_v8, %v9771_v17  ;;  %v2147_v8 = vld [vmem:[#allocation7 + $0xa8] sm:$0xff] }
 0x48f   : > { %v2616_v45 = vpop.permute.xlu1 %2615 }
 0x490   : > { %v9780_v12 = vpop.permute.xlu0 %9779 }
 0x491   : > { %v9782_v14 = vunpack.i.h.bf16 %v9780_v12  ;;  %v9781_v52 = vunpack.i.l.bf16 %v9780_v12 }
 0x492   : > { %8755 = vmatmul.mubr.msk.f32.vlgmr.msra.gmra.mrb[20].mxu1 %vm560_vm1, %v11168_v10 }
 0x493   : > { %9294 = vmatpush3.bf16.xpose.msk.msra.mxu1 %vm10832_vm2, %v9289_v25  ;;  %8768 = vmatprep.mubr.msk.f32.mxu1 %vm560_vm1, %v2432_v16  ;;  %v2707_v30 = vpop.permute.xlu1 %2706  ;;  %v9323_v0 = vpack.c.bf16 %v9782_v14, %v9781_v52 }
 0x494   : > { %9303 = vmatprep.subr.msk.bf16.mxu1 %vm10832_vm2, %v9301_v57  ;;  %8790 = vmatmul.mubr.msk.f32.vlgmr.msra.gmra.mrb[34].mxu0 %vm560_vm1, %v2707_v30 }
 0x497   : > { %v2798_v6 = vpop.permute.xlu1 %2797 }
 0x49a   : > { %8769 = vmatmul.mubr.msk.f32.vlgmr.msra.gmra.mrb[22].mxu1 %vm560_vm1, %v2434_v11 }
 0x49b   : > { %9306 = vmatpush3.bf16.xpose.msk.msra.mxu1 %vm10832_vm2, %v9301_v57  ;;  %8782 = vmatprep.mubr.msk.f32.mxu1 %vm560_vm1, %v2614_v23  ;;  %v9775_v10 = vpop.permute.xlu1 %9774 }
 0x49c   : > { %v9777_v16 = vunpack.i.h.bf16 %v9775_v10  ;;  %v9776_v42 = vunpack.i.l.bf16 %v9775_v10  ;;  %9315 = vmatprep.subr.msk.bf16.mxu1 %vm10832_vm2, %v9313_v3 }
 0x49e   : > { %v9319_v20 = vpack.c.bf16 %v9777_v16, %v9776_v42 }
 0x49f   : > { %v9785_v55 = vpop.permute.xlu1 %9784 }
 0x4a0   : > { %v9787_v22 = vunpack.i.h.bf16 %v9785_v55  ;;  %v9786_v15 = vunpack.i.l.bf16 %v9785_v55  ;;  %9320 = vmatprep.subr.bf16.mxu0 %v9319_v20 }
 0x4a1   : > { %9322 = vmatpush3.bf16.msra.mxu0 %v9319_v20 }
 0x4a2   : > { %8783 = vmatmul.mubr.msk.f32.vlgmr.msra.gmra.mrb[24].mxu1 %vm560_vm1, %v2616_v45  ;;  %v11224_v4 = vpack.c.bf16 %v9787_v22, %v9786_v15 }
 0x4a3   : > { %9318 = vmatpush3.bf16.xpose.msk.msra.mxu1 %vm10832_vm2, %v9313_v3  ;;  %8796 = vmatprep.mubr.msk.f32.mxu1 %vm560_vm1, %v2796_v13  ;;  %v9790_v40 = vpop.permute.xlu1 %9789  ;;  %v2146_v3 = vld [vmem:[#allocation7 + $0xa0] sm:$0xff] }
 0x4a4   : > { %9324 = vmatprep.subr.bf16.mxu1 %v9323_v0  ;;  %9328 = vmatprep.subr.bf16.mxu0 %v11224_v4  ;;  %v9792_v35 = vunpack.i.h.bf16 %v9790_v40  ;;  %v9791_v47 = vunpack.i.l.bf16 %v9790_v40  ;;  %v2145_v40 = vld [vmem:[#allocation7 + $0x98] sm:$0xff] }
 0x4a6   : > { %v11231_v18 = vpack.c.bf16 %v9792_v35, %v9791_v47  ;;  %v2144_v35 = vld [vmem:[#allocation7 + $0x90] sm:$0xff]  ;;  %v2151_v47 = vld [vmem:[#allocation7 + $0xc8] sm:$0xff] }
 0x4aa   : > { %8797 = vmatmul.mubr.msk.f32.vlgmr.msra.gmra.mrb[26].mxu1 %vm560_vm1, %v2798_v6 }
 0x4ab   : > { %9326 = vmatpush3.bf16.msra.mxu1 %v9323_v0 }
 0x4ac   : > { %9332 = vmatprep.subr.bf16.mxu1 %v11231_v18 }
 0x4d0   : > { %v11234_v1 = vpop.f32.mrb[20].mxu0 }
 0x4d1   : > { %v11236_v11 = vpop.f32.mrb[21].mxu0 }
 0x4db   : > { %v11238_v23 = vpop.f32.mrb[12].mxu1 }
 0x4dc   : > { %v11240_v50 = vpop.f32.mrb[13].mxu1 }
 0x4e8   : > { %v11242_v5 = vpop.f32.mrb[22].mxu0 }
 0x4e9   : > { %v11244_v37 = vpop.f32.mrb[23].mxu0 }
 0x4ec   : > { %v11246_v21 = vpop.f32.mrb[14].mxu1  ;;  %v11248_v9 = vpop.f32.mrb[24].mxu0 }
 0x4ed   : > { %12277 = vst [vmem:[#allocation15_spill] sm:$0xff] %v11246_v21  ;;  %12278 = vst [vmem:[#allocation16_spill] sm:$0xff] %v11248_v9  ;;  %v11250_v27 = vpop.f32.mrb[15].mxu1  ;;  %v11252_v19 = vpop.f32.mrb[25].mxu0 }
 0x4ee   : > { %12279 = vst [vmem:[#allocation17_spill] sm:$0xff] %v11250_v27  ;;  %12280 = vst [vmem:[#allocation18_spill] sm:$0xff] %v11252_v19 }
 0x4f0   : > { %v11254_v25 = vpop.f32.mrb[26].mxu0 }
 0x4f1   : > { %12281 = vst [vmem:[#allocation19_spill] sm:$0xff] %v11254_v25  ;;  %v11256_v60 = vpop.f32.mrb[27].mxu0  ;;  %v2156_v25 = vld [vmem:[#allocation7 + $0xf0] sm:$0xff] }
 0x4f2   : > { %12282 = vst [vmem:[#allocation20_spill] sm:$0xff] %v11256_v60 }
 0x4fd   : > { %v8749_v63 = vpop.f32.mrb[28].mxu0 }
 0x4fe   : > { %v11258_v45 = vadd.f32 %v8749_v63, %v2143_v32  ;;  %v2240_v57 = vpop.f32.mrb[29].mxu0  ;;  %v2150_v63 = vld [vmem:[#allocation7 + $0xc0] sm:$0xff] }
 0x4ff   : > { %v11260_v30 = vadd.f32 %v2240_v57, %v2142_v7 }
 0x500   : > { %v2889_v13 = vsel %vm1267_vm3, %v11258_v45, -inf }
 0x501   : > { %2890 = vmax.xlane.f32.xlu0 %v2889_v13  ;;  %v2886_v17 = vsel %vm1267_vm3, %v11260_v30, -inf }
 0x505   : > { %v8763_v6 = vpop.f32.mrb[30].mxu0  ;;  %2887 = vmax.xlane.f32.xlu0 %v2886_v17 }
 0x506   : > { %v11266_v12 = vadd.f32 %v8763_v6, %v2147_v8  ;;  %v2422_v10 = vpop.f32.mrb[31].mxu0 }
 0x507   : > { %v11268_v16 = vadd.f32 %v2422_v10, %v2146_v3 }
 0x508   : > { %v2901_v42 = vsel %vm1267_vm3, %v11266_v12, -inf }
 0x509   : > { %2902 = vmax.xlane.f32.xlu1 %v2901_v42  ;;  %v2898_v14 = vsel %vm1267_vm3, %v11268_v16, -inf }
 0x50d   : > { %2899 = vmax.xlane.f32.xlu1 %v2898_v14  ;;  %v2154_v14 = vld [vmem:[#allocation7 + $0xe0] sm:$0xff] }
 0x52c   : > { %v11274_v52 = vpop.f32.mrb[16].mxu1 }
 0x52d   : > { %12283 = vst [vmem:[#allocation21_spill] sm:$0xff] %v11274_v52  ;;  %v11276_v20 = vpop.f32.mrb[17].mxu1 }
 0x52e   : > { %12284 = vst [vmem:[#allocation22_spill] sm:$0xff] %v11276_v20 }
 0x55c   : > { %v8777_v55 = vpop.f32.mrb[32].mxu0 }
 0x55d   : > { %v11278_v22 = vpop.f32.mrb[18].mxu1  ;;  %v2604_v15 = vpop.f32.mrb[33].mxu0  ;;  %v11286_v17 = vadd.f32 %v8777_v55, %v2151_v47  ;;  %v2148_v47 = vld [vmem:[#allocation7 + $0xb0] sm:$0xff] }
 0x55e   : > { %12285 = vst [vmem:[#allocation23_spill] sm:$0xff] %v11278_v22  ;;  %v11280_v0 = vpop.f32.mrb[19].mxu1  ;;  %v11290_v10 = vadd.f32 %v2604_v15, %v2150_v63  ;;  %v2155_v22 = vld [vmem:[#allocation7 + $0xe8] sm:$0xff] }
 0x55f   : > { %12286 = vst [vmem:[#allocation24_spill] sm:$0xff] %v11280_v0 }
 0x565   : > { %v8756_v32 = vpop.f32.mrb[20].mxu1 }
 0x566   : > { %v11282_v7 = vadd.f32 %v8756_v32, %v2145_v40  ;;  %v2331_v57 = vpop.f32.mrb[21].mxu1  ;;  %v2149_v40 = vld [vmem:[#allocation7 + $0xb8] sm:$0xff] }
 0x567   : > { %v11284_v13 = vadd.f32 %v2331_v57, %v2144_v35  ;;  %v8791_v8 = vpop.f32.mrb[34].mxu0  ;;  %v2913_v35 = vsel %vm1267_vm3, %v11286_v17, -inf  ;;  %v2910_v57 = vsel %vm1267_vm3, %v11290_v10, -inf }
 0x568   : > { %v2786_v6 = vpop.f32.mrb[35].mxu0  ;;  %v2895_v3 = vsel %vm1267_vm3, %v11282_v7, -inf }
 0x569   : > { %2896 = vmax.xlane.f32.xlu0 %v2895_v3  ;;  %v2892_v42 = vsel %vm1267_vm3, %v11284_v13, -inf  ;;  %v11296_v32 = vadd.f32 %v2786_v6, %v2154_v14  ;;  %v11308_v14 = vadd.f32 %v8791_v8, %v2155_v22  ;;  %v2157_v8 = vld [vmem:[#allocation7 + $0xf8] sm:$0xff] }
 0x56a   : > { %2893 = vmax.xlane.f32.xlu1 %v2892_v42 }
 0x56b   : > { %v2922_v6 = vsel %vm1267_vm3, %v11296_v32, -inf }
 0x56d   : > { %v8770_v55 = vpop.f32.mrb[22].mxu1  ;;  %2914 = vmax.xlane.f32.xlu0 %v2913_v35 }
 0x56e   : > { %v11300_v15 = vadd.f32 %v8770_v55, %v2149_v40  ;;  %v2513_v63 = vpop.f32.mrb[23].mxu1  ;;  %2911 = vmax.xlane.f32.xlu1 %v2910_v57  ;;  %v2152_v40 = vld [vmem:[#allocation7 + $0xd0] sm:$0xff]  ;;  %v2153_v55 = vld [vmem:[#allocation7 + $0xd8] sm:$0xff] }
 0x56f   : > { %v11302_v3 = vadd.f32 %v2513_v63, %v2148_v47 }
 0x570   : > { %v2907_v42 = vsel %vm1267_vm3, %v11300_v15, -inf }
 0x571   : > { %2908 = vmax.xlane.f32.xlu0 %v2907_v42  ;;  %v2904_v35 = vsel %vm1267_vm3, %v11302_v3, -inf  ;;  %v2925_v42 = vsel %vm1267_vm3, %v11308_v14, -inf }
 0x572   : > { %2923 = vmax.xlane.f32.xlu1 %v2922_v6 }
 0x575   : > { %v8784_v0 = vpop.f32.mrb[24].mxu1  ;;  %2905 = vmax.xlane.f32.xlu0 %v2904_v35 }
 0x576   : > { %v2695_v47 = vpop.f32.mrb[25].mxu1  ;;  %v11314_v63 = vadd.f32 %v8784_v0, %v2153_v55 }
 0x577   : > { %v11312_v57 = vadd.f32 %v2695_v47, %v2152_v40 }
 0x578   : > { %v2919_v6 = vsel %vm1267_vm3, %v11314_v63, -inf }
 0x579   : > { %2926 = vmax.xlane.f32.xlu0 %v2925_v42  ;;  %v2916_v22 = vsel %vm1267_vm3, %v11312_v57, -inf }
 0x57a   : > { %2917 = vmax.xlane.f32.xlu1 %v2916_v22 }
 0x57d   : > { %v8798_v60 = vpop.f32.mrb[26].mxu1  ;;  %2920 = vmax.xlane.f32.xlu0 %v2919_v6 }
 0x57e   : > { %v11322_v35 = vadd.f32 %v8798_v60, %v2157_v8  ;;  %v2877_v40 = vpop.f32.mrb[27].mxu1 }
 0x57f   : > { %v11324_v0 = vadd.f32 %v2877_v40, %v2156_v25 }
 0x580   : > { %v2931_v55 = vsel %vm1267_vm3, %v11322_v35, -inf }
 0x581   : > { %2932 = vmax.xlane.f32.xlu0 %v2931_v55  ;;  %v2928_v47 = vsel %vm1267_vm3, %v11324_v0, -inf }
 0x582   : > { %2929 = vmax.xlane.f32.xlu1 %v2928_v47 }
 0x58e   : > { %v2891_v42 = vpop.xlane.xlu0 %2890 }
 0x58f   : > { %v2935_v60 = vsub.f32 %v11258_v45, %v2891_v42 }
 0x591   : > { %v2952_v8 = vmul.f32 1.442695, %v2935_v60 }
 0x592   : > { %v2888_v22 = vpop.xlane.xlu0 %2887 }
 0x593   : > { %9799 = vrot.lane.b32.xlu1 %v10794_v53, %s10429_s8  ;;  %v2934_v6 = vsub.f32 %v11260_v30, %v2888_v22  ;;  %10037 = vpow2.f32 %v2952_v8 }
 0x595   : > { %v2950_v40 = vmul.f32 1.442695, %v2934_v6 }
 0x596   : > { %v2903_v25 = vpop.xlane.xlu1 %2902 }
 0x597   : > { %9794 = vrot.lane.b32.xlu0 %v10784_v48, %s10429_s8  ;;  %v2939_v55 = vsub.f32 %v11266_v12, %v2903_v25  ;;  %10039 = vpow2.f32 %v2950_v40 }
 0x599   : > { %v2960_v47 = vmul.f32 1.442695, %v2939_v55 }
 0x59a   : > { %v2900_v52 = vpop.xlane.xlu1 %2899 }
 0x59b   : > { %v2938_v20 = vsub.f32 %v11268_v16, %v2900_v52  ;;  %10041 = vpow2.f32 %v2960_v47 }
 0x59d   : > { %v2958_v9 = vmul.f32 1.442695, %v2938_v20  ;;  %v11338_v19 = vpop.eup %10037 }
 0x59e   : > { %v2985_v45 = vsel %vm1267_vm3, %v11338_v19, 0.0 }
 0x59f   : > { %10043 = vpow2.f32 %v2958_v9 }
 0x5a1   : > { %v11342_v42 = vpop.eup %10039 }
 0x5a2   : > { %v2982_v30 = vsel %vm1267_vm3, %v11342_v42, 0.0 }
 0x5a5   : > { %v11346_v12 = vpop.eup %10041 }
 0x5a6   : > { %v2997_v16 = vsel %vm1267_vm3, %v11346_v12, 0.0 }
 0x5a9   : > { %v11350_v52 = vpop.eup %10043 }
 0x5aa   : > { %v2994_v9 = vsel %vm1267_vm3, %v11350_v52, 0.0 }
 0x5b7   : > { %2986 = vadd.xlane.f32.xlu1 %v2985_v45 }
 0x5bb   : > { %2983 = vadd.xlane.f32.xlu1 %v2982_v30 }
 0x5bf   : > { %2998 = vadd.xlane.f32.xlu1 %v2997_v16 }
 0x5c3   : > { %2995 = vadd.xlane.f32.xlu1 %v2994_v9 }
 0x5f6   : > { %v2897_v20 = vpop.xlane.xlu0 %2896 }
 0x5f7   : > { %v2937_v60 = vsub.f32 %v11282_v7, %v2897_v20  ;;  %v2894_v22 = vpop.xlane.xlu1 %2893 }
 0x5f8   : > { %v2936_v25 = vsub.f32 %v11284_v13, %v2894_v22 }
 0x5f9   : > { %v2956_v8 = vmul.f32 1.442695, %v2937_v60 }
 0x5fa   : > { %v2954_v6 = vmul.f32 1.442695, %v2936_v25  ;;  %v2915_v40 = vpop.xlane.xlu0 %2914 }
 0x5fb   : > { %10045 = vpow2.f32 %v2956_v8  ;;  %v2943_v55 = vsub.f32 %v11286_v17, %v2915_v40  ;;  %v2912_v47 = vpop.xlane.xlu1 %2911 }
 0x5fc   : > { %v2942_v45 = vsub.f32 %v11290_v10, %v2912_v47  ;;  %10047 = vpow2.f32 %v2954_v6 }
 0x5fd   : > { %v2968_v30 = vmul.f32 1.442695, %v2943_v55 }
 0x5fe   : > { %v2966_v16 = vmul.f32 1.442695, %v2942_v45  ;;  %v2909_v21 = vpop.xlane.xlu0 %2908 }
 0x5ff   : > { %v2941_v9 = vsub.f32 %v11300_v15, %v2909_v21  ;;  %v2924_v27 = vpop.xlane.xlu1 %2923 }
 0x600   : > { %10049 = vpow2.f32 %v2966_v16  ;;  %v2946_v7 = vsub.f32 %v11296_v32, %v2924_v27 }
 0x601   : > { %10051 = vpow2.f32 %v2968_v30  ;;  %v2964_v13 = vmul.f32 1.442695, %v2941_v9 }
 0x602   : > { %v2974_v20 = vmul.f32 1.442695, %v2946_v7  ;;  %v2906_v60 = vpop.xlane.xlu0 %2905 }
 0x603   : > { %v2940_v22 = vsub.f32 %v11302_v3, %v2906_v60 }
 0x604   : > { %10053 = vpow2.f32 %v2974_v20 }
 0x605   : > { %v11361_v17 = vpop.eup %10045  ;;  %10055 = vpow2.f32 %v2964_v13  ;;  %v2962_v10 = vmul.f32 1.442695, %v2940_v22 }
 0x606   : > { %v2927_v25 = vpop.xlane.xlu0 %2926  ;;  %v2991_v8 = vsel %vm1267_vm3, %v11361_v17, 0.0  ;;  %v11365_v21 = vpop.eup %10047 }
 0x607   : > { %v2947_v15 = vsub.f32 %v11308_v14, %v2927_v25  ;;  %v2918_v27 = vpop.xlane.xlu1 %2917  ;;  %2992 = vadd.xlane.f32.xlu0 %v2991_v8  ;;  %10057 = vpow2.f32 %v2962_v10  ;;  %v2988_v47 = vsel %vm1267_vm3, %v11365_v21, 0.0 }
 0x608   : > { %v2944_v32 = vsub.f32 %v11312_v57, %v2918_v27 }
 0x609   : > { %v2976_v6 = vmul.f32 1.442695, %v2947_v15 }
 0x60a   : > { %v11369_v3 = vpop.eup %10049  ;;  %v2970_v40 = vmul.f32 1.442695, %v2944_v32  ;;  %v2921_v55 = vpop.xlane.xlu0 %2920 }
 0x60b   : > { %v11373_v45 = vpop.eup %10051  ;;  %v2945_v30 = vsub.f32 %v11314_v63, %v2921_v55  ;;  %2989 = vadd.xlane.f32.xlu0 %v2988_v47  ;;  %v3006_v14 = vsel %vm1267_vm3, %v11369_v3, 0.0 }
 0x60c   : > { %10059 = vpow2.f32 %v2970_v40  ;;  %3007 = vadd.xlane.f32.xlu1 %v3006_v14  ;;  %v3009_v7 = vsel %vm1267_vm3, %v11373_v45, 0.0 }
 0x60d   : > { %10061 = vpow2.f32 %v2976_v6  ;;  %v2972_v57 = vmul.f32 1.442695, %v2945_v30 }
 0x60e   : > { %v11378_v16 = vpop.eup %10053  ;;  %v2933_v9 = vpop.xlane.xlu0 %2932 }
 0x60f   : > { %v11382_v13 = vpop.eup %10055  ;;  %v2949_v20 = vsub.f32 %v11322_v35, %v2933_v9  ;;  %v2930_v60 = vpop.xlane.xlu1 %2929  ;;  %3010 = vadd.xlane.f32.xlu0 %v3009_v7  ;;  %v3018_v63 = vsel %vm1267_vm3, %v11378_v16, 0.0  ;;  %10063 = vpow2.f32 %v2972_v57 }
 0x610   : > { %v2948_v22 = vsub.f32 %v11324_v0, %v2930_v60  ;;  %3019 = vadd.xlane.f32.xlu1 %v3018_v63  ;;  %v3003_v8 = vsel %vm1267_vm3, %v11382_v13, 0.0 }
 0x611   : > { %v2980_v10 = vmul.f32 1.442695, %v2949_v20  ;;  %v11390_v15 = vpop.eup %10057 }
 0x612   : > { %v2978_v25 = vmul.f32 1.442695, %v2948_v22  ;;  %v3000_v27 = vsel %vm1267_vm3, %v11390_v15, 0.0  ;;  %v9795_v63 = vpop.permute.xlu0 %9794 }
 0x613   : > { %3004 = vadd.xlane.f32.xlu0 %v3003_v8  ;;  %v11426_v9 = vpop.permute.xlu1 %9799  ;;  %v9797_v8 = vunpack.i.h.bf16 %v9795_v63 }
 0x614   : > { %10065 = vpow2.f32 %v2978_v25 }
 0x615   : > { %10067 = vpow2.f32 %v2980_v10 }
 0x616   : > { %v11392_v35 = vpop.eup %10059 }
 0x617   : > { %v11396_v32 = vpop.eup %10061  ;;  %3001 = vadd.xlane.f32.xlu0 %v3000_v27  ;;  %v3012_v0 = vsel %vm1267_vm3, %v11392_v35, 0.0  ;;  %v9796_v27 = vunpack.i.l.bf16 %v9795_v63 }
 0x618   : > { %3013 = vadd.xlane.f32.xlu1 %v3012_v0  ;;  %v3021_v6 = vsel %vm1267_vm3, %v11396_v32, 0.0 }
 0x619   : > { %v11402_v40 = vpop.eup %10063 }
 0x61a   : > { %v3015_v47 = vsel %vm1267_vm3, %v11402_v40, 0.0 }
 0x61b   : > { %3022 = vadd.xlane.f32.xlu0 %v3021_v6 }
 0x61e   : > { %v11404_v55 = vpop.eup %10065 }
 0x61f   : > { %v11408_v30 = vpop.eup %10067  ;;  %3016 = vadd.xlane.f32.xlu0 %v3015_v47  ;;  %v3024_v14 = vsel %vm1267_vm3, %v11404_v55, 0.0  ;;  %v9335_v47 = vpack.c.bf16 %v9797_v8, %v9796_v27 }
 0x620   : > { %3025 = vadd.xlane.f32.xlu1 %v3024_v14  ;;  %v3027_v57 = vsel %vm1267_vm3, %v11408_v30, 0.0 }
 0x623   : > { %3028 = vadd.xlane.f32.xlu0 %v3027_v57 }
 0x631   : > { %9809 = vrot.lane.b32.xlu1 %v10814_v62, %s10429_s8 }
 0x635   : > { %9819 = vrot.lane.b32.xlu1 %v10752_v33, %s10430_s16 }
 0x639   : > { %4164 = vrot.lane.b32.xlu1 %v10734_v24, %s10431_s17  ;;  %9804 = vrot.lane.b32.xlu0 %v10804_v58, %s10429_s8  ;;  %s12201_s8 = scalar_lea.hbm %s12257_s6, %s8254_s19 }
 0x63d   : > { %4253 = vrot.lane.b32.xlu1 %v10746_v31, %s10431_s17  ;;  %9814 = vrot.lane.b32.xlu0 %v10742_v28, %s10430_s16 }
 0x641   : > { %9829 = vrot.lane.b32.xlu1 %v10772_v43, %s10430_s16  ;;  %4162 = vrot.lane.b32.xlu0 %v10736_v26, %s10431_s17 }
 0x644   : > { %v2987_v7 = vpop.xlane.xlu1 %2986 }
 0x645   : > { %4346 = vrot.lane.b32.xlu1 %v10754_v34, %s10431_s17  ;;  %9824 = vrot.lane.b32.xlu0 %v10762_v38, %s10430_s16  ;;  %10069 = vrcp.f32 %v2987_v7 }
 0x648   : > { %v2984_v20 = vpop.xlane.xlu1 %2983 }
 0x649   : > { %10071 = vrcp.f32 %v2984_v20  ;;  %4435 = vrot.lane.b32.xlu1 %v10766_v41, %s10431_s17  ;;  %4255 = vrot.lane.b32.xlu0 %v10744_v29, %s10431_s17 }
 0x64c   : > { %v2999_v60 = vpop.xlane.xlu1 %2998 }
 0x64d   : > { %9839 = vrot.lane.b32.xlu1 %v10794_v53, %s10430_s16  ;;  %4344 = vrot.lane.b32.xlu0 %v10756_v36, %s10431_s17  ;;  %10073 = vrcp.f32 %v2999_v60 }
 0x64f   : > { %v10070_v10 = vpop.eup %10069 }
 0x650   : > { %v2996_v22 = vpop.xlane.xlu1 %2995  ;;  %v3047_v6 = vmul.f32 %v10070_v10, %v11338_v19  ;;  %v9802_v10 = vunpack.i.h.bf16 %v11426_v9 }
 0x651   : > { %10075 = vrcp.f32 %v2996_v22  ;;  %4528 = vrot.lane.b32.xlu1 %v10774_v44, %s10431_s17  ;;  %9834 = vrot.lane.b32.xlu0 %v10784_v48, %s10430_s16 }
 0x653   : > { %v10072_v25 = vpop.eup %10071 }
 0x654   : > { %v3046_v0 = vmul.f32 %v10072_v25, %v11342_v42  ;;  %v9801_v25 = vunpack.i.l.bf16 %v11426_v9 }
 0x655   : > { %4617 = vrot.lane.b32.xlu1 %v10790_v51, %s10431_s17  ;;  %4437 = vrot.lane.b32.xlu0 %v10764_v39, %s10431_s17 }
 0x656   : > { %8803 = vmatprep.mubr.msk.f32.mxu0 %vm1267_vm3, %v3046_v0  ;;  %v9339_v9 = vpack.c.bf16 %v9802_v10, %v9801_v25 }
 0x657   : > { %8804 = vmatmul.mubr.msk.f32.vlgmr.msra.gmra.mrb[36].mxu0 %vm1267_vm3, %v3047_v6  ;;  %v10074_v42 = vpop.eup %10073 }
 0x658   : > { %9330 = vmatpush3.bf16.msra.mxu0 %v11224_v4  ;;  %v3051_v19 = vmul.f32 %v10074_v42, %v11346_v12 }
 0x659   : > { %9336 = vmatprep.subr.bf16.mxu0 %v9335_v47  ;;  %9849 = vrot.lane.b32.xlu1 %v10814_v62, %s10430_s16 }
 0x65a   : > { %4526 = vrot.lane.b32.xlu0 %v10776_v46, %s10431_s17 }
 0x65b   : > { %v10076_v14 = vpop.eup %10075 }
 0x65c   : > { %v3050_v57 = vmul.f32 %v10076_v14, %v11350_v52 }
 0x65d   : > { %4710 = vrot.lane.b32.xlu1 %v10796_v54, %s10431_s17 }
 0x65e   : > { %9844 = vrot.lane.b32.xlu0 %v10804_v58, %s10430_s16  ;;  %8817 = vmatprep.mubr.msk.f32.mxu0 %vm1267_vm3, %v3050_v57  ;;  %s10343_s16 = scalar_lea.vmem %s12203_s9, 2048 }
 0x65f   : > { %8818 = vmatmul.mubr.msk.f32.vlgmr.msra.gmra.mrb[38].mxu0 %vm1267_vm3, %v3051_v19  ;;  %p10344_p10 = scmp.ne.s32.totalorder %s12203_s9, %s10343_s16 }
 0x660   : > { %9338 = vmatpush3.bf16.msra.mxu0 %v9335_v47 }
 0x661   : > { %4801 = vrot.lane.b32.xlu1 %v10806_v59, %s10431_s17  ;;  %p10345_p3 = pnand %p10344_p10, %p10628_p5 }
 0x662   : > { %4619 = vrot.lane.b32.xlu0 %v10786_v49, %s10431_s17 }
 0x663   : > { %p10346_p7 = pneg %p10345_p3 }
 0x665   : > { %9854 = vrot.lane.b32.xlu1 %v10742_v28, %s10432_s12 }
 0x666   : > { %4708 = vrot.lane.b32.xlu0 %v10798_v56, %s10431_s17 }
 0x66a   : > { %4799 = vrot.lane.b32.xlu0 %v10808_v61, %s10431_s17  ;;  %s10436_s17 = smov [#allocation10]  }
 0x694   : > { %v2993_v4 = vpop.xlane.xlu0 %2992 }
 0x695   : > { %10077 = vrcp.f32 %v2993_v4 }
 0x698   : > { %v2990_v12 = vpop.xlane.xlu0 %2989 }
 0x699   : > { %10079 = vrcp.f32 %v2990_v12  ;;  %v3008_v52 = vpop.xlane.xlu1 %3007 }
 0x69a   : > { %10081 = vrcp.f32 %v3008_v52 }
 0x69c   : > { %v3011_v7 = vpop.xlane.xlu0 %3010 }
 0x69d   : > { %10083 = vrcp.f32 %v3011_v7  ;;  %v3020_v20 = vpop.xlane.xlu1 %3019 }
 0x69e   : > { %10085 = vrcp.f32 %v3020_v20 }
 0x69f   : > { %v10078_v63 = vpop.eup %10077 }
 0x6a0   : > { %v3005_v60 = vpop.xlane.xlu0 %3004  ;;  %v3049_v47 = vmul.f32 %v10078_v63, %v11361_v17 }
 0x6a1   : > { %10087 = vrcp.f32 %v3005_v60 }
 0x6a3   : > { %v10080_v22 = vpop.eup %10079 }
 0x6a4   : > { %v10082_v8 = vpop.eup %10081  ;;  %v3002_v27 = vpop.xlane.xlu0 %3001  ;;  %v3048_v0 = vmul.f32 %v10080_v22, %v11365_v21 }
 0x6a5   : > { %10089 = vrcp.f32 %v3002_v27  ;;  %v3014_v6 = vpop.xlane.xlu1 %3013  ;;  %v3054_v42 = vmul.f32 %v10082_v8, %v11369_v3 }
 0x6a6   : > { %10091 = vrcp.f32 %v3014_v6  ;;  %8810 = vmatprep.mubr.msk.f32.mxu1 %vm1267_vm3, %v3048_v0 }
 0x6a7   : > { %v10084_v14 = vpop.eup %10083  ;;  %8811 = vmatmul.mubr.msk.f32.vlgmr.msra.gmra.mrb[28].mxu1 %vm1267_vm3, %v3049_v47  ;;  %8831 = vmatprep.mubr.msk.f32.mxu0 %vm1267_vm3, %v3054_v42 }
 0x6a8   : > { %v10086_v57 = vpop.eup %10085  ;;  %9334 = vmatpush3.bf16.msra.mxu1 %v11231_v18  ;;  %v3023_v19 = vpop.xlane.xlu0 %3022  ;;  %v3055_v21 = vmul.f32 %v10084_v14, %v11373_v45  ;;  %v3758_v14 = vld [vmem:[#allocation8 + $0x8] sm:$0xff] }
 0x6a9   : > { %9340 = vmatprep.subr.bf16.mxu1 %v9339_v9  ;;  %v3058_v17 = vmul.f32 %v10086_v57, %v11378_v16  ;;  %10093 = vrcp.f32 %v3023_v19 }
 0x6aa   : > { %8832 = vmatmul.mubr.msk.f32.vlgmr.msra.gmra.mrb[40].mxu0 %vm1267_vm3, %v3055_v21 }
 0x6ab   : > { %8845 = vmatprep.mubr.msk.f32.mxu0 %vm1267_vm3, %v3058_v17  ;;  %v10088_v12 = vpop.eup %10087 }
 0x6ac   : > { %v3017_v3 = vpop.xlane.xlu0 %3016  ;;  %v3053_v60 = vmul.f32 %v10088_v12, %v11382_v13 }
 0x6ad   : > { %10095 = vrcp.f32 %v3017_v3  ;;  %v3026_v4 = vpop.xlane.xlu1 %3025 }
 0x6ae   : > { %10097 = vrcp.f32 %v3026_v4 }
 0x6af   : > { %v10090_v52 = vpop.eup %10089 }
 0x6b0   : > { %v10092_v7 = vpop.eup %10091  ;;  %v3029_v20 = vpop.xlane.xlu0 %3028  ;;  %v3052_v18 = vmul.f32 %v10090_v52, %v11390_v15 }
 0x6b1   : > { %10099 = vrcp.f32 %v3029_v20  ;;  %v9810_v45 = vpop.permute.xlu1 %9809  ;;  %v3056_v16 = vmul.f32 %v10092_v7, %v11392_v35 }
 0x6b2   : > { %v9812_v63 = vunpack.i.h.bf16 %v9810_v45  ;;  %v9811_v22 = vunpack.i.l.bf16 %v9810_v45  ;;  %8824 = vmatprep.mubr.msk.f32.mxu1 %vm1267_vm3, %v3052_v18 }
 0x6b3   : > { %8825 = vmatmul.mubr.msk.f32.vlgmr.msra.gmra.mrb[30].mxu1 %vm1267_vm3, %v3053_v60  ;;  %v10094_v15 = vpop.eup %10093 }
 0x6b4   : > { %9342 = vmatpush3.bf16.msra.mxu1 %v9339_v9  ;;  %8838 = vmatprep.mubr.msk.f32.mxu1 %vm1267_vm3, %v3056_v16  ;;  %v9805_v10 = vpop.permute.xlu0 %9804  ;;  %v9347_v25 = vpack.c.bf16 %v9812_v63, %v9811_v22  ;;  %v3059_v21 = vmul.f32 %v10094_v15, %v11396_v32 }
 0x6b5   : > { %v9807_v8 = vunpack.i.h.bf16 %v9805_v10  ;;  %v9806_v27 = vunpack.i.l.bf16 %v9805_v10  ;;  %v9820_v3 = vpop.permute.xlu1 %9819 }
 0x6b6   : > { %9348 = vmatprep.subr.bf16.mxu1 %v9347_v25 }
 0x6b7   : > { %v10096_v0 = vpop.eup %10095  ;;  %v9343_v6 = vpack.c.bf16 %v9807_v8, %v9806_v27 }
 0x6b8   : > { %v10098_v13 = vpop.eup %10097  ;;  %v9815_v47 = vpop.permute.xlu0 %9814  ;;  %v3057_v35 = vmul.f32 %v10096_v0, %v11402_v40  ;;  %v2140_v40 = vld [vmem:[#allocation8] sm:$0xff] }
 0x6b9   : > { %9344 = vmatprep.subr.bf16.mxu0 %v9343_v6  ;;  %v3060_v42 = vmul.f32 %v10098_v13, %v11404_v55  ;;  %v9817_v57 = vunpack.i.h.bf16 %v9815_v47  ;;  %v9816_v9 = vunpack.i.l.bf16 %v9815_v47  ;;  %v11508_v4 = vpop.permute.xlu1 %4164 }
 0x6ba   : > { %8839 = vmatmul.mubr.msk.f32.vlgmr.msra.gmra.mrb[32].mxu1 %vm1267_vm3, %v3057_v35  ;;  %9346 = vmatpush3.bf16.msra.mxu0 %v9343_v6 }
 0x6bb   : > { %v10100_v19 = vpop.eup %10099  ;;  %9350 = vmatpush3.bf16.msra.mxu1 %v9347_v25  ;;  %8852 = vmatprep.mubr.msk.f32.mxu1 %vm1267_vm3, %v3060_v42  ;;  %v9351_v55 = vpack.c.bf16 %v9817_v57, %v9816_v9  ;;  %v9822_v42 = vunpack.i.h.bf16 %v9820_v3 }
 0x6bc   : > { %9511 = vmatprep.subr.mxu1 %v3758_v14  ;;  %v3061_v17 = vmul.f32 %v10100_v19, %v11408_v30  ;;  %8855 = vmatprep.subr.mxu0 %v3758_v14 }
 0x6bd   : > { %8846 = vmatmul.mubr.msk.f32.vlgmr.msra.gmra.mrb[42].mxu0 %vm1267_vm3, %v3059_v21  ;;  %v11510_v32 = vpop.permute.xlu1 %4253 }
 0x6be   : > { %8853 = vmatmul.mubr.msk.f32.vlgmr.msra.gmra.mrb[34].mxu1 %vm1267_vm3, %v3061_v17  ;;  %8856 = vmatpush3.msra.mxu0 %v3758_v14 }
 0x6bf   : > { %9512 = vmatpush3.msra.mxu1 %v3758_v14  ;;  %8881 = vmatprep.subr.mxu0 %v2140_v40  ;;  %v9821_v14 = vunpack.i.l.bf16 %v9820_v3 }
 0x6c0   : > { %9353 = vmatprep.subr.msk.bf16.mxu1 %vm10832_vm2, %v9351_v55 }
 0x6c1   : > { %v11512_v12 = vpop.permute.xlu1 %9829  ;;  %v9357_v19 = vpack.c.bf16 %v9822_v42, %v9821_v14  ;;  %v12296_v14 = vld [vmem:[#allocation23_spill] sm:$0xff] }
 0x6c2   : > { %v9831_v42 = vunpack.i.l.bf16 %v11512_v12 }
 0x6c5   : > { %v11514_v30 = vpop.permute.xlu1 %4346 }
 0x6c9   : > { %v11516_v52 = vpop.permute.xlu1 %4435 }
 0x6cd   : > { %v11518_v7 = vpop.permute.xlu1 %9839 }
 0x6d1   : > { %v11520_v20 = vpop.permute.xlu1 %4528 }
 0x6d5   : > { %v11522_v18 = vpop.permute.xlu1 %4617 }
 0x6d9   : > { %v11524_v45 = vpop.permute.xlu1 %9849 }
 0x6dd   : > { %v11526_v60 = vpop.permute.xlu1 %4710 }
 0x6e1   : > { %v11528_v16 = vpop.permute.xlu1 %4801 }
 0x6e5   : > { %v9855_v63 = vpop.permute.xlu1 %9854 }
 0x6e6   : > { %v9857_v22 = vunpack.i.h.bf16 %v9855_v63  ;;  %v9856_v10 = vunpack.i.l.bf16 %v9855_v63  ;;  %v12289_v63 = vld [vmem:[#allocation18_spill] sm:$0xff] }
 0x6e8   : > { %v9399_v27 = vpack.c.bf16 %v9857_v22, %v9856_v10  ;;  %v12291_v22 = vld [vmem:[#allocation22_spill] sm:$0xff] }
 0x72a   : > { %v8805_v25 = vpop.f32.mrb[36].mxu0 }
 0x72b   : > { %v3140_v8 = vpop.f32.mrb[37].mxu0 }
 0x72c   : > { %8857 = vmatprep.mubr.msk.f32.mxu0 %vm560_vm1, %v3140_v8 }
 0x72d   : > { %8858 = vmatmul.mubr.msk.f32.vlgmr.msra.gmra.mrb[44].mxu0 %vm560_vm1, %v8805_v25 }
 0x72e   : > { %8882 = vmatpush3.msra.mxu0 %v2140_v40 }
 0x72f   : > { %9400 = vmatprep.subr.bf16.mxu0 %v9399_v27 }
 0x732   : > { %v8819_v15 = vpop.f32.mrb[38].mxu0 }
 0x733   : > { %v3314_v0 = vpop.f32.mrb[39].mxu0 }
 0x77a   : > { %v8812_v6 = vpop.f32.mrb[28].mxu1 }
 0x77b   : > { %v3227_v13 = vpop.f32.mrb[29].mxu1 }
 0x77c   : > { %8860 = vmatprep.mubr.msk.f32.mxu0 %vm560_vm1, %v3227_v13 }
 0x77d   : > { %v8833_v47 = vpop.f32.mrb[40].mxu0  ;;  %8861 = vmatmul.mubr.msk.f32.gmra.mrb[46].mxu0 %vm560_vm1, %v8812_v6  ;;  %v12294_v6 = vld [vmem:[#allocation19_spill] sm:$0xff] }
 0x77e   : > { %v3488_v35 = vpop.f32.mrb[41].mxu0  ;;  %8863 = vmatprep.mubr.msk.f32.mxu0 %vm560_vm1, %v3314_v0 }
 0x781   : > { %8864 = vmatmul.mubr.msk.f32.gmra.mrb[48].mxu0 %vm560_vm1, %v8819_v15  ;;  %v12293_v15 = vld [vmem:[#allocation20_spill] sm:$0xff] }
 0x782   : > { %8883 = vmatprep.mubr.msk.f32.mxu0 %vm560_vm1, %v11236_v11 }
 0x785   : > { %8884 = vmatmul.mubr.msk.f32.vlgmr.msra.gmra.mrb[44].mxu0 %vm560_vm1, %v11234_v1  ;;  %v4163_v1 = vpop.permute.xlu0 %4162 }
 0x786   : > { %9402 = vmatpush3.bf16.msra.mxu0 %v9399_v27  ;;  %v8826_v57 = vpop.f32.mrb[30].mxu1  ;;  %8886 = vmatprep.mubr.msk.f32.mxu0 %vm560_vm1, %v11240_v50  ;;  %v12292_v27 = vld [vmem:[#allocation21_spill] sm:$0xff] }
 0x787   : > { %v3401_v9 = vpop.f32.mrb[31].mxu1 }
 0x788   : > { %8866 = vmatprep.mubr.msk.f32.mxu1 %vm560_vm1, %v3401_v9 }
 0x789   : > { %8867 = vmatmul.mubr.msk.f32.vlgmr.msra.gmra.mrb[36].mxu1 %vm560_vm1, %v8826_v57  ;;  %8887 = vmatmul.mubr.msk.f32.gmra.mrb[46].mxu0 %vm560_vm1, %v11238_v23  ;;  %v12287_v23 = vld [vmem:[#allocation17_spill] sm:$0xff] }
 0x78a   : > { %9356 = vmatpush3.bf16.xpose.msk.msra.mxu1 %vm10832_vm2, %v9351_v55  ;;  %8869 = vmatprep.mubr.msk.f32.mxu1 %vm560_vm1, %v3488_v35  ;;  %v9825_v55 = vpop.permute.xlu0 %9824  ;;  %v9832_v35 = vunpack.i.h.bf16 %v11512_v12 }
 0x78b   : > { %8889 = vmatprep.mubr.msk.f32.mxu0 %vm560_vm1, %v11244_v37  ;;  %9359 = vmatprep.subr.msk.bf16.mxu1 %vm10832_vm2, %v9357_v19  ;;  %v12288_v37 = vld [vmem:[#allocation15_spill] sm:$0xff]  ;;  %v9827_v25 = vunpack.i.h.bf16 %v9825_v55  ;;  %v9826_v8 = vunpack.i.l.bf16 %v9825_v55 }
 0x78c   : > { %v9369_v57 = vpack.c.bf16 %v9832_v35, %v9831_v42 }
 0x78d   : > { %v8840_v11 = vpop.f32.mrb[32].mxu1  ;;  %8870 = vmatmul.mubr.msk.f32.gmra.mrb[38].mxu1 %vm560_vm1, %v8833_v47  ;;  %8890 = vmatmul.mubr.msk.f32.gmra.mrb[48].mxu0 %vm560_vm1, %v11242_v5  ;;  %v12290_v5 = vld [vmem:[#allocation16_spill] sm:$0xff]  ;;  %v9363_v0 = vpack.c.bf16 %v9827_v25, %v9826_v8 }
 0x78e   : > { %v3575_v50 = vpop.f32.mrb[33].mxu1  ;;  %8892 = vmatprep.mubr.msk.f32.mxu0 %vm560_vm1, %v12287_v23  ;;  %v4256_v10 = vpop.permute.xlu0 %4255  ;;  %v12295_v47 = vld [vmem:[#allocation24_spill] sm:$0xff] }
 0x78f   : > { %8872 = vmatprep.mubr.msk.f32.mxu1 %vm560_vm1, %v3575_v50  ;;  %v9841_v50 = vunpack.i.l.bf16 %v11518_v7 }
 0x790   : > { %v8847_v21 = vpop.f32.mrb[42].mxu0 }
 0x791   : > { %v3662_v17 = vpop.f32.mrb[43].mxu0  ;;  %v8854_v40 = vpop.f32.mrb[34].mxu1  ;;  %8873 = vmatmul.mubr.msk.f32.gmra.mrb[40].mxu1 %vm560_vm1, %v8840_v11  ;;  %8893 = vmatmul.mubr.msk.f32.gmra.mrb[50].mxu0 %vm560_vm1, %v12288_v37  ;;  %v9842_v11 = vunpack.i.h.bf16 %v11518_v7  ;;  %v9851_v37 = vunpack.i.l.bf16 %v11524_v45 }
 0x792   : > { %v3749_v3 = vpop.f32.mrb[35].mxu1  ;;  %8875 = vmatprep.mubr.msk.f32.mxu1 %vm560_vm1, %v3662_v17  ;;  %8895 = vmatprep.mubr.msk.f32.mxu0 %vm560_vm1, %v12289_v63  ;;  %v4345_v13 = vpop.permute.xlu0 %4344 }
 0x793   : > { %v9381_v23 = vpack.c.bf16 %v9842_v11, %v9841_v50  ;;  %v4150_v50 = vld [vmem:[#allocation7 + $0x120] sm:$0xff] }
 0x795   : > { %8876 = vmatmul.mubr.msk.f32.gmra.mrb[42].mxu1 %vm560_vm1, %v8847_v21  ;;  %8896 = vmatmul.mubr.msk.f32.gmra.mrb[52].mxu0 %vm560_vm1, %v12290_v5 }
 0x796   : > { %8878 = vmatprep.mubr.msk.f32.mxu1 %vm560_vm1, %v3749_v3  ;;  %8898 = vmatprep.mubr.msk.f32.mxu0 %vm560_vm1, %v12291_v22 }
 0x799   : > { %8879 = vmatmul.mubr.msk.f32.gmra.mrb[44].mxu1 %vm560_vm1, %v8854_v40  ;;  %8899 = vmatmul.mubr.msk.f32.gmra.mrb[54].mxu0 %vm560_vm1, %v12292_v27  ;;  %v9852_v40 = vunpack.i.h.bf16 %v11524_v45 }
 0x79a   : > { %8901 = vmatprep.mubr.msk.f32.mxu0 %vm560_vm1, %v12293_v15  ;;  %8911 = vmatprep.mubr.msk.f32.mxu1 %vm560_vm1, %v4163_v1  ;;  %v4146_v15 = vld [vmem:[#allocation7 + $0x100] sm:$0xff] }
 0x79b   : > { %v9393_v55 = vpack.c.bf16 %v9852_v40, %v9851_v37  ;;  %v4153_v40 = vld [vmem:[#allocation7 + $0x138] sm:$0xff]  ;;  %v4152_v37 = vld [vmem:[#allocation7 + $0x130] sm:$0xff] }
 0x79d   : > { %8902 = vmatmul.mubr.msk.f32.gmra.mrb[56].mxu0 %vm560_vm1, %v12294_v6  ;;  %8912 = vmatmul.mubr.msk.f32.vlgmr.msra.gmra.mrb[46].mxu1 %vm560_vm1, %v11508_v4  ;;  %v9835_v4 = vpop.permute.xlu0 %9834 }
 0x79e   : > { %9362 = vmatpush3.bf16.xpose.msk.msra.mxu1 %vm10832_vm2, %v9357_v19  ;;  %8904 = vmatprep.mubr.msk.f32.mxu0 %vm560_vm1, %v12295_v47  ;;  %v9836_v9 = vunpack.i.l.bf16 %v9835_v4 }
 0x79f   : > { %8918 = vmatprep.mubr.msk.f32.mxu1 %vm560_vm1, %v11510_v32  ;;  %9365 = vmatprep.subr.msk.bf16.mxu1 %vm10832_vm2, %v9363_v0  ;;  %v9837_v32 = vunpack.i.h.bf16 %v9835_v4 }
 0x7a1   : > { %8905 = vmatmul.mubr.msk.f32.gmra.mrb[58].mxu0 %vm560_vm1, %v12296_v14  ;;  %v4438_v19 = vpop.permute.xlu0 %4437  ;;  %v9375_v1 = vpack.c.bf16 %v9837_v32, %v9836_v9  ;;  %v4149_v14 = vld [vmem:[#allocation7 + $0x118] sm:$0xff] }
 0x7a5   : > { %8919 = vmatmul.mubr.msk.f32.vlgmr.msra.gmra.mrb[48].mxu1 %vm560_vm1, %v4256_v10  ;;  %v4527_v12 = vpop.permute.xlu0 %4526 }
 0x7a6   : > { %9368 = vmatpush3.bf16.xpose.msk.msra.mxu1 %vm10832_vm2, %v9363_v0  ;;  %8925 = vmatprep.mubr.msk.f32.mxu1 %vm560_vm1, %v4345_v13 }
 0x7a7   : > { %9371 = vmatprep.subr.msk.bf16.mxu1 %vm10832_vm2, %v9369_v57 }
 0x7a9   : > { %v9845_v21 = vpop.permute.xlu0 %9844 }
 0x7ad   : > { %8926 = vmatmul.mubr.msk.f32.vlgmr.msra.gmra.mrb[50].mxu1 %vm560_vm1, %v11514_v30  ;;  %v9847_v30 = vunpack.i.h.bf16 %v9845_v21  ;;  %v4620_v7 = vpop.permute.xlu0 %4619 }
 0x7ae   : > { %9374 = vmatpush3.bf16.xpose.msk.msra.mxu1 %vm10832_vm2, %v9369_v57  ;;  %8932 = vmatprep.mubr.msk.f32.mxu1 %vm560_vm1, %v11516_v52  ;;  %v9846_v52 = vunpack.i.l.bf16 %v9845_v21  ;;  %v4148_v57 = vld [vmem:[#allocation7 + $0x110] sm:$0xff] }
 0x7af   : > { %9377 = vmatprep.subr.msk.bf16.mxu1 %vm10832_vm2, %v9375_v1 }
 0x7b0   : > { %v9387_v17 = vpack.c.bf16 %v9847_v30, %v9846_v52 }
 0x7b1   : > { %v4709_v3 = vpop.permute.xlu0 %4708 }
 0x7b5   : > { %8933 = vmatmul.mubr.msk.f32.vlgmr.msra.gmra.mrb[52].mxu1 %vm560_vm1, %v4438_v19 }
 0x7b6   : > { %9380 = vmatpush3.bf16.xpose.msk.msra.mxu1 %vm10832_vm2, %v9375_v1  ;;  %8939 = vmatprep.mubr.msk.f32.mxu1 %vm560_vm1, %v4527_v12  ;;  %v4151_v12 = vld [vmem:[#allocation7 + $0x128] sm:$0xff] }
 0x7b7   : > { %9383 = vmatprep.subr.msk.bf16.mxu1 %vm10832_vm2, %v9381_v23 }
 0x7bd   : > { %8940 = vmatmul.mubr.msk.f32.vlgmr.msra.gmra.mrb[54].mxu1 %vm560_vm1, %v11520_v20  ;;  %v4800_v20 = vpop.permute.xlu0 %4799 }
 0x7be   : > { %9386 = vmatpush3.bf16.xpose.msk.msra.mxu1 %vm10832_vm2, %v9381_v23  ;;  %8946 = vmatprep.mubr.msk.f32.mxu1 %vm560_vm1, %v11522_v18 }
 0x7bf   : > { %9389 = vmatprep.subr.msk.bf16.mxu1 %vm10832_vm2, %v9387_v17 }
 0x7c5   : > { %8947 = vmatmul.mubr.msk.f32.vlgmr.msra.gmra.mrb[56].mxu1 %vm560_vm1, %v4620_v7 }
 0x7c6   : > { %9392 = vmatpush3.bf16.xpose.msk.msra.mxu1 %vm10832_vm2, %v9387_v17  ;;  %8953 = vmatprep.mubr.msk.f32.mxu1 %vm560_vm1, %v4709_v3 }
 0x7c7   : > { %9395 = vmatprep.subr.msk.bf16.mxu1 %vm10832_vm2, %v9393_v55 }
 0x7cd   : > { %8954 = vmatmul.mubr.msk.f32.vlgmr.msra.gmra.mrb[58].mxu1 %vm560_vm1, %v11526_v60 }
 0x7ce   : > { %9398 = vmatpush3.bf16.xpose.msk.msra.mxu1 %vm10832_vm2, %v9393_v55  ;;  %8960 = vmatprep.mubr.msk.f32.mxu1 %vm560_vm1, %v4800_v20 }
 0x7d5   : > { %8961 = vmatmul.mubr.msk.f32.vlgmr.msra.gmra.mrb[60].mxu1 %vm560_vm1, %v11528_v16  ;;  %v4147_v16 = vld [vmem:[#allocation7 + $0x108] sm:$0xff] }
 0x85c   : > { %v11638_v18 = vpop.f32.mrb[36].mxu1 }
 0x85d   : > { %v11640_v45 = vpop.f32.mrb[37].mxu1 }
 0x860   : > { %v11642_v63 = vpop.f32.mrb[38].mxu1 }
 0x861   : > { %v11644_v5 = vpop.f32.mrb[39].mxu1 }
 0x864   : > { %v11646_v22 = vpop.f32.mrb[40].mxu1 }
 0x865   : > { %v11648_v10 = vpop.f32.mrb[41].mxu1 }
 0x868   : > { %v11650_v60 = vpop.f32.mrb[42].mxu1 }
 0x869   : > { %v11652_v25 = vpop.f32.mrb[43].mxu1 }
 0x86c   : > { %v11654_v8 = vpop.f32.mrb[44].mxu1 }
 0x86d   : > { %v11656_v27 = vpop.f32.mrb[45].mxu1 }
 0x86e   : > { %12297 = vst [vmem:[#allocation17_spill] sm:$0xff] %v11656_v27 }
 0x870   : > { %v8913_v0 = vpop.f32.mrb[46].mxu1 }
 0x871   : > { %v11658_v6 = vadd.f32 %v8913_v0, %v4147_v16  ;;  %v4244_v13 = vpop.f32.mrb[47].mxu1 }
 0x872   : > { %v11660_v47 = vadd.f32 %v4244_v13, %v4146_v15  ;;  %v4155_v13 = vld [vmem:[#allocation7 + $0x148] sm:$0xff] }
 0x873   : > { %v4893_v35 = vsel %vm1267_vm3, %v11658_v6, -inf }
 0x874   : > { %4894 = vmax.xlane.f32.xlu1 %v4893_v35  ;;  %v4890_v42 = vsel %vm1267_vm3, %v11660_v47, -inf  ;;  %v4154_v35 = vld [vmem:[#allocation7 + $0x140] sm:$0xff] }
 0x875   : > { %4891 = vmax.xlane.f32.xlu0 %v4890_v42 }
 0x878   : > { %v8920_v4 = vpop.f32.mrb[48].mxu1 }
 0x879   : > { %v11666_v32 = vadd.f32 %v8920_v4, %v4149_v14  ;;  %v4335_v9 = vpop.f32.mrb[49].mxu1 }
 0x87a   : > { %v11668_v19 = vadd.f32 %v4335_v9, %v4148_v57 }
 0x87b   : > { %v4899_v1 = vsel %vm1267_vm3, %v11666_v32, -inf }
 0x87c   : > { %4900 = vmax.xlane.f32.xlu0 %v4899_v1  ;;  %v4896_v11 = vsel %vm1267_vm3, %v11668_v19, -inf }
 0x880   : > { %v8927_v23 = vpop.f32.mrb[50].mxu1  ;;  %4897 = vmax.xlane.f32.xlu0 %v4896_v11  ;;  %v4156_v11 = vld [vmem:[#allocation7 + $0x150] sm:$0xff] }
 0x881   : > { %v11674_v21 = vadd.f32 %v8927_v23, %v4151_v12  ;;  %v4426_v30 = vpop.f32.mrb[51].mxu1  ;;  %v4157_v12 = vld [vmem:[#allocation7 + $0x158] sm:$0xff] }
 0x882   : > { %v11676_v52 = vadd.f32 %v4426_v30, %v4150_v50 }
 0x883   : > { %v4905_v17 = vsel %vm1267_vm3, %v11674_v21, -inf }
 0x884   : > { %4906 = vmax.xlane.f32.xlu0 %v4905_v17  ;;  %v4902_v7 = vsel %vm1267_vm3, %v11676_v52, -inf }
 0x885   : > { %4903 = vmax.xlane.f32.xlu1 %v4902_v7 }
 0x888   : > { %v8934_v55 = vpop.f32.mrb[52].mxu1 }
 0x889   : > { %v11682_v3 = vadd.f32 %v8934_v55, %v4153_v40  ;;  %v4517_v20 = vpop.f32.mrb[53].mxu1  ;;  %v4158_v55 = vld [vmem:[#allocation7 + $0x160] sm:$0xff] }
 0x88a   : > { %v11684_v16 = vadd.f32 %v4517_v20, %v4152_v37  ;;  %v4159_v37 = vld [vmem:[#allocation7 + $0x168] sm:$0xff] }
 0x88b   : > { %v4911_v15 = vsel %vm1267_vm3, %v11682_v3, -inf }
 0x88c   : > { %4912 = vmax.xlane.f32.xlu0 %v4911_v15  ;;  %v4908_v0 = vsel %vm1267_vm3, %v11684_v16, -inf }
 0x88d   : > { %4909 = vmax.xlane.f32.xlu1 %v4908_v0 }
 0x890   : > { %v8941_v42 = vpop.f32.mrb[54].mxu1 }
 0x891   : > { %v11690_v14 = vadd.f32 %v8941_v42, %v4155_v13  ;;  %v4608_v4 = vpop.f32.mrb[55].mxu1 }
 0x892   : > { %v11692_v57 = vadd.f32 %v4608_v4, %v4154_v35  ;;  %v4161_v4 = vld [vmem:[#allocation7 + $0x178] sm:$0xff] }
 0x893   : > { %v4917_v9 = vsel %vm1267_vm3, %v11690_v14, -inf }
 0x894   : > { %4918 = vmax.xlane.f32.xlu0 %v4917_v9  ;;  %v4914_v1 = vsel %vm1267_vm3, %v11692_v57, -inf }
 0x895   : > { %4915 = vmax.xlane.f32.xlu1 %v4914_v1 }
 0x898   : > { %v8948_v50 = vpop.f32.mrb[56].mxu1 }
 0x899   : > { %v11698_v23 = vadd.f32 %v8948_v50, %v4157_v12  ;;  %v4699_v30 = vpop.f32.mrb[57].mxu1  ;;  %v4160_v50 = vld [vmem:[#allocation7 + $0x170] sm:$0xff] }
 0x89a   : > { %v11700_v17 = vadd.f32 %v4699_v30, %v4156_v11 }
 0x89b   : > { %v4923_v7 = vsel %vm1267_vm3, %v11698_v23, -inf }
 0x89c   : > { %4924 = vmax.xlane.f32.xlu0 %v4923_v7  ;;  %v4920_v40 = vsel %vm1267_vm3, %v11700_v17, -inf }
 0x89d   : > { %4921 = vmax.xlane.f32.xlu1 %v4920_v40 }
 0x8a0   : > { %v8955_v20 = vpop.f32.mrb[58].mxu1 }
 0x8a1   : > { %v11706_v15 = vadd.f32 %v8955_v20, %v4159_v37  ;;  %v4790_v0 = vpop.f32.mrb[59].mxu1 }
 0x8a2   : > { %v11708_v13 = vadd.f32 %v4790_v0, %v4158_v55 }
 0x8a3   : > { %v4929_v35 = vsel %vm1267_vm3, %v11706_v15, -inf }
 0x8a4   : > { %4930 = vmax.xlane.f32.xlu0 %v4929_v35  ;;  %v4926_v42 = vsel %vm1267_vm3, %v11708_v13, -inf }
 0x8a5   : > { %4927 = vmax.xlane.f32.xlu1 %v4926_v42 }
 0x8a8   : > { %v8962_v9 = vpop.f32.mrb[60].mxu1 }
 0x8a9   : > { %v11714_v1 = vadd.f32 %v8962_v9, %v4161_v4  ;;  %v4881_v12 = vpop.f32.mrb[61].mxu1 }
 0x8aa   : > { %v11722_v30 = vadd.f32 %v4881_v12, %v4160_v50 }
 0x8ab   : > { %v4935_v11 = vsel %vm1267_vm3, %v11714_v1, -inf }
 0x8ac   : > { %4936 = vmax.xlane.f32.xlu0 %v4935_v11  ;;  %v4932_v7 = vsel %vm1267_vm3, %v11722_v30, -inf }
 0x8b6   : > { %9864 = vrot.lane.b32.xlu1 %v10762_v38, %s10432_s12 }
 0x8c2   : > { %9859 = vrot.lane.b32.xlu0 %v10752_v33, %s10432_s12 }
 0x8da   : > { %4933 = vmax.xlane.f32.xlu1 %v4932_v7 }
 0x901   : > { %v4895_v40 = vpop.xlane.xlu1 %4894 }
 0x902   : > { %v4939_v37 = vsub.f32 %v11658_v6, %v4895_v40  ;;  %v4892_v55 = vpop.xlane.xlu0 %4891 }
 0x903   : > { %v4938_v20 = vsub.f32 %v11660_v47, %v4892_v55 }
 0x904   : > { %v4956_v0 = vmul.f32 1.442695, %v4939_v37 }
 0x905   : > { %v4954_v35 = vmul.f32 1.442695, %v4938_v20 }
 0x906   : > { %10101 = vpow2.f32 %v4956_v0 }
 0x907   : > { %10103 = vpow2.f32 %v4954_v35 }
 0x909   : > { %v4901_v42 = vpop.xlane.xlu0 %4900 }
 0x90a   : > { %v4941_v4 = vsub.f32 %v11666_v32, %v4901_v42 }
 0x90c   : > { %v4960_v9 = vmul.f32 1.442695, %v4941_v4 }
 0x90d   : > { %v4898_v12 = vpop.xlane.xlu0 %4897 }
 0x90e   : > { %10105 = vpow2.f32 %v4960_v9  ;;  %v4940_v11 = vsub.f32 %v11668_v19, %v4898_v12 }
 0x910   : > { %v11730_v50 = vpop.eup %10101  ;;  %v4958_v7 = vmul.f32 1.442695, %v4940_v11 }
 0x911   : > { %v11732_v27 = vpop.eup %10103  ;;  %v4907_v6 = vpop.xlane.xlu0 %4906  ;;  %v4989_v47 = vsel %vm1267_vm3, %v11730_v50, 0.0 }
 0x912   : > { %10107 = vpow2.f32 %v4958_v7  ;;  %v4943_v40 = vsub.f32 %v11674_v21, %v4907_v6  ;;  %v4904_v37 = vpop.xlane.xlu1 %4903  ;;  %4990 = vadd.xlane.f32.xlu0 %v4989_v47  ;;  %v4986_v32 = vsel %vm1267_vm3, %v11732_v27, 0.0 }
 0x913   : > { %v4942_v55 = vsub.f32 %v11676_v52, %v4904_v37  ;;  %4987 = vadd.xlane.f32.xlu1 %v4986_v32 }
 0x914   : > { %v4964_v19 = vmul.f32 1.442695, %v4943_v40 }
 0x915   : > { %v4962_v20 = vmul.f32 1.442695, %v4942_v55 }
 0x916   : > { %10109 = vpow2.f32 %v4964_v19 }
 0x917   : > { %10111 = vpow2.f32 %v4962_v20 }
 0x918   : > { %v11740_v0 = vpop.eup %10105 }
 0x919   : > { %v4913_v35 = vpop.xlane.xlu0 %4912  ;;  %v4995_v42 = vsel %vm1267_vm3, %v11740_v0, 0.0 }
 0x91a   : > { %v4945_v21 = vsub.f32 %v11682_v3, %v4913_v35  ;;  %v4910_v4 = vpop.xlane.xlu1 %4909  ;;  %4996 = vadd.xlane.f32.xlu0 %v4995_v42 }
 0x91b   : > { %v4944_v9 = vsub.f32 %v11684_v16, %v4910_v4 }
 0x91c   : > { %v11746_v12 = vpop.eup %10107  ;;  %v4968_v52 = vmul.f32 1.442695, %v4945_v21 }
 0x91d   : > { %v4966_v11 = vmul.f32 1.442695, %v4944_v9  ;;  %v4992_v7 = vsel %vm1267_vm3, %v11746_v12, 0.0 }
 0x91e   : > { %10113 = vpow2.f32 %v4968_v52  ;;  %4993 = vadd.xlane.f32.xlu1 %v4992_v7 }
 0x91f   : > { %10115 = vpow2.f32 %v4966_v11 }
 0x920   : > { %v11750_v6 = vpop.eup %10109 }
 0x921   : > { %v11752_v47 = vpop.eup %10111  ;;  %v4919_v40 = vpop.xlane.xlu0 %4918  ;;  %v5001_v3 = vsel %vm1267_vm3, %v11750_v6, 0.0 }
 0x922   : > { %v4947_v16 = vsub.f32 %v11690_v14, %v4919_v40  ;;  %v4916_v37 = vpop.xlane.xlu1 %4915  ;;  %5002 = vadd.xlane.f32.xlu0 %v5001_v3  ;;  %v4998_v32 = vsel %vm1267_vm3, %v11752_v47, 0.0 }
 0x923   : > { %v4946_v55 = vsub.f32 %v11692_v57, %v4916_v37  ;;  %4999 = vadd.xlane.f32.xlu1 %v4998_v32 }
 0x924   : > { %v4972_v19 = vmul.f32 1.442695, %v4947_v16 }
 0x925   : > { %v4970_v20 = vmul.f32 1.442695, %v4946_v55 }
 0x926   : > { %10117 = vpow2.f32 %v4972_v19 }
 0x927   : > { %10119 = vpow2.f32 %v4970_v20 }
 0x928   : > { %v11760_v35 = vpop.eup %10113 }
 0x929   : > { %v11762_v42 = vpop.eup %10115  ;;  %v4925_v21 = vpop.xlane.xlu0 %4924  ;;  %v5007_v14 = vsel %vm1267_vm3, %v11760_v35, 0.0 }
 0x92a   : > { %v4949_v4 = vsub.f32 %v11698_v23, %v4925_v21  ;;  %v4922_v9 = vpop.xlane.xlu1 %4921  ;;  %5008 = vadd.xlane.f32.xlu0 %v5007_v14  ;;  %v5004_v57 = vsel %vm1267_vm3, %v11762_v42, 0.0 }
 0x92b   : > { %v4948_v52 = vsub.f32 %v11700_v17, %v4922_v9  ;;  %5005 = vadd.xlane.f32.xlu1 %v5004_v57 }
 0x92c   : > { %v4976_v11 = vmul.f32 1.442695, %v4949_v4 }
 0x92d   : > { %v4974_v7 = vmul.f32 1.442695, %v4948_v52 }
 0x92e   : > { %10121 = vpow2.f32 %v4976_v11 }
 0x92f   : > { %10123 = vpow2.f32 %v4974_v7 }
 0x930   : > { %v11770_v40 = vpop.eup %10117 }
 0x931   : > { %v11772_v3 = vpop.eup %10119  ;;  %v4931_v16 = vpop.xlane.xlu0 %4930  ;;  %v5013_v23 = vsel %vm1267_vm3, %v11770_v40, 0.0 }
 0x932   : > { %v4951_v37 = vsub.f32 %v11706_v15, %v4931_v16  ;;  %v4928_v32 = vpop.xlane.xlu1 %4927  ;;  %5014 = vadd.xlane.f32.xlu0 %v5013_v23  ;;  %v5010_v17 = vsel %vm1267_vm3, %v11772_v3, 0.0 }
 0x933   : > { %v4950_v55 = vsub.f32 %v11708_v13, %v4928_v32  ;;  %5011 = vadd.xlane.f32.xlu1 %v5010_v17 }
 0x934   : > { %v4980_v19 = vmul.f32 1.442695, %v4951_v37 }
 0x935   : > { %v4978_v20 = vmul.f32 1.442695, %v4950_v55 }
 0x936   : > { %10125 = vpow2.f32 %v4980_v19  ;;  %v9865_v21 = vpop.permute.xlu1 %9864 }
 0x937   : > { %v9867_v14 = vunpack.i.h.bf16 %v9865_v21  ;;  %v9866_v4 = vunpack.i.l.bf16 %v9865_v21  ;;  %10127 = vpow2.f32 %v4978_v20 }
 0x938   : > { %v11780_v9 = vpop.eup %10121 }
 0x939   : > { %v11782_v57 = vpop.eup %10123  ;;  %v11784_v15 = vpack.c.bf16 %v9867_v14, %v9866_v4  ;;  %v4937_v52 = vpop.xlane.xlu0 %4936  ;;  %v5019_v11 = vsel %vm1267_vm3, %v11780_v9, 0.0 }
 0x93a   : > { %v4953_v13 = vsub.f32 %v11714_v1, %v4937_v52  ;;  %5020 = vadd.xlane.f32.xlu0 %v5019_v11  ;;  %v5016_v7 = vsel %vm1267_vm3, %v11782_v57, 0.0 }
 0x93b   : > { %9408 = vmatprep.subr.bf16.mxu0 %v11784_v15  ;;  %5017 = vadd.xlane.f32.xlu1 %v5016_v7 }
 0x93c   : > { %v4984_v16 = vmul.f32 1.442695, %v4953_v13 }
 0x93d   : > { %v9860_v23 = vpop.permute.xlu0 %9859 }
 0x93e   : > { %10129 = vpow2.f32 %v4984_v16  ;;  %v9862_v37 = vunpack.i.h.bf16 %v9860_v23  ;;  %v9861_v32 = vunpack.i.l.bf16 %v9860_v23 }
 0x940   : > { %v11792_v17 = vpop.eup %10125  ;;  %v9403_v55 = vpack.c.bf16 %v9862_v37, %v9861_v32 }
 0x941   : > { %v5025_v19 = vsel %vm1267_vm3, %v11792_v17, 0.0  ;;  %v11796_v20 = vpop.eup %10127 }
 0x942   : > { %5026 = vadd.xlane.f32.xlu0 %v5025_v19  ;;  %9404 = vmatprep.subr.bf16.mxu1 %v9403_v55  ;;  %v5022_v1 = vsel %vm1267_vm3, %v11796_v20, 0.0 }
 0x943   : > { %9406 = vmatpush3.bf16.msra.mxu1 %v9403_v55 }
 0x946   : > { %5023 = vadd.xlane.f32.xlu0 %v5022_v1 }
 0x948   : > { %v11800_v21 = vpop.eup %10129 }
 0x949   : > { %v5031_v14 = vsel %vm1267_vm3, %v11800_v21, 0.0 }
 0x94a   : > { %5032 = vadd.xlane.f32.xlu0 %v5031_v14 }
 0x94c   : > { %9874 = vrot.lane.b32.xlu1 %v10784_v48, %s10432_s12 }
 0x950   : > { %9879 = vrot.lane.b32.xlu1 %v10794_v53, %s10432_s12 }
 0x954   : > { %9884 = vrot.lane.b32.xlu1 %v10804_v58, %s10432_s12 }
 0x960   : > { %9869 = vrot.lane.b32.xlu0 %v10772_v43, %s10432_s12 }
 0x964   : > { %9894 = vrot.lane.b32.xlu0 %v10742_v28, %s10433_s20 }
 0x967   : > { %v4934_v4 = vpop.xlane.xlu1 %4933 }
 0x968   : > { %v4952_v52 = vsub.f32 %v11722_v30, %v4934_v4  ;;  %5989 = vrot.lane.b32.xlu0 %v10736_v26, %s10434_s7 }
 0x96a   : > { %v4982_v11 = vmul.f32 1.442695, %v4952_v52 }
 0x96c   : > { %10131 = vpow2.f32 %v4982_v11  ;;  %9904 = vrot.lane.b32.xlu0 %v10762_v38, %s10433_s20 }
 0x970   : > { %6082 = vrot.lane.b32.xlu0 %v10744_v29, %s10434_s7 }
 0x974   : > { %6171 = vrot.lane.b32.xlu0 %v10756_v36, %s10434_s7 }
 0x976   : > { %v11823_v13 = vpop.eup %10131 }
 0x977   : > { %v5028_v30 = vsel %vm1267_vm3, %v11823_v13, 0.0 }
 0x978   : > { %5029 = vadd.xlane.f32.xlu1 %v5028_v30  ;;  %9914 = vrot.lane.b32.xlu0 %v10784_v48, %s10433_s20 }
 0x97c   : > { %6262 = vrot.lane.b32.xlu0 %v10766_v41, %s10434_s7 }
 0x980   : > { %9924 = vrot.lane.b32.xlu0 %v10804_v58, %s10433_s20 }
 0x984   : > { %6355 = vrot.lane.b32.xlu0 %v10774_v44, %s10434_s7 }
 0x988   : > { %6444 = vrot.lane.b32.xlu0 %v10790_v51, %s10434_s7 }
 0x989   : > { %9889 = vrot.lane.b32.xlu1 %v10814_v62, %s10432_s12  ;;  %s10347_s12 = sshll.u32 %s10436_s17, 4  ;;  %s10348_s12 = int_to_ptr.vmem [resolvable:$false] %s10347_s12 }
 0x98a   : > { %p10350_p12 = scmp.lt.s32.totalorder %s12203_s9, %s10348_s12 }
 0x98c   : > { %6535 = vrot.lane.b32.xlu0 %v10798_v56, %s10434_s7 }
 0x98d   : > { %9899 = vrot.lane.b32.xlu1 %v10752_v33, %s10433_s20 }
 0x990   : > { %6626 = vrot.lane.b32.xlu0 %v10808_v61, %s10434_s7 }
 0x991   : > { %5991 = vrot.lane.b32.xlu1 %v10734_v24, %s10434_s7 }
 0x995   : > { %6080 = vrot.lane.b32.xlu1 %v10746_v31, %s10434_s7 }
 0x999   : > { %9909 = vrot.lane.b32.xlu1 %v10772_v43, %s10433_s20 }
 0x99d   : > { %6173 = vrot.lane.b32.xlu1 %v10754_v34, %s10434_s7 }
 0x99f   : > { %v4991_v26 = vpop.xlane.xlu0 %4990 }
 0x9a0   : > { %10133 = vrcp.f32 %v4991_v26  ;;  %v4988_v29 = vpop.xlane.xlu1 %4987 }
 0x9a1   : > { %10135 = vrcp.f32 %v4988_v29  ;;  %9919 = vrot.lane.b32.xlu1 %v10794_v53, %s10433_s20 }
 0x9a5   : > { %6264 = vrot.lane.b32.xlu1 %v10764_v39, %s10434_s7 }
 0x9a7   : > { %v4997_v24 = vpop.xlane.xlu0 %4996 }
 0x9a8   : > { %10137 = vrcp.f32 %v4997_v24 }
 0x9a9   : > { %6353 = vrot.lane.b32.xlu1 %v10776_v46, %s10434_s7 }
 0x9aa   : > { %v10134_v31 = vpop.eup %10133 }
 0x9ab   : > { %v10136_v36 = vpop.eup %10135  ;;  %v4994_v41 = vpop.xlane.xlu1 %4993  ;;  %v5051_v44 = vmul.f32 %v10134_v31, %v11730_v50 }
 0x9ac   : > { %10139 = vrcp.f32 %v4994_v41  ;;  %v5050_v34 = vmul.f32 %v10136_v36, %v11732_v27  ;;  %v5762_v36 = vld [vmem:[#allocation8 + $0x10] sm:$0xff] }
 0x9ad   : > { %9929 = vrot.lane.b32.xlu1 %v10814_v62, %s10433_s20  ;;  %s10349_s20 = scalar_lea.vmem %s10348_s12, 4096 }
 0x9ae   : > { %8967 = vmatprep.mubr.msk.f32.mxu0 %vm1267_vm3, %v5050_v34  ;;  %p10351_p1 = scmp.lt.s32.totalorder %s10349_s20, %s10343_s16 }
 0x9af   : > { %v5003_v51 = vpop.xlane.xlu0 %5002  ;;  %8968 = vmatmul.mubr.msk.f32.vlgmr.msra.gmra.mrb[60].mxu0 %vm1267_vm3, %v5051_v44 }
 0x9b0   : > { %10141 = vrcp.f32 %v5003_v51  ;;  %v5000_v39 = vpop.xlane.xlu1 %4999  ;;  %9410 = vmatpush3.bf16.msra.mxu0 %v11784_v15  ;;  %p10352_p2 = por %p10351_p1, %p10350_p12 }
 0x9b1   : > { %10143 = vrcp.f32 %v5000_v39  ;;  %6446 = vrot.lane.b32.xlu1 %v10786_v49, %s10434_s7 }
 0x9b2   : > { %v10138_v46 = vpop.eup %10137  ;;  %p10353_p4 = pnand %p10352_p2, %p10346_p7 }
 0x9b3   : > { %v5053_v27 = vmul.f32 %v10138_v46, %v11740_v0 }
 0x9b5   : > { %6537 = vrot.lane.b32.xlu1 %v10796_v54, %s10434_s7 }
 0x9b6   : > { %v10140_v56 = vpop.eup %10139 }
 0x9b7   : > { %v5052_v61 = vmul.f32 %v10140_v56, %v11746_v12  ;;  %v5009_v12 = vpop.xlane.xlu0 %5008 }
 0x9b8   : > { %v5006_v50 = vpop.xlane.xlu1 %5005 }
 0x9b9   : > { %10145 = vrcp.f32 %v5006_v50  ;;  %6628 = vrot.lane.b32.xlu1 %v10806_v59, %s10434_s7  ;;  %8974 = vmatprep.mubr.msk.f32.mxu1 %vm1267_vm3, %v5052_v61 }
 0x9ba   : > { %v10142_v15 = vpop.eup %10141  ;;  %8975 = vmatmul.mubr.msk.f32.vlgmr.msra.gmra.mrb[62].mxu1 %vm1267_vm3, %v5053_v27 }
 0x9bb   : > { %v10144_v49 = vpop.eup %10143  ;;  %v5055_v54 = vmul.f32 %v10142_v15, %v11750_v6 }
 0x9bc   : > { %v5054_v7 = vmul.f32 %v10144_v49, %v11752_v47 }
 0x9be   : > { %8981 = vmatprep.mubr.msk.f32.mxu0 %vm1267_vm3, %v5054_v7 }
 0x9bf   : > { %8982 = vmatmul.mubr.msk.f32.vlgmr.msra.gmra.mrb[62].mxu0 %vm1267_vm3, %v5055_v54  ;;  %v5015_v23 = vpop.xlane.xlu0 %5014 }
 0x9c0   : > { %v5012_v0 = vpop.xlane.xlu1 %5011 }
 0x9c1   : > { %10147 = vrcp.f32 %v5012_v0 }
 0x9c2   : > { %10149 = vrcp.f32 %v5015_v23 }
 0x9c3   : > { %v10146_v16 = vpop.eup %10145 }
 0x9c4   : > { %v5056_v59 = vmul.f32 %v10146_v16, %v11762_v42 }
 0x9c6   : > { %8988 = vmatprep.mubr.msk.f32.mxu1 %vm1267_vm3, %v5056_v59 }
 0x9c7   : > { %v5021_v55 = vpop.xlane.xlu0 %5020 }
 0x9c8   : > { %v5018_v37 = vpop.xlane.xlu1 %5017 }
 0x9cb   : > { %v10148_v32 = vpop.eup %10147 }
 0x9cc   : > { %v9875_v47 = vpop.permute.xlu1 %9874  ;;  %v5058_v6 = vmul.f32 %v10148_v32, %v11772_v3  ;;  %v10150_v52 = vpop.eup %10149 }
 0x9cd   : > { %v9877_v19 = vunpack.i.h.bf16 %v9875_v47  ;;  %v9876_v1 = vunpack.i.l.bf16 %v9875_v47  ;;  %v5059_v42 = vmul.f32 %v10150_v52, %v11770_v40 }
 0x9ce   : > { %8995 = vmatprep.mubr.msk.f32.mxu0 %vm1267_vm3, %v5058_v6 }
 0x9cf   : > { %v9415_v14 = vpack.c.bf16 %v9877_v19, %v9876_v1  ;;  %v5027_v4 = vpop.xlane.xlu0 %5026 }
 0x9d0   : > { %v9880_v11 = vpop.permute.xlu1 %9879  ;;  %10151 = vrcp.f32 %v5027_v4 }
 0x9d1   : > { %9416 = vmatprep.subr.bf16.mxu0 %v9415_v14  ;;  %v9882_v34 = vunpack.i.h.bf16 %v9880_v11  ;;  %v9881_v40 = vunpack.i.l.bf16 %v9880_v11 }
 0x9d2   : > { %9418 = vmatpush3.bf16.msra.mxu0 %v9415_v14 }
 0x9d3   : > { %v5024_v30 = vpop.xlane.xlu0 %5023  ;;  %v9419_v7 = vpack.c.bf16 %v9882_v34, %v9881_v40 }
 0x9d4   : > { %10153 = vrcp.f32 %v5024_v30  ;;  %v9885_v26 = vpop.permute.xlu1 %9884 }
 0x9d5   : > { %10155 = vrcp.f32 %v5009_v12  ;;  %v9887_v29 = vunpack.i.h.bf16 %v9885_v26  ;;  %v9886_v24 = vunpack.i.l.bf16 %v9885_v26  ;;  %8996 = vmatmul.mubr.msk.f32.vlgmr.msra.gmra.mrb[64].mxu0 %vm1267_vm3, %v5059_v42 }
 0x9d6   : > { %10157 = vrcp.f32 %v5018_v37 }
 0x9d7   : > { %v9423_v3 = vpack.c.bf16 %v9887_v29, %v9886_v24  ;;  %v5033_v31 = vpop.xlane.xlu0 %5032  ;;  %10159 = vrcp.f32 %v5021_v55 }
 0x9d8   : > { %10161 = vrcp.f32 %v5033_v31 }
 0x9d9   : > { %9424 = vmatprep.subr.bf16.mxu0 %v9423_v3 }
 0x9da   : > { %9426 = vmatpush3.bf16.msra.mxu0 %v9423_v3  ;;  %v10152_v39 = vpop.eup %10151 }
 0x9db   : > { %v9870_v41 = vpop.permute.xlu0 %9869  ;;  %9019 = vmatprep.subr.mxu0 %v5762_v36  ;;  %v5063_v49 = vmul.f32 %v10152_v39, %v11792_v17 }
 0x9dc   : > { %v9872_v44 = vunpack.i.h.bf16 %v9870_v41  ;;  %v9871_v51 = vunpack.i.l.bf16 %v9870_v41 }
 0x9de   : > { %v10154_v46 = vpop.eup %10153  ;;  %v9411_v56 = vpack.c.bf16 %v9872_v44, %v9871_v51 }
 0x9df   : > { %v10156_v61 = vpop.eup %10155  ;;  %v9895_v27 = vpop.permute.xlu0 %9894  ;;  %v5062_v50 = vmul.f32 %v10154_v46, %v11796_v20 }
 0x9e0   : > { %v10158_v15 = vpop.eup %10157  ;;  %9412 = vmatprep.subr.bf16.mxu1 %v9411_v56  ;;  %v5057_v54 = vmul.f32 %v10156_v61, %v11760_v35  ;;  %v9897_v6 = vunpack.i.h.bf16 %v9895_v27 }
 0x9e1   : > { %9414 = vmatpush3.bf16.msra.mxu1 %v9411_v56  ;;  %9009 = vmatprep.mubr.msk.f32.mxu0 %vm1267_vm3, %v5062_v50  ;;  %v10160_v12 = vpop.eup %10159  ;;  %v5060_v16 = vmul.f32 %v10158_v15, %v11782_v57 }
 0x9e2   : > { %9420 = vmatprep.subr.bf16.mxu1 %v9419_v7  ;;  %9010 = vmatmul.mubr.msk.f32.vlgmr.msra.gmra.mrb[66].mxu0 %vm1267_vm3, %v5063_v49  ;;  %v5061_v17 = vmul.f32 %v10160_v12, %v11780_v9  ;;  %v9896_v9 = vunpack.i.l.bf16 %v9895_v27  ;;  %v10162_v11 = vpop.eup %10161 }
 0x9e3   : > { %v5990_v0 = vpop.permute.xlu0 %5989  ;;  %9020 = vmatpush3.msra.mxu0 %v5762_v36  ;;  %v5065_v29 = vmul.f32 %v10162_v11, %v11800_v21 }
 0x9e4   : > { %8989 = vmatmul.mubr.msk.f32.vlgmr.msra.gmra.mrb[64].mxu1 %vm1267_vm3, %v5057_v54  ;;  %v9431_v52 = vpack.c.bf16 %v9897_v6, %v9896_v9 }
 0x9e5   : > { %9422 = vmatpush3.bf16.msra.mxu1 %v9419_v7  ;;  %9002 = vmatprep.mubr.msk.f32.mxu1 %vm1267_vm3, %v5060_v16 }
 0x9e7   : > { %v9905_v20 = vpop.permute.xlu0 %9904 }
 0x9e8   : > { %9003 = vmatmul.mubr.msk.f32.vlgmr.msra.gmra.mrb[66].mxu1 %vm1267_vm3, %v5061_v17  ;;  %v9906_v34 = vunpack.i.l.bf16 %v9905_v20 }
 0x9eb   : > { %v6083_v23 = vpop.permute.xlu0 %6082 }
 0x9ef   : > { %v6172_v35 = vpop.permute.xlu0 %6171 }
 0x9f3   : > { %v9915_v59 = vpop.permute.xlu0 %9914 }
 0x9f4   : > { %v9917_v37 = vunpack.i.h.bf16 %v9915_v59  ;;  %v9916_v32 = vunpack.i.l.bf16 %v9915_v59 }
 0x9f6   : > { %v11896_v55 = vpack.c.bf16 %v9917_v37, %v9916_v32 }
 0x9f7   : > { %v6263_v44 = vpop.permute.xlu0 %6262 }
 0x9f8   : > { %9457 = vmatprep.subr.msk.bf16.mxu0 %vm10832_vm2, %v11896_v55 }
 0x9fb   : > { %v9925_v61 = vpop.permute.xlu0 %9924 }
 0x9ff   : > { %v6356_v7 = vpop.permute.xlu0 %6355 }
 0xa05   : > { %v5030_v57 = vpop.xlane.xlu1 %5029 }
 0xa06   : > { %10163 = vrcp.f32 %v5030_v57  ;;  %v9927_v57 = vunpack.i.h.bf16 %v9925_v61 }
 0xa09   : > { %v9890_v47 = vpop.permute.xlu1 %9889 }
 0xa0a   : > { %v9892_v19 = vunpack.i.h.bf16 %v9890_v47  ;;  %v9891_v1 = vunpack.i.l.bf16 %v9890_v47  ;;  %v9926_v47 = vunpack.i.l.bf16 %v9925_v61 }
 0xa0c   : > { %v9427_v14 = vpack.c.bf16 %v9892_v19, %v9891_v1  ;;  %v9467_v19 = vpack.c.bf16 %v9927_v57, %v9926_v47 }
 0xa0d   : > { %v9900_v4 = vpop.permute.xlu1 %9899 }
 0xa0e   : > { %9428 = vmatprep.subr.bf16.mxu1 %v9427_v14  ;;  %v9902_v24 = vunpack.i.h.bf16 %v9900_v4  ;;  %v9901_v3 = vunpack.i.l.bf16 %v9900_v4 }
 0xa0f   : > { %9430 = vmatpush3.bf16.msra.mxu1 %v9427_v14 }
 0xa10   : > { %v10164_v42 = vpop.eup %10163  ;;  %9433 = vmatprep.subr.msk.bf16.mxu1 %vm10832_vm2, %v9431_v52  ;;  %v9437_v36 = vpack.c.bf16 %v9902_v24, %v9901_v3 }
 0xa11   : > { %v5992_v30 = vpop.permute.xlu1 %5991  ;;  %v5064_v26 = vmul.f32 %v10164_v42, %v11823_v13  ;;  %v9907_v13 = vunpack.i.h.bf16 %v9905_v20 }
 0xa13   : > { %9016 = vmatprep.mubr.msk.f32.mxu1 %vm1267_vm3, %v5064_v26  ;;  %v9443_v40 = vpack.c.bf16 %v9907_v13, %v9906_v34  ;;  %v5973_v13 = vld [vmem:[#allocation7 + $0x180] sm:$0xff] }
 0xa14   : > { %9017 = vmatmul.mubr.msk.f32.vlgmr.msra.gmra.mrb[68].mxu1 %vm1267_vm3, %v5065_v29 }
 0xa15   : > { %v6081_v31 = vpop.permute.xlu1 %6080  ;;  %9049 = vmatprep.mubr.msk.f32.mxu1 %vm560_vm1, %v5990_v0  ;;  %v6445_v0 = vpop.permute.xlu0 %6444 }
 0xa18   : > { %9436 = vmatpush3.bf16.xpose.msk.msra.mxu1 %vm10832_vm2, %v9431_v52 }
 0xa19   : > { %v9910_v41 = vpop.permute.xlu1 %9909  ;;  %9439 = vmatprep.subr.msk.bf16.mxu1 %vm10832_vm2, %v9437_v36 }
 0xa1a   : > { %v9912_v39 = vunpack.i.h.bf16 %v9910_v41  ;;  %v9911_v46 = vunpack.i.l.bf16 %v9910_v41  ;;  %v5974_v41 = vld [vmem:[#allocation7 + $0x188] sm:$0xff] }
 0xa1c   : > { %v9449_v27 = vpack.c.bf16 %v9912_v39, %v9911_v46  ;;  %v5976_v46 = vld [vmem:[#allocation7 + $0x198] sm:$0xff] }
 0xa1d   : > { %v6174_v21 = vpop.permute.xlu1 %6173 }
 0xa1f   : > { %9050 = vmatmul.mubr.msk.f32.vlgmr.msra.gmra.mrb[70].mxu1 %vm560_vm1, %v5992_v30 }
 0xa20   : > { %9442 = vmatpush3.bf16.xpose.msk.msra.mxu1 %vm10832_vm2, %v9437_v36  ;;  %9056 = vmatprep.mubr.msk.f32.mxu1 %vm560_vm1, %v6081_v31 }
 0xa21   : > { %v9920_v51 = vpop.permute.xlu1 %9919  ;;  %9445 = vmatprep.subr.msk.bf16.mxu1 %vm10832_vm2, %v9443_v40 }
 0xa22   : > { %v9922_v15 = vunpack.i.h.bf16 %v9920_v51  ;;  %v9921_v49 = vunpack.i.l.bf16 %v9920_v51 }
 0xa24   : > { %v9461_v54 = vpack.c.bf16 %v9922_v15, %v9921_v49  ;;  %v5978_v49 = vld [vmem:[#allocation7 + $0x1a8] sm:$0xff] }
 0xa25   : > { %v6265_v56 = vpop.permute.xlu1 %6264 }
 0xa27   : > { %9057 = vmatmul.mubr.msk.f32.vlgmr.msra.gmra.mrb[72].mxu1 %vm560_vm1, %v6083_v23  ;;  %v6536_v23 = vpop.permute.xlu0 %6535 }
 0xa28   : > { %9448 = vmatpush3.bf16.xpose.msk.msra.mxu1 %vm10832_vm2, %v9443_v40  ;;  %9063 = vmatprep.mubr.msk.f32.mxu1 %vm560_vm1, %v6172_v35 }
 0xa29   : > { %9451 = vmatprep.subr.msk.bf16.mxu1 %vm10832_vm2, %v9449_v27  ;;  %v11924_v50 = vpop.permute.xlu1 %6353 }
 0xa2b   : > { %v6627_v59 = vpop.permute.xlu0 %6626 }
 0xa2d   : > { %v9930_v12 = vpop.permute.xlu1 %9929 }
 0xa2e   : > { %v9932_v16 = vunpack.i.h.bf16 %v9930_v12  ;;  %v9931_v17 = vunpack.i.l.bf16 %v9930_v12 }
 0xa2f   : > { %9064 = vmatmul.mubr.msk.f32.vlgmr.msra.gmra.mrb[74].mxu1 %vm560_vm1, %v6174_v21 }
 0xa30   : > { %9454 = vmatpush3.bf16.xpose.msk.msra.mxu1 %vm10832_vm2, %v9449_v27  ;;  %9070 = vmatprep.mubr.msk.f32.mxu1 %vm560_vm1, %v6263_v44  ;;  %v9473_v20 = vpack.c.bf16 %v9932_v16, %v9931_v17 }
 0xa31   : > { %9463 = vmatprep.subr.msk.bf16.mxu1 %vm10832_vm2, %v9461_v54  ;;  %v6447_v35 = vpop.permute.xlu1 %6446 }
 0xa35   : > { %v6538_v37 = vpop.permute.xlu1 %6537 }
 0xa37   : > { %9071 = vmatmul.mubr.msk.f32.vlgmr.msra.gmra.mrb[76].mxu1 %vm560_vm1, %v6265_v56 }
 0xa38   : > { %9466 = vmatpush3.bf16.xpose.msk.msra.mxu1 %vm10832_vm2, %v9461_v54  ;;  %9084 = vmatprep.mubr.msk.f32.mxu1 %vm560_vm1, %v6445_v0  ;;  %v5977_v54 = vld [vmem:[#allocation7 + $0x1a0] sm:$0xff] }
 0xa39   : > { %9475 = vmatprep.subr.msk.bf16.mxu1 %vm10832_vm2, %v9473_v20  ;;  %v6629_v32 = vpop.permute.xlu1 %6628 }
 0xa3f   : > { %9085 = vmatmul.mubr.msk.f32.vlgmr.msra.gmra.mrb[78].mxu1 %vm560_vm1, %v6447_v35  ;;  %v5980_v35 = vld [vmem:[#allocation7 + $0x1b8] sm:$0xff] }
 0xa40   : > { %9478 = vmatpush3.bf16.xpose.msk.msra.mxu1 %vm10832_vm2, %v9473_v20  ;;  %9098 = vmatprep.mubr.msk.f32.mxu1 %vm560_vm1, %v6627_v59  ;;  %v5979_v59 = vld [vmem:[#allocation7 + $0x1b0] sm:$0xff] }
 0xa47   : > { %9099 = vmatmul.mubr.msk.f32.vlgmr.msra.gmra.mrb[80].mxu1 %vm560_vm1, %v6629_v32 }
 0xa82   : > { %v8969_v6 = vpop.f32.mrb[60].mxu0 }
 0xa83   : > { %v5144_v9 = vpop.f32.mrb[61].mxu0 }
 0xa84   : > { %9021 = vmatprep.mubr.msk.f32.mxu0 %vm560_vm1, %v5144_v9 }
 0xa85   : > { %9022 = vmatmul.mubr.msk.f32.vlgmr.msra.gmra.mrb[44].mxu0 %vm560_vm1, %v8969_v6 }
 0xa86   : > { %9460 = vmatpush3.bf16.xpose.msk.msra.mxu0 %vm10832_vm2, %v11896_v55 }
 0xa87   : > { %9469 = vmatprep.subr.msk.bf16.mxu0 %vm10832_vm2, %v9467_v19 }
 0xa8d   : > { %v8976_v1 = vpop.f32.mrb[62].mxu1 }
 0xa8e   : > { %v5231_v14 = vpop.f32.mrb[63].mxu1 }
 0xa8f   : > { %9024 = vmatprep.mubr.msk.f32.mxu0 %vm560_vm1, %v5231_v14 }
 0xa90   : > { %9025 = vmatmul.mubr.msk.f32.gmra.mrb[46].mxu0 %vm560_vm1, %v8976_v1  ;;  %v5983_v1 = vld [vmem:[#allocation7 + $0x1d0] sm:$0xff] }
 0xa92   : > { %v8983_v4 = vpop.f32.mrb[62].mxu0 }
 0xa93   : > { %v5318_v52 = vpop.f32.mrb[63].mxu0 }
 0xa94   : > { %9027 = vmatprep.mubr.msk.f32.mxu0 %vm560_vm1, %v5318_v52 }
 0xa95   : > { %9028 = vmatmul.mubr.msk.f32.gmra.mrb[48].mxu0 %vm560_vm1, %v8983_v4 }
 0xaa8   : > { %v8997_v11 = vpop.f32.mrb[64].mxu0 }
 0xaa9   : > { %v5492_v42 = vpop.f32.mrb[65].mxu0 }
 0xab5   : > { %v9011_v30 = vpop.f32.mrb[66].mxu0 }
 0xab6   : > { %v5666_v26 = vpop.f32.mrb[67].mxu0 }
 0xab7   : > { %v8990_v55 = vpop.f32.mrb[64].mxu1 }
 0xab8   : > { %v5405_v29 = vpop.f32.mrb[65].mxu1 }
 0xab9   : > { %9030 = vmatprep.mubr.msk.f32.mxu0 %vm560_vm1, %v5405_v29 }
 0xaba   : > { %9031 = vmatmul.mubr.msk.f32.gmra.mrb[50].mxu0 %vm560_vm1, %v8990_v55  ;;  %v5987_v55 = vld [vmem:[#allocation7 + $0x1f0] sm:$0xff] }
 0xabb   : > { %v9004_v24 = vpop.f32.mrb[66].mxu1  ;;  %9033 = vmatprep.mubr.msk.f32.mxu0 %vm560_vm1, %v5492_v42 }
 0xabc   : > { %v5579_v3 = vpop.f32.mrb[67].mxu1 }
 0xabe   : > { %9034 = vmatmul.mubr.msk.f32.gmra.mrb[52].mxu0 %vm560_vm1, %v8997_v11 }
 0xabf   : > { %9036 = vmatprep.mubr.msk.f32.mxu0 %vm560_vm1, %v5579_v3 }
 0xac2   : > { %9037 = vmatmul.mubr.msk.f32.gmra.mrb[54].mxu0 %vm560_vm1, %v9004_v24 }
 0xac3   : > { %9039 = vmatprep.mubr.msk.f32.mxu0 %vm560_vm1, %v5666_v26  ;;  %v5988_v26 = vld [vmem:[#allocation7 + $0x1f8] sm:$0xff] }
 0xac6   : > { %9040 = vmatmul.mubr.msk.f32.gmra.mrb[56].mxu0 %vm560_vm1, %v9011_v30 }
 0xae7   : > { %v9018_v31 = vpop.f32.mrb[68].mxu1 }
 0xae8   : > { %v5753_v36 = vpop.f32.mrb[69].mxu1 }
 0xae9   : > { %9042 = vmatprep.mubr.msk.f32.mxu0 %vm560_vm1, %v5753_v36 }
 0xaea   : > { %9043 = vmatmul.mubr.msk.f32.gmra.mrb[58].mxu0 %vm560_vm1, %v9018_v31 }
 0xaeb   : > { %9077 = vmatprep.mubr.msk.f32.mxu0 %vm560_vm1, %v11924_v50 }
 0xaee   : > { %9078 = vmatmul.mubr.msk.f32.vlgmr.msra.gmra.mrb[68].mxu0 %vm560_vm1, %v6356_v7 }
 0xaef   : > { %9472 = vmatpush3.bf16.xpose.msk.msra.mxu0 %vm10832_vm2, %v9467_v19  ;;  %9091 = vmatprep.mubr.msk.f32.mxu0 %vm560_vm1, %v6536_v23  ;;  %v5984_v19 = vld [vmem:[#allocation7 + $0x1d8] sm:$0xff] }
 0xaf2   : > { %v9051_v34 = vpop.f32.mrb[70].mxu1 }
 0xaf3   : > { %v6077_v21 = vadd.f32 %v9051_v34, %v5974_v41  ;;  %v6071_v40 = vpop.f32.mrb[71].mxu1 }
 0xaf4   : > { %v6072_v44 = vadd.f32 %v6071_v40, %v5973_v13 }
 0xaf5   : > { %v6720_v51 = vsel %vm1267_vm3, %v6077_v21, -inf }
 0xaf6   : > { %9092 = vmatmul.mubr.msk.f32.vlgmr.msra.gmra.mrb[70].mxu0 %vm560_vm1, %v6538_v37  ;;  %6721 = vmax.xlane.f32.xlu1 %v6720_v51  ;;  %v6717_v39 = vsel %vm1267_vm3, %v6072_v44, -inf }
 0xaf7   : > { %6718 = vmax.xlane.f32.xlu0 %v6717_v39 }
 0xafa   : > { %v9058_v56 = vpop.f32.mrb[72].mxu1 }
 0xafb   : > { %v6168_v61 = vadd.f32 %v9058_v56, %v5976_v46  ;;  %v6162_v27 = vpop.f32.mrb[73].mxu1 }
 0xafc   : > { %v6163_v50 = vadd.f32 %v6162_v27, %v5975_v2 }
 0xafd   : > { %v6726_v15 = vsel %vm1267_vm3, %v6168_v61, -inf }
 0xafe   : > { %6727 = vmax.xlane.f32.xlu0 %v6726_v15  ;;  %v6723_v7 = vsel %vm1267_vm3, %v6163_v50, -inf }
 0xb02   : > { %v9065_v12 = vpop.f32.mrb[74].mxu1  ;;  %6724 = vmax.xlane.f32.xlu0 %v6723_v7 }
 0xb03   : > { %v11975_v0 = vadd.f32 %v9065_v12, %v5978_v49  ;;  %v6253_v16 = vpop.f32.mrb[75].mxu1 }
 0xb04   : > { %v6254_v17 = vadd.f32 %v6253_v16, %v5977_v54 }
 0xb05   : > { %v6732_v20 = vsel %vm1267_vm3, %v11975_v0, -inf }
 0xb06   : > { %6733 = vmax.xlane.f32.xlu0 %v6732_v20  ;;  %v6729_v23 = vsel %vm1267_vm3, %v6254_v17, -inf }
 0xb07   : > { %6730 = vmax.xlane.f32.xlu1 %v6729_v23 }
 0xb0a   : > { %v9072_v37 = vpop.f32.mrb[76].mxu1 }
 0xb0b   : > { %v11980_v32 = vadd.f32 %v9072_v37, %v5980_v35  ;;  %v6344_v57 = vpop.f32.mrb[77].mxu1 }
 0xb0c   : > { %v6345_v47 = vadd.f32 %v6344_v57, %v5979_v59 }
 0xb0d   : > { %v6738_v6 = vsel %vm1267_vm3, %v11980_v32, -inf }
 0xb0e   : > { %6739 = vmax.xlane.f32.xlu0 %v6738_v6  ;;  %v6735_v9 = vsel %vm1267_vm3, %v6345_v47, -inf }
 0xb0f   : > { %6736 = vmax.xlane.f32.xlu1 %v6735_v9 }
 0xb12   : > { %v9086_v14 = vpop.f32.mrb[78].mxu1 }
 0xb13   : > { %v11985_v4 = vadd.f32 %v9086_v14, %v5984_v19  ;;  %v6526_v52 = vpop.f32.mrb[79].mxu1 }
 0xb14   : > { %v11987_v11 = vadd.f32 %v6526_v52, %v5983_v1 }
 0xb15   : > { %v6750_v42 = vsel %vm1267_vm3, %v11985_v4, -inf }
 0xb16   : > { %6751 = vmax.xlane.f32.xlu0 %v6750_v42  ;;  %v6747_v30 = vsel %vm1267_vm3, %v11987_v11, -inf }
 0xb17   : > { %6748 = vmax.xlane.f32.xlu1 %v6747_v30 }
 0xb1a   : > { %v9100_v29 = vpop.f32.mrb[80].mxu1 }
 0xb1b   : > { %v11993_v24 = vadd.f32 %v9100_v29, %v5988_v26  ;;  %v6708_v3 = vpop.f32.mrb[81].mxu1 }
 0xb1c   : > { %v11995_v31 = vadd.f32 %v6708_v3, %v5987_v55 }
 0xb1d   : > { %v6762_v36 = vsel %vm1267_vm3, %v11993_v24, -inf }
 0xb1e   : > { %6763 = vmax.xlane.f32.xlu0 %v6762_v36  ;;  %v6759_v41 = vsel %vm1267_vm3, %v11995_v31, -inf }
 0xb1f   : > { %6760 = vmax.xlane.f32.xlu1 %v6759_v41 }
 0xb83   : > { %v6722_v13 = vpop.xlane.xlu1 %6721 }
 0xb84   : > { %v6766_v34 = vsub.f32 %v6077_v21, %v6722_v13  ;;  %v6719_v40 = vpop.xlane.xlu0 %6718 }
 0xb85   : > { %v6765_v51 = vsub.f32 %v6072_v44, %v6719_v40 }
 0xb86   : > { %v6783_v39 = vmul.f32 1.442695, %v6766_v34 }
 0xb87   : > { %v6781_v46 = vmul.f32 1.442695, %v6765_v51  ;;  %v5982_v51 = vld [vmem:[#allocation7 + $0x1c8] sm:$0xff] }
 0xb88   : > { %10165 = vpow2.f32 %v6783_v39  ;;  %v5981_v39 = vld [vmem:[#allocation7 + $0x1c0] sm:$0xff] }
 0xb89   : > { %10167 = vpow2.f32 %v6781_v46 }
 0xb8b   : > { %v6728_v56 = vpop.xlane.xlu0 %6727 }
 0xb8c   : > { %v6768_v2 = vsub.f32 %v6168_v61, %v6728_v56 }
 0xb8e   : > { %v6787_v27 = vmul.f32 1.442695, %v6768_v2 }
 0xb8f   : > { %v6725_v15 = vpop.xlane.xlu0 %6724 }
 0xb90   : > { %10169 = vpow2.f32 %v6787_v27  ;;  %v6767_v49 = vsub.f32 %v6163_v50, %v6725_v15 }
 0xb92   : > { %v12001_v7 = vpop.eup %10165  ;;  %v6785_v54 = vmul.f32 1.442695, %v6767_v49 }
 0xb93   : > { %v12003_v12 = vpop.eup %10167  ;;  %v6734_v16 = vpop.xlane.xlu0 %6733  ;;  %v6816_v21 = vsel %vm1267_vm3, %v12001_v7, 0.0 }
 0xb94   : > { %10171 = vpow2.f32 %v6785_v54  ;;  %v6770_v44 = vsub.f32 %v11975_v0, %v6734_v16  ;;  %v6731_v20 = vpop.xlane.xlu1 %6730  ;;  %6817 = vadd.xlane.f32.xlu0 %v6816_v21  ;;  %v6813_v61 = vsel %vm1267_vm3, %v12003_v12, 0.0  ;;  %v5986_v54 = vld [vmem:[#allocation7 + $0x1e8] sm:$0xff]  ;;  %v5985_v16 = vld [vmem:[#allocation7 + $0x1e0] sm:$0xff] }
 0xb95   : > { %v6769_v23 = vsub.f32 %v6254_v17, %v6731_v20  ;;  %6814 = vadd.xlane.f32.xlu1 %v6813_v61 }
 0xb96   : > { %v6791_v50 = vmul.f32 1.442695, %v6770_v44 }
 0xb97   : > { %v6789_v35 = vmul.f32 1.442695, %v6769_v23 }
 0xb98   : > { %10173 = vpow2.f32 %v6791_v50 }
 0xb99   : > { %10175 = vpow2.f32 %v6789_v35 }
 0xb9a   : > { %v12010_v59 = vpop.eup %10169 }
 0xb9b   : > { %v6822_v37 = vsel %vm1267_vm3, %v12010_v59, 0.0  ;;  %v6740_v29 = vpop.xlane.xlu0 %6739 }
 0xb9c   : > { %v6737_v57 = vpop.xlane.xlu1 %6736  ;;  %6823 = vadd.xlane.f32.xlu0 %v6822_v37  ;;  %v6772_v36 = vsub.f32 %v11980_v32, %v6740_v29 }
 0xb9d   : > { %v6771_v6 = vsub.f32 %v6345_v47, %v6737_v57 }
 0xb9e   : > { %v12014_v0 = vpop.eup %10171  ;;  %v6795_v13 = vmul.f32 1.442695, %v6772_v36 }
 0xb9f   : > { %v6793_v9 = vmul.f32 1.442695, %v6771_v6  ;;  %v6819_v19 = vsel %vm1267_vm3, %v12014_v0, 0.0 }
 0xba0   : > { %6820 = vadd.xlane.f32.xlu1 %v6819_v19 }
 0xba1   : > { %10177 = vpow2.f32 %v6793_v9 }
 0xba2   : > { %v12018_v17 = vpop.eup %10173 }
 0xba3   : > { %v12020_v1 = vpop.eup %10175  ;;  %v6828_v14 = vsel %vm1267_vm3, %v12018_v17, 0.0 }
 0xba4   : > { %v6749_v52 = vpop.xlane.xlu1 %6748  ;;  %6829 = vadd.xlane.f32.xlu0 %v6828_v14  ;;  %v6825_v47 = vsel %vm1267_vm3, %v12020_v1, 0.0 }
 0xba5   : > { %v6775_v42 = vsub.f32 %v11987_v11, %v6749_v52  ;;  %6826 = vadd.xlane.f32.xlu1 %v6825_v47  ;;  %v6752_v11 = vpop.xlane.xlu0 %6751 }
 0xba6   : > { %v6776_v34 = vsub.f32 %v11985_v4, %v6752_v11 }
 0xba7   : > { %v6801_v30 = vmul.f32 1.442695, %v6775_v42 }
 0xba8   : > { %v6803_v40 = vmul.f32 1.442695, %v6776_v34 }
 0xba9   : > { %10179 = vpow2.f32 %v6801_v30 }
 0xbaa   : > { %10181 = vpow2.f32 %v6795_v13 }
 0xbab   : > { %v12027_v26 = vpop.eup %10177  ;;  %10183 = vpow2.f32 %v6803_v40  ;;  %v6764_v6 = vpop.xlane.xlu0 %6763 }
 0xbac   : > { %v6831_v55 = vsel %vm1267_vm3, %v12027_v26, 0.0  ;;  %v6761_v57 = vpop.xlane.xlu1 %6760  ;;  %v6780_v19 = vsub.f32 %v11993_v24, %v6764_v6 }
 0xbad   : > { %6832 = vadd.xlane.f32.xlu1 %v6831_v55  ;;  %v6779_v9 = vsub.f32 %v11995_v31, %v6761_v57 }
 0xbae   : > { %v6811_v52 = vmul.f32 1.442695, %v6780_v19 }
 0xbaf   : > { %v6809_v14 = vmul.f32 1.442695, %v6779_v9 }
 0xbb1   : > { %10185 = vpow2.f32 %v6809_v14 }
 0xbb2   : > { %10187 = vpow2.f32 %v6811_v52 }
 0xbb3   : > { %v12031_v3 = vpop.eup %10179 }
 0xbb4   : > { %v6843_v41 = vsel %vm1267_vm3, %v12031_v3, 0.0  ;;  %v12038_v32 = vpop.eup %10181 }
 0xbb5   : > { %6844 = vadd.xlane.f32.xlu1 %v6843_v41  ;;  %v6834_v4 = vsel %vm1267_vm3, %v12038_v32, 0.0  ;;  %v12044_v50 = vpop.eup %10183 }
 0xbb6   : > { %v6846_v37 = vsel %vm1267_vm3, %v12044_v50, 0.0 }
 0xbbb   : > { %v12055_v47 = vpop.eup %10185 }
 0xbbc   : > { %v12057_v42 = vpop.eup %10187 }
 0xbc1   : > { %v9079_v46 = vpop.f32.mrb[68].mxu0 }
 0xbc2   : > { %v6441_v56 = vadd.f32 %v9079_v46, %v5982_v51  ;;  %v6435_v2 = vpop.f32.mrb[69].mxu0 }
 0xbc3   : > { %v6436_v27 = vadd.f32 %v6435_v2, %v5981_v39 }
 0xbc4   : > { %v6744_v15 = vsel %vm1267_vm3, %v6441_v56, -inf }
 0xbc5   : > { %6745 = vmax.xlane.f32.xlu0 %v6744_v15  ;;  %v6741_v49 = vsel %vm1267_vm3, %v6436_v27, -inf }
 0xbc6   : > { %6742 = vmax.xlane.f32.xlu1 %v6741_v49 }
 0xbc9   : > { %v9093_v21 = vpop.f32.mrb[70].mxu0  ;;  %6835 = vadd.xlane.f32.xlu0 %v6834_v4 }
 0xbca   : > { %v6623_v44 = vadd.f32 %v9093_v21, %v5986_v54  ;;  %v6617_v20 = vpop.f32.mrb[71].mxu0 }
 0xbcb   : > { %v6618_v61 = vadd.f32 %v6617_v20, %v5985_v16 }
 0xbcc   : > { %v6756_v23 = vsel %vm1267_vm3, %v6623_v44, -inf }
 0xbcd   : > { %6757 = vmax.xlane.f32.xlu0 %v6756_v23  ;;  %v6753_v35 = vsel %vm1267_vm3, %v6618_v61, -inf }
 0xbce   : > { %6754 = vmax.xlane.f32.xlu1 %v6753_v35 }
 0xbd1   : > { %6847 = vadd.xlane.f32.xlu0 %v6846_v37 }
 0xbdf   : > { %9934 = vrot.lane.b32.xlu1 %v10742_v28, %s10435_s11  ;;  %v6855_v28 = vsel %vm1267_vm3, %v12055_v47, 0.0 }
 0xbe7   : > { %9939 = vrot.lane.b32.xlu0 %v10752_v33, %s10435_s11  ;;  %v6858_v33 = vsel %vm1267_vm3, %v12057_v42, 0.0 }
 0xc03   : > { %6856 = vadd.xlane.f32.xlu1 %v6855_v28 }
 0xc06   : > { %6859 = vadd.xlane.f32.xlu0 %v6858_v33 }
 0xc14   : > { %9944 = vrot.lane.b32.xlu1 %v10762_v38, %s10435_s11 }
 0xc21   : > { %v6818_v13 = vpop.xlane.xlu0 %6817 }
 0xc22   : > { %v6815_v24 = vpop.xlane.xlu1 %6814 }
 0xc23   : > { %10189 = vrcp.f32 %v6815_v24 }
 0xc29   : > { %v6824_v11 = vpop.xlane.xlu0 %6823 }
 0xc2d   : > { %v10190_v31 = vpop.eup %10189  ;;  %v6821_v30 = vpop.xlane.xlu1 %6820 }
 0xc2e   : > { %v6877_v55 = vmul.f32 %v10190_v31, %v12003_v12 }
 0xc30   : > { %9105 = vmatprep.mubr.msk.f32.mxu0 %vm1267_vm3, %v6877_v55 }
 0xc31   : > { %v12069_v40 = vpop.xlane.xlu0 %6829 }
 0xc32   : > { %v6827_v29 = vpop.xlane.xlu1 %6826 }
 0xc33   : > { %10191 = vrcp.f32 %v6827_v29 }
 0xc3a   : > { %v6833_v34 = vpop.xlane.xlu1 %6832 }
 0xc3d   : > { %v10192_v36 = vpop.eup %10191 }
 0xc3e   : > { %v6881_v41 = vmul.f32 %v10192_v36, %v12020_v1 }
 0xc40   : > { %9119 = vmatprep.mubr.msk.f32.mxu1 %vm1267_vm3, %v6881_v41 }
 0xc42   : > { %v12071_v38 = vpop.xlane.xlu1 %6844 }
 0xc52   : > { %v6746_v51 = vpop.xlane.xlu0 %6745 }
 0xc53   : > { %v6774_v39 = vsub.f32 %v6441_v56, %v6746_v51  ;;  %v6743_v46 = vpop.xlane.xlu1 %6742 }
 0xc54   : > { %v6773_v12 = vsub.f32 %v6436_v27, %v6743_v46 }
 0xc55   : > { %v6799_v2 = vmul.f32 1.442695, %v6774_v39 }
 0xc56   : > { %v6797_v15 = vmul.f32 1.442695, %v6773_v12  ;;  %v12073_v49 = vpop.xlane.xlu0 %6835 }
 0xc57   : > { %10193 = vpow2.f32 %v6799_v2 }
 0xc58   : > { %10195 = vpow2.f32 %v6797_v15 }
 0xc59   : > { %10197 = vrcp.f32 %v6818_v13 }
 0xc5a   : > { %10199 = vrcp.f32 %v6821_v30  ;;  %v6758_v1 = vpop.xlane.xlu0 %6757 }
 0xc5b   : > { %v6778_v54 = vsub.f32 %v6623_v44, %v6758_v1  ;;  %v6755_v4 = vpop.xlane.xlu1 %6754  ;;  %10201 = vrcp.f32 %v6824_v11 }
 0xc5c   : > { %v6777_v16 = vsub.f32 %v6618_v61, %v6755_v4  ;;  %10203 = vrcp.f32 %v6833_v34 }
 0xc5d   : > { %v6807_v21 = vmul.f32 1.442695, %v6778_v54 }
 0xc5e   : > { %v6805_v20 = vmul.f32 1.442695, %v6777_v16  ;;  %v12075_v23 = vpop.xlane.xlu0 %6847 }
 0xc5f   : > { %10205 = vpow2.f32 %v6807_v21  ;;  %v9935_v56 = vpop.permute.xlu1 %9934 }
 0xc60   : > { %v9937_v27 = vunpack.i.h.bf16 %v9935_v56  ;;  %v9936_v35 = vunpack.i.l.bf16 %v9935_v56  ;;  %10207 = vpow2.f32 %v6805_v20 }
 0xc61   : > { %v12077_v37 = vpop.eup %10193  ;;  %10209 = vrcp.f32 %v12069_v40 }
 0xc62   : > { %v12079_v57 = vpop.eup %10195  ;;  %v9479_v6 = vpack.c.bf16 %v9937_v27, %v9936_v35  ;;  %v9940_v9 = vpop.permute.xlu0 %9939  ;;  %v6840_v44 = vsel %vm1267_vm3, %v12077_v37, 0.0 }
 0xc63   : > { %v10198_v61 = vpop.eup %10197  ;;  %v9942_v19 = vunpack.i.h.bf16 %v9940_v9  ;;  %v9941_v14 = vunpack.i.l.bf16 %v9940_v9  ;;  %6841 = vadd.xlane.f32.xlu0 %v6840_v44  ;;  %v6837_v52 = vsel %vm1267_vm3, %v12079_v57, 0.0 }
 0xc64   : > { %v10200_v28 = vpop.eup %10199  ;;  %9480 = vmatprep.subr.bf16.mxu0 %v9479_v6  ;;  %6838 = vadd.xlane.f32.xlu1 %v6837_v52  ;;  %v6878_v24 = vmul.f32 %v10198_v61, %v12001_v7 }
 0xc65   : > { %v9483_v33 = vpack.c.bf16 %v9942_v19, %v9941_v14  ;;  %9482 = vmatpush3.bf16.msra.mxu0 %v9479_v6  ;;  %v10202_v31 = vpop.eup %10201  ;;  %v6879_v30 = vmul.f32 %v10200_v28, %v12014_v0 }
 0xc66   : > { %v10204_v55 = vpop.eup %10203  ;;  %v6880_v36 = vmul.f32 %v10202_v31, %v12010_v59 }
 0xc67   : > { %9484 = vmatprep.subr.bf16.mxu0 %v9483_v33  ;;  %v6883_v7 = vmul.f32 %v10204_v55, %v12027_v26 }
 0xc68   : > { %9106 = vmatmul.mubr.msk.f32.vlgmr.msra.gmra.mrb[72].mxu0 %vm1267_vm3, %v6878_v24 }
 0xc69   : > { %v12088_v29 = vpop.eup %10205  ;;  %9486 = vmatpush3.bf16.msra.mxu0 %v9483_v33  ;;  %9112 = vmatprep.mubr.msk.f32.mxu0 %vm1267_vm3, %v6879_v30 }
 0xc6a   : > { %v6852_v41 = vsel %vm1267_vm3, %v12088_v29, 0.0  ;;  %v12094_v13 = vpop.eup %10207 }
 0xc6b   : > { %6853 = vadd.xlane.f32.xlu0 %v6852_v41  ;;  %v6849_v0 = vsel %vm1267_vm3, %v12094_v13, 0.0 }
 0xc6c   : > { %9113 = vmatmul.mubr.msk.f32.vlgmr.msra.gmra.mrb[74].mxu0 %vm1267_vm3, %v6880_v36 }
 0xc6d   : > { %9126 = vmatprep.mubr.msk.f32.mxu0 %vm1267_vm3, %v6883_v7 }
 0xc6f   : > { %6850 = vadd.xlane.f32.xlu0 %v6849_v0 }
 0xc75   : > { %9954 = vrot.lane.b32.xlu1 %v10784_v48, %s10435_s11  ;;  %v10210_v48 = vpop.eup %10209 }
 0xc79   : > { %9959 = vrot.lane.b32.xlu1 %v10794_v53, %s10435_s11  ;;  %v6882_v53 = vmul.f32 %v10210_v48, %v12018_v17 }
 0xc7d   : > { %9964 = vrot.lane.b32.xlu1 %v10804_v58, %s10435_s11 }
 0xc81   : > { %9969 = vrot.lane.b32.xlu1 %v10814_v62, %s10435_s11 }
 0xc85   : > { %9949 = vrot.lane.b32.xlu0 %v10772_v43, %s10435_s11 }
 0xc90   : > { %v6857_v59 = vpop.xlane.xlu1 %6856 }
 0xc93   : > { %v6860_v58 = vpop.xlane.xlu0 %6859 }
 0xc94   : > { %v9945_v26 = vpop.permute.xlu1 %9944 }
 0xc95   : > { %v9947_v11 = vunpack.i.h.bf16 %v9945_v26  ;;  %v9946_v34 = vunpack.i.l.bf16 %v9945_v26 }
 0xc97   : > { %v9487_v51 = vpack.c.bf16 %v9947_v11, %v9946_v34 }
 0xc99   : > { %9488 = vmatprep.subr.bf16.mxu1 %v9487_v51 }
 0xc9a   : > { %9490 = vmatpush3.bf16.msra.mxu1 %v9487_v51 }
 0xc9d   : > { %9120 = vmatmul.mubr.msk.f32.vlgmr.msra.gmra.mrb[82].mxu1 %vm1267_vm3, %v6882_v53 }
 0xcf0   : > { %v6842_v39 = vpop.xlane.xlu0 %6841 }
 0xcf1   : > { %10211 = vrcp.f32 %v6842_v39  ;;  %v6839_v62 = vpop.xlane.xlu1 %6838 }
 0xcf2   : > { %10213 = vrcp.f32 %v6839_v62 }
 0xcf3   : > { %10215 = vrcp.f32 %v12073_v49 }
 0xcf4   : > { %10217 = vrcp.f32 %v12071_v38 }
 0xcf5   : > { %v9955_v43 = vpop.permute.xlu1 %9954 }
 0xcf6   : > { %v9957_v46 = vunpack.i.h.bf16 %v9955_v43  ;;  %v9956_v40 = vunpack.i.l.bf16 %v9955_v43 }
 0xcf8   : > { %v9495_v12 = vpack.c.bf16 %v9957_v46, %v9956_v40  ;;  %v6854_v2 = vpop.xlane.xlu0 %6853  ;;  %v8244_v40 = vld [vmem:[%s12256_s5] ss:$0 sm:$0xff] }
 0xcf9   : > { %v9960_v15 = vpop.permute.xlu1 %9959  ;;  %10219 = vrcp.f32 %v6854_v2 }
 0xcfa   : > { %9496 = vmatprep.subr.bf16.mxu1 %v9495_v12  ;;  %v9962_v38 = vunpack.i.h.bf16 %v9960_v15  ;;  %v9961_v35 = vunpack.i.l.bf16 %v9960_v15 }
 0xcfb   : > { %v10212_v1 = vpop.eup %10211  ;;  %9498 = vmatpush3.bf16.msra.mxu1 %v9495_v12 }
 0xcfc   : > { %v10214_v17 = vpop.eup %10213  ;;  %v6851_v54 = vpop.xlane.xlu0 %6850  ;;  %v6886_v21 = vmul.f32 %v10212_v1, %v12077_v37  ;;  %v9499_v61 = vpack.c.bf16 %v9962_v38, %v9961_v35 }
 0xcfd   : > { %10221 = vrcp.f32 %v6851_v54  ;;  %v9965_v4 = vpop.permute.xlu1 %9964  ;;  %v6885_v16 = vmul.f32 %v10214_v17, %v12079_v57 }
 0xcfe   : > { %10223 = vrcp.f32 %v12075_v23  ;;  %v9967_v20 = vunpack.i.h.bf16 %v9965_v4  ;;  %v9966_v56 = vunpack.i.l.bf16 %v9965_v4  ;;  %v10216_v23 = vpop.eup %10215 }
 0xcff   : > { %10225 = vrcp.f32 %v6857_v59  ;;  %9133 = vmatprep.mubr.msk.f32.mxu1 %vm1267_vm3, %v6885_v16  ;;  %v10218_v37 = vpop.eup %10217  ;;  %v6884_v33 = vmul.f32 %v10216_v23, %v12038_v32 }
 0xd00   : > { %v9503_v49 = vpack.c.bf16 %v9967_v20, %v9966_v56  ;;  %v9950_v27 = vpop.permute.xlu0 %9949  ;;  %9134 = vmatmul.mubr.msk.f32.vlgmr.msra.gmra.mrb[84].mxu1 %vm1267_vm3, %v6886_v21  ;;  %10227 = vrcp.f32 %v6860_v58  ;;  %v6887_v31 = vmul.f32 %v10218_v37, %v12031_v3 }
 0xd01   : > { %v9952_v6 = vunpack.i.h.bf16 %v9950_v27  ;;  %v9951_v9 = vunpack.i.l.bf16 %v9950_v27  ;;  %v9970_v44 = vpop.permute.xlu1 %9969 }
 0xd02   : > { %9504 = vmatprep.subr.bf16.mxu1 %v9503_v49  ;;  %v9972_v19 = vunpack.i.h.bf16 %v9970_v44  ;;  %v9971_v14 = vunpack.i.l.bf16 %v9970_v44 }
 0xd03   : > { %v9491_v57 = vpack.c.bf16 %v9952_v6, %v9951_v9  ;;  %9506 = vmatpush3.bf16.msra.mxu1 %v9503_v49  ;;  %v10220_v52 = vpop.eup %10219 }
 0xd04   : > { %v9507_v36 = vpack.c.bf16 %v9972_v19, %v9971_v14  ;;  %v6890_v41 = vmul.f32 %v10220_v52, %v12088_v29 }
 0xd05   : > { %9492 = vmatprep.subr.bf16.mxu0 %v9491_v57 }
 0xd06   : > { %9494 = vmatpush3.bf16.msra.mxu0 %v9491_v57 }
 0xd07   : > { %v10222_v28 = vpop.eup %10221  ;;  %9500 = vmatprep.subr.bf16.mxu0 %v9499_v61 }
 0xd08   : > { %v10224_v24 = vpop.eup %10223  ;;  %v6889_v30 = vmul.f32 %v10222_v28, %v12094_v13  ;;  %v7589_v13 = vld [vmem:[#allocation8 + $0x18] sm:$0xff] }
 0xd09   : > { %v10226_v55 = vpop.eup %10225  ;;  %9127 = vmatmul.mubr.msk.f32.vlgmr.msra.gmra.mrb[76].mxu0 %vm1267_vm3, %v6884_v33  ;;  %v6888_v7 = vmul.f32 %v10224_v24, %v12044_v50 }
 0xd0a   : > { %9502 = vmatpush3.bf16.msra.mxu0 %v9499_v61  ;;  %9140 = vmatprep.mubr.msk.f32.mxu0 %vm1267_vm3, %v6887_v31  ;;  %v10228_v32 = vpop.eup %10227  ;;  %v6891_v3 = vmul.f32 %v10226_v55, %v12055_v47 }
 0xd0b   : > { %9147 = vmatprep.mubr.msk.f32.mxu1 %vm1267_vm3, %v6889_v30  ;;  %9508 = vmatprep.subr.bf16.mxu0 %v9507_v36  ;;  %v6892_v29 = vmul.f32 %v10228_v32, %v12057_v42 }
 0xd0c   : > { %9148 = vmatmul.mubr.msk.f32.vlgmr.msra.gmra.mrb[86].mxu1 %vm1267_vm3, %v6890_v41 }
 0xd0d   : > { %9141 = vmatmul.mubr.msk.f32.vlgmr.msra.gmra.mrb[78].mxu0 %vm1267_vm3, %v6888_v7 }
 0xd0e   : > { %9510 = vmatpush3.bf16.msra.mxu0 %v9507_v36  ;;  %9154 = vmatprep.mubr.msk.f32.mxu0 %vm1267_vm3, %v6891_v3 }
 0xd0f   : > { %9157 = vmatprep.subr.mxu0 %v7589_v13 }
 0xd11   : > { %9155 = vmatmul.mubr.msk.f32.vlgmr.msra.gmra.mrb[80].mxu0 %vm1267_vm3, %v6892_v29 }
 0xd12   : > { %9158 = vmatpush3.msra.mxu0 %v7589_v13 }
 0xd3b   : > { %v9107_v50 = vpop.f32.mrb[72].mxu0 }
 0xd3c   : > { %v6971_v0 = vpop.f32.mrb[73].mxu0 }
 0xd3d   : > { %9159 = vmatprep.mubr.msk.f32.mxu0 %vm560_vm1, %v6971_v0 }
 0xd3e   : > { %9160 = vmatmul.mubr.msk.f32.vlgmr.msra.gmra.mrb[44].mxu0 %vm560_vm1, %v9107_v50 }
 0xd3f   : > { %v9114_v59 = vpop.f32.mrb[74].mxu0 }
 0xd40   : > { %v7058_v47 = vpop.f32.mrb[75].mxu0 }
 0xd41   : > { %9162 = vmatprep.mubr.msk.f32.mxu0 %vm560_vm1, %v7058_v47 }
 0xd42   : > { %9163 = vmatmul.mubr.msk.f32.gmra.mrb[46].mxu0 %vm560_vm1, %v9114_v59 }
 0xd70   : > { %v9121_v26 = vpop.f32.mrb[82].mxu1 }
 0xd71   : > { %v7145_v11 = vpop.f32.mrb[83].mxu1 }
 0xd72   : > { %9165 = vmatprep.mubr.msk.f32.mxu0 %vm560_vm1, %v7145_v11 }
 0xd73   : > { %9166 = vmatmul.mubr.msk.f32.gmra.mrb[48].mxu0 %vm560_vm1, %v9121_v26 }
 0xdd3   : > { %v9135_v42 = vpop.f32.mrb[84].mxu1 }
 0xdd4   : > { %v7319_v34 = vpop.f32.mrb[85].mxu1 }
 0xddc   : > { %v9128_v51 = vpop.f32.mrb[76].mxu0 }
 0xddd   : > { %v7232_v48 = vpop.f32.mrb[77].mxu0 }
 0xdde   : > { %9168 = vmatprep.mubr.msk.f32.mxu0 %vm560_vm1, %v7232_v48 }
 0xddf   : > { %v9149_v53 = vpop.f32.mrb[86].mxu1  ;;  %9169 = vmatmul.mubr.msk.f32.gmra.mrb[50].mxu0 %vm560_vm1, %v9128_v51 }
 0xde0   : > { %v7493_v58 = vpop.f32.mrb[87].mxu1  ;;  %v9142_v39 = vpop.f32.mrb[78].mxu0  ;;  %9171 = vmatprep.mubr.msk.f32.mxu0 %vm560_vm1, %v7319_v34 }
 0xde1   : > { %v7406_v62 = vpop.f32.mrb[79].mxu0 }
 0xde3   : > { %9172 = vmatmul.mubr.msk.f32.gmra.mrb[52].mxu0 %vm560_vm1, %v9135_v42 }
 0xde4   : > { %v9156_v43 = vpop.f32.mrb[80].mxu0  ;;  %9174 = vmatprep.mubr.msk.f32.mxu0 %vm560_vm1, %v7406_v62 }
 0xde5   : > { %v7580_v46 = vpop.f32.mrb[81].mxu0 }
 0xde7   : > { %9175 = vmatmul.mubr.msk.f32.gmra.mrb[54].mxu0 %vm560_vm1, %v9142_v39 }
 0xde8   : > { %9177 = vmatprep.mubr.msk.f32.mxu0 %vm560_vm1, %v7493_v58 }
 0xdeb   : > { %9178 = vmatmul.mubr.msk.f32.gmra.mrb[56].mxu0 %vm560_vm1, %v9149_v53 }
 0xdec   : > { %9180 = vmatprep.mubr.msk.f32.mxu0 %vm560_vm1, %v7580_v46 }
 0xdef   : > { %9181 = vmatmul.mubr.msk.f32.gmra.mrb[58].mxu0 %vm560_vm1, %v9156_v43 }
 0xe11   : > { %v9161_v12 = vpop.f32.mrb[44].mxu0 }
 0xe12   : > { %v7807_v2 = vadd.f32 %v9161_v12, %v8244_v40  ;;  %v7704_v15 = vpop.f32.mrb[45].mxu0 }
 0xe13   : > { %v7806_v1 = vadd.f32 %v8244_v40, %v7704_v15 }
 0xe14   : > { %7823 = vst.msk [vmem:[%s12156_s30 + $0x8] sm:$0xff] %vm344_vm0, %v7807_v2 }
 0xe15   : > { %7822 = vst.msk [vmem:[%s12156_s30] sm:$0xff] %vm344_vm0, %v7806_v1  ;;  %v9164_v17 = vpop.f32.mrb[46].mxu0 }
 0xe16   : > { %v7809_v54 = vadd.f32 %v9164_v17, %v8244_v40  ;;  %v7714_v4 = vpop.f32.mrb[47].mxu0 }
 0xe17   : > { %v7808_v16 = vadd.f32 %v8244_v40, %v7714_v4 }
 0xe18   : > { %7825 = vst.msk [vmem:[%s12156_s30 + $0x18] sm:$0xff] %vm344_vm0, %v7809_v54 }
 0xe19   : > { %7824 = vst.msk [vmem:[%s12156_s30 + $0x10] sm:$0xff] %vm344_vm0, %v7808_v16 }
 0xe46   : > { %v9167_v21 = vpop.f32.mrb[48].mxu0 }
 0xe47   : > { %v7811_v20 = vadd.f32 %v9167_v21, %v8244_v40  ;;  %v7724_v56 = vpop.f32.mrb[49].mxu0 }
 0xe48   : > { %v7810_v49 = vadd.f32 %v8244_v40, %v7724_v56 }
 0xe49   : > { %7827 = vst.msk [vmem:[%s12156_s30 + $0x28] sm:$0xff] %vm344_vm0, %v7811_v20 }
 0xe4a   : > { %7826 = vst.msk [vmem:[%s12156_s30 + $0x20] sm:$0xff] %vm344_vm0, %v7810_v49 }
 0xeb2   : > { %v9170_v27 = vpop.f32.mrb[50].mxu0 }
 0xeb3   : > { %v9513_v38 = vadd.f32 %v9170_v27, %v11638_v18  ;;  %v7734_v35 = vpop.f32.mrb[51].mxu0 }
 0xeb4   : > { %v9514_v6 = vadd.f32 %v7734_v35, %v11640_v45 }
 0xeb5   : > { %v7813_v9 = vadd.f32 %v9513_v38, %v8244_v40 }
 0xeb6   : > { %v7812_v44 = vadd.f32 %v9514_v6, %v8244_v40  ;;  %v9173_v57 = vpop.f32.mrb[52].mxu0 }
 0xeb7   : > { %7829 = vst.msk [vmem:[%s12156_s30 + $0x38] sm:$0xff] %vm344_vm0, %v7813_v9  ;;  %v9515_v23 = vadd.f32 %v9173_v57, %v11642_v63  ;;  %v7744_v37 = vpop.f32.mrb[53].mxu0 }
 0xeb8   : > { %7828 = vst.msk [vmem:[%s12156_s30 + $0x30] sm:$0xff] %vm344_vm0, %v7812_v44  ;;  %v9516_v61 = vadd.f32 %v7744_v37, %v11644_v5 }
 0xeb9   : > { %v7815_v19 = vadd.f32 %v9515_v23, %v8244_v40 }
 0xeba   : > { %v7814_v18 = vadd.f32 %v9516_v61, %v8244_v40  ;;  %v9176_v14 = vpop.f32.mrb[54].mxu0 }
 0xebb   : > { %7831 = vst.msk [vmem:[%s12156_s30 + $0x48] sm:$0xff] %vm344_vm0, %v7815_v19  ;;  %v9517_v45 = vadd.f32 %v9176_v14, %v11646_v22  ;;  %v7754_v52 = vpop.f32.mrb[55].mxu0 }
 0xebc   : > { %7830 = vst.msk [vmem:[%s12156_s30 + $0x40] sm:$0xff] %vm344_vm0, %v7814_v18  ;;  %v9518_v63 = vadd.f32 %v7754_v52, %v11648_v10 }
 0xebd   : > { %v7817_v28 = vadd.f32 %v9517_v45, %v8244_v40 }
 0xebe   : > { %v7816_v33 = vadd.f32 %v9518_v63, %v8244_v40  ;;  %v9179_v24 = vpop.f32.mrb[56].mxu0 }
 0xebf   : > { %7833 = vst.msk [vmem:[%s12156_s30 + $0x58] sm:$0xff] %vm344_vm0, %v7817_v28  ;;  %v9519_v5 = vadd.f32 %v9179_v24, %v11650_v60  ;;  %v7764_v31 = vpop.f32.mrb[57].mxu0  ;;  %v12298_v60 = vld [vmem:[#allocation17_spill] sm:$0xff] }
 0xec0   : > { %7832 = vst.msk [vmem:[%s12156_s30 + $0x50] sm:$0xff] %vm344_vm0, %v7816_v33  ;;  %v9520_v22 = vadd.f32 %v7764_v31, %v11652_v25 }
 0xec1   : > { %v7819_v30 = vadd.f32 %v9519_v5, %v8244_v40 }
 0xec2   : > { %v7818_v55 = vadd.f32 %v9520_v22, %v8244_v40  ;;  %v9182_v36 = vpop.f32.mrb[58].mxu0 }
 0xec3   : > { %7835 = vst.msk [vmem:[%s12156_s30 + $0x68] sm:$0xff] %vm344_vm0, %v7819_v30  ;;  %v9521_v10 = vadd.f32 %v9182_v36, %v11654_v8  ;;  %v7774_v41 = vpop.f32.mrb[59].mxu0 }
 0xec4   : > { %7834 = vst.msk [vmem:[%s12156_s30 + $0x60] sm:$0xff] %vm344_vm0, %v7818_v55  ;;  %v9522_v7 = vadd.f32 %v7774_v41, %v12298_v60 }
 0xec5   : > { %v7821_v32 = vadd.f32 %v9521_v10, %v8244_v40 }
 0xec6   : > { %v7820_v25 = vadd.f32 %v9522_v7, %v8244_v40 }
 0xec7   : > { %7837 = vst.msk [vmem:[%s12156_s30 + $0x78] sm:$0xff] %vm344_vm0, %v7821_v32 }
 0xec8   : > { %7836 = vst.msk [vmem:[%s12156_s30 + $0x70] sm:$0xff] %vm344_vm0, %v7820_v25 }
 0xec9   : > { %10356 = shalt.err (!%p10353_p4)
}
 0xeca   : > { %s10357_s7 = scalar_lea.hbm %s12201_s8, 2048  ;;  %s10361_s29 = scalar_lea.hbm %s12257_s6, 4096 }
 0xecb   : > { %p10358_p9 = scmp.ne.s32.totalorder %s12201_s8, %s10357_s7  ;;  %p10362_p8 = scmp.lt.u32.totalorder %s12201_s8, %s12257_s6 }
 0xecc   : > { %p10363_p13 = scmp.lt.u32.totalorder %s10361_s29, %s10357_s7  ;;  %p10365_p10 = scmp.lt.u32.totalorder %s10357_s7, %s12201_s8 }
 0xecd   : > { %p10359_p0 = pnand %p10358_p9, %p10628_p5 }
 0xece   : > { %p10364_p6 = por %p10363_p13, %p10362_p8 }
 0xecf   : > { %p10360_p11 = pneg %p10359_p0 }
 0xed0   : > { %p10366_p3 = por %p10365_p10, %p10364_p6 }
 0xed2   : > { %p10367_p7 = pnand %p10366_p3, %p10360_p11 }
 0xed4   : > { %10370 = shalt.err (!%p10367_p7)
}
 0xed5   : > { %s10437_s26 = smov 128   ;;  %s10438_s10 = smov 8  }
 0xed6   : > { %9575 = dma.vmem_to_hbm [thread:$0]  (%p10628_p5), %s12203_s9, 2048, %s12201_s8, %s7839_s25, %s10437_s26, %s10437_s26, %s10438_s10  }
 0xed7 PF: > { %s7868_s16 = sand.u32 1, %s10405_s21   ;;  %p12299_p12 = scmp.ne.s32.totalorder %s12262_s28, 0 }
 0xed8   : > { %p12300_p1 = scmp.ge.s32.totalorder %s10417_s24, 2  ;;  %s7869_s17 = scalar_lea.sflag [#allocation4], %s7868_s16 }
 0xeda   : > { %p9592_p2 = pnand %p12300_p1, %p12299_p12 }
 0xedc   : > { %10400 = dma.done.wait (!%p9592_p2), %s7869_s17, 2048  }
 0xedd   : > { %10402 = vsyncadd (!%p9592_p2), %s7869_s17, 4294965248  ;;  %p21_p4 = scmp.ge.s32.totalorder %s10614_s18, 4   ;;  %s12301_s21 = smov %s10409_s22 }
 0xede   : > { %s12302_s22 = smov %s10413_s23  ;;  %s12303_s23 = smov %s10624_s14 }
 0xedf   : > { %s12304_s24 = smov %s10614_s18  ;;  %23 = sbr.rel (!%p21_p4) target bundleno = 7 (0x7), region = 104 }
 0xee6   :  { %7874 = vsyncpa [#allocation3], 1 }
 0xee7   :  { %7876 = vsyncpa [#allocation3 + $0x1], 1 }
 0xee8   :  { %7877 = vsyncpa [#allocation6], 1 }
 0xee9   :  { %7878 = vsyncpa [#allocation9], 1 }
 0xeea   :  { %7879 = vsyncpa [#allocation4], 1 }
 0xeeb   :  { %7881 = vsyncpa [#allocation4 + $0x1], 1 }

</bundles_post_ra>
